<compile_context>
chip_gen: v7x
topology: tpu7x:2x2x1
jax: 0.10.0
libtpu: 0.0.40
codegen_flags: <defaults>
</compile_context>

<pallas_src>
import functools

import jax
import jax.numpy as jnp
from jax.experimental import pallas as pl
from jax.experimental.pallas import tpu as pltpu


def _actor_critic_kernel(adj_ref, x_ref,
                         wm_ref, ws_ref, bq_ref,     # fused QGNN (G,2H)x2, (1,2H)
                         w1_ref, b1_ref,             # actor Linear(H,H), (1,H)
                         wha_ref, whc_ref, bh_ref,   # padded heads (H,128)x2, (1,128)
                         out_ref,                    # (block_b, n, 128)
                         *, n, a_dim):
    bn = adj_ref.shape[0]          # block_b * n rows
    h = w1_ref.shape[0]            # hidden size
    pad = wha_ref.shape[1]         # 128 (lane-dense head width)
    block_b = bn // n

    adj = adj_ref[...]             # (bn, bn) block-diagonal adjacency
    x = x_ref[...]                 # (bn, G)

    # per-graph neighbour aggregation as ONE full-width MXU matmul
    agg = jnp.dot(adj, x, preferred_element_type=jnp.float32)          # (bn, G)

    # fused QGNN: actor | critic concatenated on the OUTPUT axis (no K concat)
    hq = (jnp.dot(agg, wm_ref[...], preferred_element_type=jnp.float32)
          + jnp.dot(x, ws_ref[...], preferred_element_type=jnp.float32)
          + bq_ref[...])
    hq = jnp.maximum(hq, 0.0)                                          # (bn, 2H)

    h_a = hq[:, :h]                # actor QGNN output
    h_c = hq[:, h:]                # critic QGNN output (extra ReLU is idempotent)

    # actor hidden Linear(H,H) + ReLU
    h_a = jnp.maximum(
        jnp.dot(h_a, w1_ref[...], preferred_element_type=jnp.float32) + b1_ref[...],
        0.0)

    # fused lane-dense heads: cols [0,A) actor logits, col A critic node_q, rest 0
    head = (jnp.dot(h_a, wha_ref[...], preferred_element_type=jnp.float32)
            + jnp.dot(h_c, whc_ref[...], preferred_element_type=jnp.float32)
            + bh_ref[...])                                             # (bn, 128)

    # major-dim-only reshape (layout preserving): (bn,128) -> (block_b, n, 128)
    head3 = head.reshape(block_b, n, pad)
    lane = jax.lax.broadcasted_iota(jnp.int32, head3.shape, 2)
    neg = jnp.float32(-1e30)

    # actor softmax over action lanes (exact division; pad lanes -> prob 0)
    logits = jnp.where(lane < a_dim, head3, neg)
    m = jnp.max(logits, axis=-1, keepdims=True)
    e = jnp.exp(logits - m)
    xfer = e / jnp.sum(e, axis=-1, keepdims=True)                      # (bb, n, 128)

    # critic softmax over nodes (sublane axis); computed on full vregs, only
    # lane `a_dim` is consumed.  Per-column max-shift keeps exp() bounded.
    mq = jnp.max(head3, axis=1, keepdims=True)
    eq = jnp.exp(head3 - mq)
    node = eq / jnp.sum(eq, axis=1, keepdims=True)                     # (bb, n, 128)

    # single merged, lane-dense store: col A carries node probs, cols <A xfer probs
    out_ref[...] = jnp.where(lane == a_dim, node, xfer)


def actor_critic_forward(adj, x_onehot, fused, *, block_b=32):
    """Runs the batched actor & critic networks in one Pallas kernel.

    adj      : [B, N, N] float32 dense adjacency (one graph per batch entry)
    x_onehot : [B, N, G] float32 one-hot gate types
    fused    : fused parameter dict from `fuse_params`
    returns  : (xfer_probs [B, N, A], node_probs [B, N, 1])
    """
    b_total, n, _ = adj.shape
    g = x_onehot.shape[-1]
    a_dim = fused["action_dim"]
    pad = fused["w_head_a"].shape[1]
    assert b_total % block_b == 0, "batch must be divisible by block_b"
    num_blocks = b_total // block_b
    bn = block_b * n

    # VMEM scaling guard (feedback): adjacency tile is double-buffered.
    assert 2 * bn * bn * 4 <= 16 * 1024 * 1024, \
        "adjacency tile too large for VMEM; shrink block_b or tile N"

    # Build the block-diagonal adjacency per grid block (one-time XLA prep) so
    # the aggregation is a single (bn, bn) @ (bn, G) matmul in-kernel.
    adj_blk = adj.astype(jnp.float32).reshape(num_blocks, block_b, n, n)
    eye = jnp.eye(block_b, dtype=jnp.float32)
    adj_bd = adj_blk[:, :, None, :, :] * eye[None, :, :, None, None]
    adj_bd = adj_bd.transpose(0, 1, 3, 2, 4).reshape(num_blocks * bn, bn)

    x_flat = x_onehot.astype(jnp.float32).reshape(b_total * n, g)

    const = lambda b: (0, 0)   # weights: same block every step (VMEM-resident)

    kern = functools.partial(_actor_critic_kernel, n=n, a_dim=a_dim)

    out = pl.pallas_call(
        kern,
        out_shape=jax.ShapeDtypeStruct((b_total, n, pad), jnp.float32),
        grid_spec=pltpu.PrefetchScalarGridSpec(
            num_scalar_prefetch=0,
            grid=(num_blocks,),
            in_specs=[
                pl.BlockSpec((bn, bn), lambda b: (b, 0)),     # block-diag adjacency
                pl.BlockSpec((bn, g), lambda b: (b, 0)),      # node features
                pl.BlockSpec(fused["wm"].shape, const),       # QGNN msg weights
                pl.BlockSpec(fused["ws"].shape, const),       # QGNN self weights
                pl.BlockSpec(fused["bq"].shape, const),       # QGNN bias
                pl.BlockSpec(fused["a_w1"].shape, const),     # actor Linear(H,H)
                pl.BlockSpec(fused["a_b1"].shape, const),
                pl.BlockSpec(fused["w_head_a"].shape, const), # padded actor head
                pl.BlockSpec(fused["w_head_c"].shape, const), # padded critic head
                pl.BlockSpec(fused["b_head"].shape, const),
            ],
            out_specs=pl.BlockSpec((block_b, n, pad), lambda b: (b, 0, 0)),
        ),
        compiler_params=pltpu.CompilerParams(
            dimension_semantics=("parallel",)),   # batch axis -> both TCs on v7x
    )(adj_bd, x_flat, fused["wm"], fused["ws"], fused["bq"],
      fused["a_w1"], fused["a_b1"],
      fused["w_head_a"], fused["w_head_c"], fused["b_head"])

    xfer_probs = out[..., :a_dim]
    node_probs = out[..., a_dim:a_dim + 1]
    return xfer_probs, node_probs


def init_params(key, num_gate_type, hidden_size, action_dim):
    ks = jax.random.split(key, 12)
    s = 0.1

    def w(k, shape):
        return jax.random.normal(k, shape, jnp.float32) * s

    return {
        # actor QGNN (G -> H)
        "a_wm": w(ks[0], (num_gate_type, hidden_size)),
        "a_ws": w(ks[1], (num_gate_type, hidden_size)),
        "a_b":  w(ks[2], (1, hidden_size)),
        # actor Linear(H, H)
        "a_w1": w(ks[3], (hidden_size, hidden_size)),
        "a_b1": w(ks[4], (1, hidden_size)),
        # actor Linear(H, A)
        "a_w2": w(ks[5], (hidden_size, action_dim)),
        "a_b2": w(ks[6], (1, action_dim)),
        # critic QGNN (G -> H)
        "c_wm": w(ks[7], (num_gate_type, hidden_size)),
        "c_ws": w(ks[8], (num_gate_type, hidden_size)),
        "c_b":  w(ks[9], (1, hidden_size)),
        # critic Linear(H, 1)   (source's `nn.Linear(hidden_size)` treated as H->1)
        "c_w1": w(ks[10], (hidden_size, 1)),
        "c_b1": w(ks[11], (1, 1)),
    }


def fuse_params(p, pad_to=128):
    """One-time weight fusion: actor|critic on the OUTPUT axis + 128-lane head pad."""
    h = p["a_w1"].shape[0]
    a = p["a_w2"].shape[1]
    assert a + 1 <= pad_to
    wm = jnp.concatenate([p["a_wm"], p["c_wm"]], axis=1)        # (G, 2H)
    ws = jnp.concatenate([p["a_ws"], p["c_ws"]], axis=1)        # (G, 2H)
    bq = jnp.concatenate([p["a_b"], p["c_b"]], axis=1)          # (1, 2H)
    w_head_a = jnp.zeros((h, pad_to), jnp.float32).at[:, :a].set(p["a_w2"])
    w_head_c = jnp.zeros((h, pad_to), jnp.float32).at[:, a:a + 1].set(p["c_w1"])
    b_head = (jnp.zeros((1, pad_to), jnp.float32)
              .at[:, :a].set(p["a_b2"])
              .at[:, a:a + 1].set(p["c_b1"]))
    return {"wm": wm, "ws": ws, "bq": bq,
            "a_w1": p["a_w1"], "a_b1": p["a_b1"],
            "w_head_a": w_head_a, "w_head_c": w_head_c, "b_head": b_head,
            "action_dim": a, "hidden": h}


def reference_forward(adj, x, p):
    """Pure-JAX batched reference for correctness checking (raw params)."""
    agg = jnp.einsum("bij,bjg->big", adj, x)
    h_a = jnp.maximum(jnp.einsum("bng,gh->bnh", agg, p["a_wm"])
                      + jnp.einsum("bng,gh->bnh", x, p["a_ws"]) + p["a_b"], 0.0)
    h_a = jnp.maximum(jnp.einsum("bnh,hk->bnk", h_a, p["a_w1"]) + p["a_b1"], 0.0)
    logits = jnp.einsum("bnh,ha->bna", h_a, p["a_w2"]) + p["a_b2"]
    xfer_probs = jax.nn.softmax(logits, axis=-1)

    h_c = jnp.maximum(jnp.einsum("bng,gh->bnh", agg, p["c_wm"])
                      + jnp.einsum("bng,gh->bnh", x, p["c_ws"]) + p["c_b"], 0.0)
    node_qs = jnp.einsum("bnh,hk->bnk", h_c, p["c_w1"]) + p["c_b1"]
    node_probs = jax.nn.softmax(node_qs, axis=1)
    return xfer_probs, node_probs


if __name__ == "__main__":
    # Small, module-consistent shapes; batched over B synthetic circuit graphs.
    batch = 64           # total graphs (parallel PPO envs / trajectory states)
    block_b = 32         # graphs per grid step -> 256 MXU rows, grid=(2,)
    num_nodes = 8
    num_gate_type = 4
    hidden_size = 32
    action_dim = 16

    key = jax.random.PRNGKey(0)
    k_adj, k_gate, k_par = jax.random.split(key, 3)

    # Synthetic circuit graphs: random adjacency + one-hot gate types.
    adj = (jax.random.uniform(k_adj, (batch, num_nodes, num_nodes)) > 0.6
           ).astype(jnp.float32)
    gate_types = jax.random.randint(k_gate, (batch, num_nodes), 0, num_gate_type)
    x_onehot = jax.nn.one_hot(gate_types, num_gate_type, dtype=jnp.float32)

    raw_params = init_params(k_par, num_gate_type, hidden_size, action_dim)
    fused_params = fuse_params(raw_params)

    xfer_probs, node_probs = jax.block_until_ready(
        actor_critic_forward(adj, x_onehot, fused_params, block_b=block_b))

    ref_xfer, ref_node = reference_forward(adj, x_onehot, raw_params)
    assert xfer_probs.shape == (batch, num_nodes, action_dim)
    assert node_probs.shape == (batch, num_nodes, 1)
    assert jnp.allclose(xfer_probs, ref_xfer, atol=2e-3, rtol=2e-3)
    assert jnp.allclose(node_probs, ref_node, atol=2e-3, rtol=2e-3)
    # exact softmax division -> distributions sum to 1 to f32 precision
    assert jnp.allclose(jnp.sum(xfer_probs, axis=-1), 1.0, atol=1e-4)
    assert jnp.allclose(jnp.sum(node_probs, axis=1), 1.0, atol=1e-4)

    print("KERNEL_OK")
</pallas_src>

<mosaic_0001>
module attributes {stable_mosaic.version = 11 : i64} {
  func.func @_actor_critic_kernel(%arg0: i32, %arg1: memref<256x256xf32, #tpu.memory_space<vmem>>, %arg2: memref<256x4xf32, #tpu.memory_space<vmem>>, %arg3: memref<4x64xf32, #tpu.memory_space<vmem>>, %arg4: memref<4x64xf32, #tpu.memory_space<vmem>>, %arg5: memref<1x64xf32, #tpu.memory_space<vmem>>, %arg6: memref<32x32xf32, #tpu.memory_space<vmem>>, %arg7: memref<1x32xf32, #tpu.memory_space<vmem>>, %arg8: memref<32x128xf32, #tpu.memory_space<vmem>>, %arg9: memref<32x128xf32, #tpu.memory_space<vmem>>, %arg10: memref<1x128xf32, #tpu.memory_space<vmem>>, %arg11: memref<32x8x128xf32, #tpu.memory_space<vmem>>) attributes {dimension_semantics = [#tpu.dimension_semantics<parallel>], iteration_bounds = array<i64: 2>, scalar_prefetch = 0 : i64, scratch_operands = 0 : i64, tpu.core_type = #tpu.core_type<tc>, window_params = [{transform_indices = @transform_0, window_bounds = array<i64: 256, 256>}, {transform_indices = @transform_1, window_bounds = array<i64: 256, 4>}, {pipeline_mode = #tpu.pipeline_mode<synchronous>, transform_indices = @transform_2, window_bounds = array<i64: 4, 64>}, {pipeline_mode = #tpu.pipeline_mode<synchronous>, transform_indices = @transform_3, window_bounds = array<i64: 4, 64>}, {pipeline_mode = #tpu.pipeline_mode<synchronous>, transform_indices = @transform_4, window_bounds = array<i64: 1, 64>}, {pipeline_mode = #tpu.pipeline_mode<synchronous>, transform_indices = @transform_5, window_bounds = array<i64: 32, 32>}, {pipeline_mode = #tpu.pipeline_mode<synchronous>, transform_indices = @transform_6, window_bounds = array<i64: 1, 32>}, {pipeline_mode = #tpu.pipeline_mode<synchronous>, transform_indices = @transform_7, window_bounds = array<i64: 32, 128>}, {pipeline_mode = #tpu.pipeline_mode<synchronous>, transform_indices = @transform_8, window_bounds = array<i64: 32, 128>}, {pipeline_mode = #tpu.pipeline_mode<synchronous>, transform_indices = @transform_9, window_bounds = array<i64: 1, 128>}, {transform_indices = @transform_10, window_bounds = array<i64: 32, 8, 128>}]} {
    %c0 = arith.constant 0 : index
    %c0_0 = arith.constant 0 : index
    %0 = vector.load %arg1[%c0, %c0_0] : memref<256x256xf32, #tpu.memory_space<vmem>>, vector<256x256xf32>
    %c0_1 = arith.constant 0 : index
    %c0_2 = arith.constant 0 : index
    %1 = vector.load %arg2[%c0_1, %c0_2] : memref<256x4xf32, #tpu.memory_space<vmem>>, vector<256x4xf32>
    %cst = arith.constant dense<0.000000e+00> : vector<256x4xf32>
    %2 = tpu.matmul %0, %1, %cst {dimension_numbers = #tpu.dot_dimension_numbers<[1], [0], [0], [1], [0, 0, 1, 1], [], []>} : vector<256x256xf32>, vector<256x4xf32>, vector<256x4xf32> -> vector<256x4xf32>
    %c0_3 = arith.constant 0 : index
    %c0_4 = arith.constant 0 : index
    %3 = vector.load %arg3[%c0_3, %c0_4] : memref<4x64xf32, #tpu.memory_space<vmem>>, vector<4x64xf32>
    %cst_5 = arith.constant dense<0.000000e+00> : vector<256x64xf32>
    %4 = tpu.matmul %2, %3, %cst_5 {dimension_numbers = #tpu.dot_dimension_numbers<[1], [0], [0], [1], [0, 0, 1, 1], [], []>} : vector<256x4xf32>, vector<4x64xf32>, vector<256x64xf32> -> vector<256x64xf32>
    %c0_6 = arith.constant 0 : index
    %c0_7 = arith.constant 0 : index
    %5 = vector.load %arg4[%c0_6, %c0_7] : memref<4x64xf32, #tpu.memory_space<vmem>>, vector<4x64xf32>
    %cst_8 = arith.constant dense<0.000000e+00> : vector<256x64xf32>
    %6 = tpu.matmul %1, %5, %cst_8 {dimension_numbers = #tpu.dot_dimension_numbers<[1], [0], [0], [1], [0, 0, 1, 1], [], []>} : vector<256x4xf32>, vector<4x64xf32>, vector<256x64xf32> -> vector<256x64xf32>
    %7 = arith.addf %4, %6 : vector<256x64xf32>
    %c0_9 = arith.constant 0 : index
    %c0_10 = arith.constant 0 : index
    %8 = vector.load %arg5[%c0_9, %c0_10] : memref<1x64xf32, #tpu.memory_space<vmem>>, vector<1x64xf32>
    %9 = vector.broadcast %8 : vector<1x64xf32> to vector<256x64xf32>
    %10 = arith.addf %7, %9 : vector<256x64xf32>
    %cst_11 = arith.constant 0.000000e+00 : f32
    %11 = vector.broadcast %cst_11 : f32 to vector<256x64xf32>
    %12 = arith.maximumf %10, %11 : vector<256x64xf32>
    %13 = vector.extract_strided_slice %12 {offsets = [0, 0], sizes = [256, 32], strides = [1, 1]} : vector<256x64xf32> to vector<256x32xf32>
    %14 = vector.extract_strided_slice %12 {offsets = [0, 32], sizes = [256, 32], strides = [1, 1]} : vector<256x64xf32> to vector<256x32xf32>
    %c0_12 = arith.constant 0 : index
    %c0_13 = arith.constant 0 : index
    %15 = vector.load %arg6[%c0_12, %c0_13] : memref<32x32xf32, #tpu.memory_space<vmem>>, vector<32x32xf32>
    %cst_14 = arith.constant dense<0.000000e+00> : vector<256x32xf32>
    %16 = tpu.matmul %13, %15, %cst_14 {dimension_numbers = #tpu.dot_dimension_numbers<[1], [0], [0], [1], [0, 0, 1, 1], [], []>} : vector<256x32xf32>, vector<32x32xf32>, vector<256x32xf32> -> vector<256x32xf32>
    %c0_15 = arith.constant 0 : index
    %c0_16 = arith.constant 0 : index
    %17 = vector.load %arg7[%c0_15, %c0_16] : memref<1x32xf32, #tpu.memory_space<vmem>>, vector<1x32xf32>
    %18 = vector.broadcast %17 : vector<1x32xf32> to vector<256x32xf32>
    %19 = arith.addf %16, %18 : vector<256x32xf32>
    %cst_17 = arith.constant 0.000000e+00 : f32
    %20 = vector.broadcast %cst_17 : f32 to vector<256x32xf32>
    %21 = arith.maximumf %19, %20 : vector<256x32xf32>
    %c0_18 = arith.constant 0 : index
    %c0_19 = arith.constant 0 : index
    %22 = vector.load %arg8[%c0_18, %c0_19] : memref<32x128xf32, #tpu.memory_space<vmem>>, vector<32x128xf32>
    %cst_20 = arith.constant dense<0.000000e+00> : vector<256x128xf32>
    %23 = tpu.matmul %21, %22, %cst_20 {dimension_numbers = #tpu.dot_dimension_numbers<[1], [0], [0], [1], [0, 0, 1, 1], [], []>} : vector<256x32xf32>, vector<32x128xf32>, vector<256x128xf32> -> vector<256x128xf32>
    %c0_21 = arith.constant 0 : index
    %c0_22 = arith.constant 0 : index
    %24 = vector.load %arg9[%c0_21, %c0_22] : memref<32x128xf32, #tpu.memory_space<vmem>>, vector<32x128xf32>
    %cst_23 = arith.constant dense<0.000000e+00> : vector<256x128xf32>
    %25 = tpu.matmul %14, %24, %cst_23 {dimension_numbers = #tpu.dot_dimension_numbers<[1], [0], [0], [1], [0, 0, 1, 1], [], []>} : vector<256x32xf32>, vector<32x128xf32>, vector<256x128xf32> -> vector<256x128xf32>
    %26 = arith.addf %23, %25 : vector<256x128xf32>
    %c0_24 = arith.constant 0 : index
    %c0_25 = arith.constant 0 : index
    %27 = vector.load %arg10[%c0_24, %c0_25] : memref<1x128xf32, #tpu.memory_space<vmem>>, vector<1x128xf32>
    %28 = vector.broadcast %27 : vector<1x128xf32> to vector<256x128xf32>
    %29 = arith.addf %26, %28 : vector<256x128xf32>
    %30 = vector.shape_cast %29 : vector<256x128xf32> to vector<32x8x128xf32>
    %31 = tpu.iota {dimensions = array<i32: 2>} : vector<32x8x128xi32>
    %c16_i32 = arith.constant 16 : i32
    %32 = vector.broadcast %c16_i32 : i32 to vector<32x8x128xi32>
    %33 = arith.cmpi slt, %31, %32 : vector<32x8x128xi32>
    %cst_26 = arith.constant -1.000000e+30 : f32
    %34 = vector.broadcast %cst_26 : f32 to vector<32x8x128xf32>
    %35 = arith.select %33, %30, %34 : vector<32x8x128xi1>, vector<32x8x128xf32>
    %cst_27 = arith.constant dense<0xFF800000> : vector<32x8xf32>
    %36 = vector.multi_reduction <maximumf>, %35, %cst_27 [2] : vector<32x8x128xf32> to vector<32x8xf32>
    %37 = vector.shape_cast %36 : vector<32x8xf32> to vector<32x8x1xf32>
    %38 = vector.broadcast %37 : vector<32x8x1xf32> to vector<32x8x128xf32>
    %39 = arith.subf %35, %38 : vector<32x8x128xf32>
    %40 = math.exp %39 : vector<32x8x128xf32>
    %cst_28 = arith.constant dense<0.000000e+00> : vector<32x8xf32>
    %41 = vector.multi_reduction <add>, %40, %cst_28 [2] : vector<32x8x128xf32> to vector<32x8xf32>
    %42 = vector.shape_cast %41 : vector<32x8xf32> to vector<32x8x1xf32>
    %43 = vector.broadcast %42 : vector<32x8x1xf32> to vector<32x8x128xf32>
    %44 = arith.divf %40, %43 : vector<32x8x128xf32>
    %cst_29 = arith.constant dense<0xFF800000> : vector<32x128xf32>
    %45 = vector.multi_reduction <maximumf>, %30, %cst_29 [1] : vector<32x8x128xf32> to vector<32x128xf32>
    %46 = vector.shape_cast %45 : vector<32x128xf32> to vector<32x1x128xf32>
    %47 = vector.broadcast %46 : vector<32x1x128xf32> to vector<32x8x128xf32>
    %48 = arith.subf %30, %47 : vector<32x8x128xf32>
    %49 = math.exp %48 : vector<32x8x128xf32>
    %cst_30 = arith.constant dense<0.000000e+00> : vector<32x128xf32>
    %50 = vector.multi_reduction <add>, %49, %cst_30 [1] : vector<32x8x128xf32> to vector<32x128xf32>
    %51 = vector.shape_cast %50 : vector<32x128xf32> to vector<32x1x128xf32>
    %52 = vector.broadcast %51 : vector<32x1x128xf32> to vector<32x8x128xf32>
    %53 = arith.divf %49, %52 : vector<32x8x128xf32>
    %c16_i32_31 = arith.constant 16 : i32
    %54 = vector.broadcast %c16_i32_31 : i32 to vector<32x8x128xi32>
    %55 = arith.cmpi eq, %31, %54 : vector<32x8x128xi32>
    %56 = arith.select %55, %53, %44 : vector<32x8x128xi1>, vector<32x8x128xf32>
    %c0_32 = arith.constant 0 : index
    %c0_33 = arith.constant 0 : index
    %c0_34 = arith.constant 0 : index
    %57 = vector.load %arg11[%c0_32, %c0_33, %c0_34] : memref<32x8x128xf32, #tpu.memory_space<vmem>>, vector<32x8x128xf32>
    tpu.vector_store %arg11[%c0_32, %c0_33, %c0_34], %56 {strides = array<i32>} : memref<32x8x128xf32, #tpu.memory_space<vmem>>, vector<32x8x128xf32>,
    return
  }
  func.func @transform_0(%arg0: i32) -> (i32, i32) {
    %c0_i32 = arith.constant 0 : i32
    %c0_i32_0 = arith.constant 0 : i32
    return %arg0, %c0_i32 : i32, i32
  }
  func.func @transform_1(%arg0: i32) -> (i32, i32) {
    %c0_i32 = arith.constant 0 : i32
    %c0_i32_0 = arith.constant 0 : i32
    return %arg0, %c0_i32 : i32, i32
  }
  func.func @transform_2(%arg0: i32) -> (i32, i32) {
    %c0_i32 = arith.constant 0 : i32
    %c0_i32_0 = arith.constant 0 : i32
    %c0_i32_1 = arith.constant 0 : i32
    return %c0_i32, %c0_i32_0 : i32, i32
  }
  func.func @transform_3(%arg0: i32) -> (i32, i32) {
    %c0_i32 = arith.constant 0 : i32
    %c0_i32_0 = arith.constant 0 : i32
    %c0_i32_1 = arith.constant 0 : i32
    return %c0_i32, %c0_i32_0 : i32, i32
  }
  func.func @transform_4(%arg0: i32) -> (i32, i32) {
    %c0_i32 = arith.constant 0 : i32
    %c0_i32_0 = arith.constant 0 : i32
    %c0_i32_1 = arith.constant 0 : i32
    return %c0_i32, %c0_i32_0 : i32, i32
  }
  func.func @transform_5(%arg0: i32) -> (i32, i32) {
    %c0_i32 = arith.constant 0 : i32
    %c0_i32_0 = arith.constant 0 : i32
    %c0_i32_1 = arith.constant 0 : i32
    return %c0_i32, %c0_i32_0 : i32, i32
  }
  func.func @transform_6(%arg0: i32) -> (i32, i32) {
    %c0_i32 = arith.constant 0 : i32
    %c0_i32_0 = arith.constant 0 : i32
    %c0_i32_1 = arith.constant 0 : i32
    return %c0_i32, %c0_i32_0 : i32, i32
  }
  func.func @transform_7(%arg0: i32) -> (i32, i32) {
    %c0_i32 = arith.constant 0 : i32
    %c0_i32_0 = arith.constant 0 : i32
    %c0_i32_1 = arith.constant 0 : i32
    return %c0_i32, %c0_i32_0 : i32, i32
  }
  func.func @transform_8(%arg0: i32) -> (i32, i32) {
    %c0_i32 = arith.constant 0 : i32
    %c0_i32_0 = arith.constant 0 : i32
    %c0_i32_1 = arith.constant 0 : i32
    return %c0_i32, %c0_i32_0 : i32, i32
  }
  func.func @transform_9(%arg0: i32) -> (i32, i32) {
    %c0_i32 = arith.constant 0 : i32
    %c0_i32_0 = arith.constant 0 : i32
    %c0_i32_1 = arith.constant 0 : i32
    return %c0_i32, %c0_i32_0 : i32, i32
  }
  func.func @transform_10(%arg0: i32) -> (i32, i32, i32) {
    %c0_i32 = arith.constant 0 : i32
    %c0_i32_0 = arith.constant 0 : i32
    %c0_i32_1 = arith.constant 0 : i32
    return %arg0, %c0_i32, %c0_i32_0 : i32, i32, i32
  }
}

</mosaic_0001>

<bundles_post_ra>
// kernel: tpu_custom_call.1
= control target key start
LH: loop header
LB: loop body
LE: loop exit
PB: predicated region body
PF: predicated region fallthrough
CT: control target
= control target key end

     0   :  { %15 = vsyncpa [#allocation3], 0  ;;  %s6436_s0 = inlined_call_operand.hbm [shape: f32[512,256], index: 0, kind: input, shape index: {}]   ;;  %s6437_s1 = inlined_call_operand.vmem [shape: f32[512,4], index: 1, kind: input, shape index: {}]   ;;  %s6438_s2 = inlined_call_operand.vmem [shape: f32[4,64], index: 2, kind: input, shape index: {}]   ;;  %s6439_s3 = inlined_call_operand.vmem [shape: f32[4,64], index: 3, kind: input, shape index: {}]   ;;  %s6440_s4 = inlined_call_operand.vmem [shape: f32[1,64], index: 4, kind: input, shape index: {}]   ;;  %s6441_s5 = inlined_call_operand.vmem [shape: f32[32,32], index: 5, kind: input, shape index: {}]   ;;  %s6442_s6 = inlined_call_operand.vmem [shape: f32[1,32], index: 6, kind: input, shape index: {}]   ;;  %s6443_s7 = inlined_call_operand.vmem [shape: f32[32,128], index: 7, kind: input, shape index: {}]   ;;  %s6444_s8 = inlined_call_operand.vmem [shape: f32[32,128], index: 8, kind: input, shape index: {}]   ;;  %s6445_s9 = inlined_call_operand.vmem [shape: f32[1,128], index: 9, kind: input, shape index: {}]   ;;  %s6446_s10 = inlined_call_operand.hbm [shape: f32[64,8,128], index: 10, kind: output, shape index: {}]  }
   0x1   :  { %17 = vsyncpa [#allocation3 + $0x1], 0 }
   0x2   :  { %18 = vsyncpa [#allocation4], 0 }
   0x3   :  { %20 = vsyncpa [#allocation4 + $0x1], 0  ;;  %s4796_s13 = smov 0   ;;  %s4798_s14 = smov 0  }
   0x4   :  { %s4800_s15 = smov 0   ;;  %s4802_s16 = smov 0  }
   0x5 LB: > { %s4817_s17 = sadd.s32 4294967295, %s4731_s16   ;;  %s3564_s18 = sadd.s32 4294967294, %s4731_s16   ;;  %s4731_s16 = sphi %s4802_s16, %s6597_s16   ;;  %s4727_s15 = sphi %s4800_s15, %s6596_s15   ;;  %s4723_s14 = sphi %s4798_s14, %s6595_s14   ;;  %s4719_s13 = sphi %s4796_s13, %s6594_s13  }
   0x6   : > { %s4821_s19 = sadd.s32 1, %s4731_s16   ;;  %s33_s20 = sadd.s32 1, %s4727_s15 }
   0x7   : > { %s30_s21 = ssub.s32 %s4731_s16, %s4821_s19  ;;  %p40_p0 = scmp.ne.s32.totalorder %s4727_s15, %s4723_s14 }
   0x8   : > { %p31_p1 = scmp.eq.s32.totalorder %s30_s21, 0  ;;  %p41_p2 = scmp.eq.s32.totalorder %s4731_s16, 0 }
   0x9   : > { %p46_p3 = scmp.ne.s32.totalorder %s4723_s14, %s4719_s13  ;;  %p47_p4 = scmp.eq.s32.totalorder %s4817_s17, 0 }
   0xa   : > { %s4833_s22 = scalar_select %p31_p1, %s4727_s15, %s33_s20  }
   0xb   : > { %p4835_p5 = por %p41_p2, %p40_p0  ;;  %p4839_p6 = por %p47_p4, %p46_p3 }
   0xc   : > { %6501 = sst [smem:[#allocation8_spill]] %s4833_s22  ;;  %p264_p7 = scmp.eq.s32.totalorder %s4817_s17, 1 }
   0xd   : > { %p270_p8 = scmp.eq.s32.totalorder %s3564_s18, 1  ;;  %p4339_p10 = scmp.lt.s32.totalorder %s4731_s16, 2 }
   0xe   : > { %p4846_p11 = por %p264_p7, %p40_p0  ;;  %s314_s27 = sand.u32 1, %s4727_s15  }
   0xf   : > { %p4850_p12 = por %p270_p8, %p46_p3  ;;  %s3747_s28 = sshll.u32 %s4731_s16, 13 }
  0x10   : > { %s6504_s25 = scalar_select %p4846_p11, 1, 0 }
  0x11   : > { %s6505_s26 = scalar_select %p4850_p12, 1, 0 }
  0x12   : > { %s3567_s29 = sshll.u32 %s314_s27, 9  ;;  %s4859_s12 = scalar_lea.hbm %s6436_s0, %s3747_s28 }
  0x13   : > { %s318_s18 = scalar_lea.vmem [#allocation2], %s3567_s29  ;;  %p4863_p13 = pnand %p4339_p10, %p4835_p5 }
  0x14   : > { %s326_s20 = sshll.u32 %s318_s18, 4  ;;  %s4869_s22 = scalar_lea.sflag [#allocation3], %s314_s27  ;;  %s4867_s20 = int_to_ptr.vmem [resolvable:$true] %s326_s20 }
  0x15   : > { %s4635_s30 = scalar_lea.hbm %s4859_s12, 8192  ;;  %p4637_p1 = pneg %p4863_p13 }
  0x16   : > { %p4636_p0 = scmp.ne.s32.totalorder %s4859_s12, %s4635_s30  ;;  %s4640_s29 = scalar_lea.hbm %s6436_s0, 16384 }
  0x17   : > { %p4641_p4 = scmp.lt.u32.totalorder %s4859_s12, %s6436_s0  ;;  %p4642_p5 = scmp.lt.u32.totalorder %s4640_s29, %s4635_s30 }
  0x18   : > { %p4638_p2 = pnand %p4637_p1, %p4636_p0  ;;  %p4644_p8 = scmp.lt.u32.totalorder %s4635_s30, %s4859_s12 }
  0x19   : > { %p4643_p7 = por %p4642_p5, %p4641_p4 }
  0x1a   : > { %p4639_p3 = pneg %p4638_p2 }
  0x1b   : > { %p4645_p10 = por %p4644_p8, %p4643_p7 }
  0x1d   : > { %p4646_p9 = pnand %p4645_p10, %p4639_p3 }
  0x1f   : > { %4649 = shalt.err (!%p4646_p9)
}
  0x20   : > { %s4650_s27 = scalar_lea.vmem %s4867_s20, 8192  ;;  %s4733_s28 = smov [#allocation2]  }
  0x21   : > { %p4651_p0 = scmp.ne.s32.totalorder %s4867_s20, %s4650_s27  ;;  %s4655_s23 = sshll.u32 %s4733_s28, 4  ;;  %s4656_s23 = int_to_ptr.vmem [resolvable:$false] %s4655_s23 }
  0x22   : > { %s4657_s11 = scalar_lea.vmem %s4656_s23, 16384  ;;  %p4658_p11 = scmp.lt.s32.totalorder %s4867_s20, %s4656_s23 }
  0x23   : > { %p4653_p2 = pnand %p4651_p0, %p4637_p1  ;;  %p4659_p4 = scmp.lt.s32.totalorder %s4657_s11, %s4650_s27 }
  0x25   : > { %p4654_p12 = pneg %p4653_p2  ;;  %p4660_p5 = por %p4659_p4, %p4658_p11 }
  0x27   : > { %p4661_p7 = pnand %p4660_p5, %p4654_p12 }
  0x29   : > { %4664 = shalt.err (!%p4661_p7)
}
  0x2a   : > { %s4734_s30 = smov 256   ;;  %s4735_s29 = smov 16  }
  0x2b   : > { %4334 = dma.hbm_to_vmem [thread:$0]  (!%p4863_p13), %s4859_s12, 8192, %s4867_s20, %s4869_s22, %s4734_s30, %s4734_s30, %s4735_s29  }
  0x2c   : > { %p3571_p9 = scmp.ge.s32.totalorder %s4731_s16, 1  ;;  %p343_p1 = scmp.lt.s32.totalorder %s4731_s16, 3 }
  0x2e   : > { %p344_p3 = pnand %p3571_p9, %p343_p1 }
  0x30   : > { %347 = sbr.rel (%p344_p3) target bundleno = 1449 (0x5a9), region = 60 }
  0x37   : > { %s4900_s18 = sand.u32 1, %s4723_s14  }
  0x38   : > { %s3572_s27 = sshll.u32 %s4900_s18, 9  ;;  %s350_s28 = scalar_lea.sflag [#allocation3], %s4900_s18 }
  0x39   : > { %s4904_s23 = scalar_lea.vmem [#allocation2], %s3572_s27 }
  0x3a   : > { %4710 = dma.done.wait (%p4839_p6), %s350_s28, 8192  }
  0x3b   : > { %4712 = vsyncadd (%p4839_p6), %s350_s28, 4294959104  ;;  %s3574_s22 = sshll.u32 %s4817_s17, 5  ;;  %v4736_v0 = vmov 0.0|0.0   ;;  %v404_v12 = vld [vmem:[%s4904_s23 + $0x8] sm:$0xff]  ;;  %v725_v50 = vld [vmem:[%s6439_s3] sm:$0xf] }
  0x3c   : > { %4191 = vmatprep.subr.bf16.mxu0 %v4736_v0  ;;  %p397_p11 = scmp.lt.s32.totalorder %s3574_s22, 63  ;;  %563 = vmatprep.mubr.f32.mxu0 %v404_v12  ;;  %vm823_vm0 = vcmask 1043456   ;;  %vm726_vm1 = vcmask 31744   ;;  %v724_v51 = vld [vmem:[%s6438_s2] sm:$0xf]  ;;  %v406_v53 = vld [vmem:[%s4904_s23 + $0x18] sm:$0xff] }
  0x3d   : > { %v403_v52 = vld [vmem:[%s4904_s23] sm:$0xff]  ;;  %3923 = vmatprep.subr.msk.mxu1 %vm823_vm0, %v725_v50  ;;  %v405_v54 = vld [vmem:[%s4904_s23 + $0x10] sm:$0xff]  ;;  %v408_v55 = vld [vmem:[%s4904_s23 + $0x28] sm:$0xff]  ;;  %vm1458_vm2 = vcmask 261120   ;;  %s4737_s24 = smov 96   ;;  %s3573_s29 = sshll.u32 %s4900_s18, 8 }
  0x3e   : > { %s6599_s22 = smov (!%p397_p11, %s3574_s22), 63  ;;  %3924 = vmatpush3.msk.msra.mxu1 %vm823_vm0, %v725_v50  ;;  %v407_v56 = vld [vmem:[%s4904_s23 + $0x20] sm:$0xff]  ;;  %v410_v57 = vld [vmem:[%s4904_s23 + $0x38] sm:$0xff]  ;;  %v409_v58 = vld [vmem:[%s4904_s23 + $0x30] sm:$0xff]  ;;  %s6114_s27 = scalar_lea.vmem [#allocation5], %s3573_s29 }
  0x3f   : > { %s3575_s12 = sshll.u32 %s6599_s22, 3  ;;  %3973 = vmatprep.subr.msk.mxu1 %vm823_vm0, %v724_v51  ;;  %v412_v59 = vld [vmem:[%s4904_s23 + $0x48] sm:$0xff]  ;;  %v411_v60 = vld [vmem:[%s4904_s23 + $0x40] sm:$0xff]  ;;  %v414_v61 = vld [vmem:[%s4904_s23 + $0x58] sm:$0xff]  ;;  %s3748_s28 = sshll.u32 %s4817_s17, 12 }
  0x40   : > { %s4915_s11 = scalar_lea.vmem %s6437_s1, %s3575_s12  ;;  %v413_v62 = vld [vmem:[%s4904_s23 + $0x50] sm:$0xff]  ;;  %v416_v63 = vld [vmem:[%s4904_s23 + $0x68] sm:$0xff]  ;;  %v427_v12 = vld [vmem:[%s4904_s23 + $0xc0] sm:$0xff]  ;;  %s3479_s22 = sshll.u32 %s6114_s27, 4  ;;  %s6386_s22 = int_to_ptr.vmem [resolvable:$true] %s3479_s22 }
  0x41   : > { %v4918_v1 = vld [vmem:[%s4915_s11] sm:$0xff]  ;;  %v4921_v2 = vld [vmem:[%s4915_s11 + $0x8] sm:$0xff]  ;;  %v4924_v3 = vld [vmem:[%s4915_s11 + $0x10] sm:$0xff]  ;;  %s3466_s17 = scalar_lea.sflag [#allocation4], %s4900_s18  ;;  %s4665_s21 = scalar_lea.vmem %s6386_s22, 4096 }
  0x42   : > { %v4192_v4 = vpack.c.bf16 %v4921_v2, %v4918_v1  ;;  %v4929_v5 = vld [vmem:[%s4915_s11 + $0x18] sm:$0xff]  ;;  %v4935_v7 = vld [vmem:[%s4915_s11 + $0x20] sm:$0xff]  ;;  %v4938_v8 = vld [vmem:[%s4915_s11 + $0x28] sm:$0xff]  ;;  %3925 = vmatprep.mubr.msk.f32.mxu1 %vm726_vm1, %v4918_v1  ;;  %p4666_p6 = scmp.ne.s32.totalorder %s6386_s22, %s4665_s21  ;;  %p6590_p12 = scmp.ne.s32.totalorder %s6504_s25, 0 }
  0x43   : > { %v4195_v6 = vpack.c.bf16 %v4929_v5, %v4924_v3  ;;  %v4198_v9 = vpack.c.bf16 %v4938_v8, %v4935_v7  ;;  %v4944_v10 = vld [vmem:[%s4915_s11 + $0x30] sm:$0xff]  ;;  %v4947_v11 = vld [vmem:[%s4915_s11 + $0x38] sm:$0xff]  ;;  %v4954_v14 = vld [vmem:[%s4915_s11 + $0x40] sm:$0xff]  ;;  %3926 = vmatmul.mubr.msk.f32.vlgmr.msra.gmra.mrb[0].mxu1 %vm726_vm1, %v4921_v2 }
  0x44   : > { %4193 = vmatpush1.bf16.msra.mxu0 %v4192_v4  ;;  %v4201_v13 = vpack.c.bf16 %v4947_v11, %v4944_v10  ;;  %v4957_v15 = vld [vmem:[%s4915_s11 + $0x48] sm:$0xff]  ;;  %v4963_v17 = vld [vmem:[%s4915_s11 + $0x50] sm:$0xff]  ;;  %v4966_v18 = vld [vmem:[%s4915_s11 + $0x58] sm:$0xff]  ;;  %3928 = vmatprep.mubr.msk.f32.mxu1 %vm726_vm1, %v4924_v3  ;;  %p4667_p13 = pnand %p4666_p6, %p6590_p12 }
  0x45   : > { %4194 = vmatprep.subr.bf16.mxu0 %v4736_v0  ;;  %v4204_v16 = vpack.c.bf16 %v4957_v15, %v4954_v14  ;;  %v4207_v19 = vpack.c.bf16 %v4966_v18, %v4963_v17  ;;  %v4972_v20 = vld [vmem:[%s4915_s11 + $0x60] sm:$0xff]  ;;  %v4975_v21 = vld [vmem:[%s4915_s11 + $0x68] sm:$0xff]  ;;  %v4981_v23 = vld [vmem:[%s4915_s11 + $0x70] sm:$0xff]  ;;  %3974 = vmatpush3.msk.msra.mxu1 %vm823_vm0, %v724_v51 }
  0x46   : > { %v4210_v22 = vpack.c.bf16 %v4975_v21, %v4972_v20  ;;  %v4984_v24 = vld [vmem:[%s4915_s11 + $0x78] sm:$0xff]  ;;  %v4990_v26 = vld [vmem:[%s4915_s11 + $0x80] sm:$0xff]  ;;  %v4993_v27 = vld [vmem:[%s4915_s11 + $0x88] sm:$0xff]  ;;  %p4668_p8 = pneg %p4667_p13 }
  0x47   : > { %v4213_v25 = vpack.c.bf16 %v4984_v24, %v4981_v23  ;;  %v4216_v28 = vpack.c.bf16 %v4993_v27, %v4990_v26  ;;  %v4999_v29 = vld [vmem:[%s4915_s11 + $0x90] sm:$0xff]  ;;  %v5002_v30 = vld [vmem:[%s4915_s11 + $0x98] sm:$0xff]  ;;  %v5008_v32 = vld [vmem:[%s4915_s11 + $0xa0] sm:$0xff]  ;;  %3929 = vmatmul.mubr.msk.f32.gmra.mrb[2].mxu1 %vm726_vm1, %v4929_v5 }
  0x48   : > { %4196 = vmatpush1.bf16.msra.mxu0 %v4195_v6  ;;  %v4219_v31 = vpack.c.bf16 %v5002_v30, %v4999_v29  ;;  %v5011_v33 = vld [vmem:[%s4915_s11 + $0xa8] sm:$0xff]  ;;  %v5017_v35 = vld [vmem:[%s4915_s11 + $0xb0] sm:$0xff]  ;;  %v5020_v36 = vld [vmem:[%s4915_s11 + $0xb8] sm:$0xff]  ;;  %3931 = vmatprep.mubr.msk.f32.mxu1 %vm726_vm1, %v4935_v7 }
  0x49   : > { %4197 = vmatprep.subr.bf16.mxu0 %v4736_v0  ;;  %v4222_v34 = vpack.c.bf16 %v5011_v33, %v5008_v32  ;;  %v4225_v37 = vpack.c.bf16 %v5020_v36, %v5017_v35  ;;  %v5026_v38 = vld [vmem:[%s4915_s11 + $0xc0] sm:$0xff]  ;;  %v5029_v39 = vld [vmem:[%s4915_s11 + $0xc8] sm:$0xff]  ;;  %v5035_v41 = vld [vmem:[%s4915_s11 + $0xd0] sm:$0xff] }
  0x4a   : > { %v4228_v40 = vpack.c.bf16 %v5029_v39, %v5026_v38  ;;  %v5038_v42 = vld [vmem:[%s4915_s11 + $0xd8] sm:$0xff]  ;;  %v5044_v44 = vld [vmem:[%s4915_s11 + $0xe0] sm:$0xff]  ;;  %v5047_v45 = vld [vmem:[%s4915_s11 + $0xe8] sm:$0xff] }
  0x4b   : > { %v4231_v43 = vpack.c.bf16 %v5038_v42, %v5035_v41  ;;  %v4234_v46 = vpack.c.bf16 %v5047_v45, %v5044_v44  ;;  %v5053_v47 = vld [vmem:[%s4915_s11 + $0xf0] sm:$0xff]  ;;  %v5056_v48 = vld [vmem:[%s4915_s11 + $0xf8] sm:$0xff]  ;;  %3932 = vmatmul.mubr.msk.f32.gmra.mrb[4].mxu1 %vm726_vm1, %v4938_v8  ;;  %v420_v3 = vld [vmem:[%s4904_s23 + $0x88] sm:$0xff]  ;;  %s4738_s11 = smov [#allocation5]  }
  0x4c   : > { %4199 = vmatpush1.bf16.msra.mxu0 %v4198_v9  ;;  %v4237_v49 = vpack.c.bf16 %v5056_v48, %v5053_v47  ;;  %3934 = vmatprep.mubr.msk.f32.mxu1 %vm726_vm1, %v4944_v10  ;;  %v418_v1 = vld [vmem:[%s4904_s23 + $0x78] sm:$0xff]  ;;  %v417_v2 = vld [vmem:[%s4904_s23 + $0x70] sm:$0xff]  ;;  %v419_v4 = vld [vmem:[%s4904_s23 + $0x80] sm:$0xff] }
  0x4d   : > { %4200 = vmatprep.subr.bf16.mxu0 %v4736_v0  ;;  %v422_v5 = vld [vmem:[%s4904_s23 + $0x98] sm:$0xff]  ;;  %v421_v6 = vld [vmem:[%s4904_s23 + $0x90] sm:$0xff]  ;;  %v424_v7 = vld [vmem:[%s4904_s23 + $0xa8] sm:$0xff] }
  0x4e   : > { %v423_v8 = vld [vmem:[%s4904_s23 + $0xa0] sm:$0xff]  ;;  %v426_v9 = vld [vmem:[%s4904_s23 + $0xb8] sm:$0xff]  ;;  %v425_v10 = vld [vmem:[%s4904_s23 + $0xb0] sm:$0xff] }
  0x4f   : > { %3935 = vmatmul.mubr.msk.f32.gmra.mrb[6].mxu1 %vm726_vm1, %v4947_v11  ;;  %v428_v11 = vld [vmem:[%s4904_s23 + $0xc8] sm:$0xff]  ;;  %v465_v50 = vld [vmem:[%s4904_s23 + $0x1f0] sm:$0xff]  ;;  %v1447_v51 = vld [vmem:[%s6441_s5] sm:$0xff] }
  0x50   : > { %4202 = vmatpush1.bf16.msra.mxu0 %v4201_v13  ;;  %3937 = vmatprep.mubr.msk.f32.mxu1 %vm726_vm1, %v4954_v14  ;;  %v430_v13 = vld [vmem:[%s4904_s23 + $0xd8] sm:$0xff]  ;;  %v429_v14 = vld [vmem:[%s4904_s23 + $0xd0] sm:$0xff] }
  0x51   : > { %4203 = vmatprep.subr.bf16.mxu0 %v4736_v0 }
  0x53   : > { %3938 = vmatmul.mubr.msk.f32.gmra.mrb[8].mxu1 %vm726_vm1, %v4957_v15  ;;  %v432_v15 = vld [vmem:[%s4904_s23 + $0xe8] sm:$0xff] }
  0x54   : > { %4205 = vmatpush1.bf16.msra.mxu0 %v4204_v16  ;;  %3940 = vmatprep.mubr.msk.f32.mxu1 %vm726_vm1, %v4963_v17  ;;  %v431_v16 = vld [vmem:[%s4904_s23 + $0xe0] sm:$0xff]  ;;  %v434_v17 = vld [vmem:[%s4904_s23 + $0xf8] sm:$0xff] }
  0x55   : > { %4206 = vmatprep.subr.bf16.mxu0 %v4736_v0 }
  0x57   : > { %3941 = vmatmul.mubr.msk.f32.gmra.mrb[10].mxu1 %vm726_vm1, %v4966_v18  ;;  %v433_v18 = vld [vmem:[%s4904_s23 + $0xf0] sm:$0xff] }
  0x58   : > { %4208 = vmatpush1.bf16.msra.mxu0 %v4207_v19  ;;  %3943 = vmatprep.mubr.msk.f32.mxu1 %vm726_vm1, %v4972_v20  ;;  %v436_v19 = vld [vmem:[%s4904_s23 + $0x108] sm:$0xff]  ;;  %v435_v20 = vld [vmem:[%s4904_s23 + $0x100] sm:$0xff] }
  0x59   : > { %4209 = vmatprep.subr.bf16.mxu0 %v4736_v0 }
  0x5b   : > { %3944 = vmatmul.mubr.msk.f32.gmra.mrb[12].mxu1 %vm726_vm1, %v4975_v21  ;;  %v438_v21 = vld [vmem:[%s4904_s23 + $0x118] sm:$0xff] }
  0x5c   : > { %4211 = vmatpush1.bf16.msra.mxu0 %v4210_v22  ;;  %3946 = vmatprep.mubr.msk.f32.mxu1 %vm726_vm1, %v4981_v23  ;;  %v437_v22 = vld [vmem:[%s4904_s23 + $0x110] sm:$0xff]  ;;  %v440_v23 = vld [vmem:[%s4904_s23 + $0x128] sm:$0xff] }
  0x5d   : > { %4212 = vmatprep.subr.bf16.mxu0 %v4736_v0 }
  0x5f   : > { %3947 = vmatmul.mubr.msk.f32.gmra.mrb[14].mxu1 %vm726_vm1, %v4984_v24  ;;  %v439_v24 = vld [vmem:[%s4904_s23 + $0x120] sm:$0xff] }
  0x60   : > { %4214 = vmatpush1.bf16.msra.mxu0 %v4213_v25  ;;  %3949 = vmatprep.mubr.msk.f32.mxu1 %vm726_vm1, %v4990_v26  ;;  %v442_v25 = vld [vmem:[%s4904_s23 + $0x138] sm:$0xff]  ;;  %v441_v26 = vld [vmem:[%s4904_s23 + $0x130] sm:$0xff] }
  0x61   : > { %4215 = vmatprep.subr.bf16.mxu0 %v4736_v0 }
  0x63   : > { %3950 = vmatmul.mubr.msk.f32.gmra.mrb[16].mxu1 %vm726_vm1, %v4993_v27  ;;  %v444_v27 = vld [vmem:[%s4904_s23 + $0x148] sm:$0xff] }
  0x64   : > { %4217 = vmatpush1.bf16.msra.mxu0 %v4216_v28  ;;  %3952 = vmatprep.mubr.msk.f32.mxu1 %vm726_vm1, %v4999_v29  ;;  %v443_v28 = vld [vmem:[%s4904_s23 + $0x140] sm:$0xff]  ;;  %v446_v29 = vld [vmem:[%s4904_s23 + $0x158] sm:$0xff] }
  0x65   : > { %4218 = vmatprep.subr.bf16.mxu0 %v4736_v0 }
  0x67   : > { %3953 = vmatmul.mubr.msk.f32.gmra.mrb[18].mxu1 %vm726_vm1, %v5002_v30  ;;  %v445_v30 = vld [vmem:[%s4904_s23 + $0x150] sm:$0xff] }
  0x68   : > { %4220 = vmatpush1.bf16.msra.mxu0 %v4219_v31  ;;  %3955 = vmatprep.mubr.msk.f32.mxu1 %vm726_vm1, %v5008_v32  ;;  %v448_v31 = vld [vmem:[%s4904_s23 + $0x168] sm:$0xff]  ;;  %v447_v32 = vld [vmem:[%s4904_s23 + $0x160] sm:$0xff] }
  0x69   : > { %4221 = vmatprep.subr.bf16.mxu0 %v4736_v0 }
  0x6b   : > { %3956 = vmatmul.mubr.msk.f32.gmra.mrb[20].mxu1 %vm726_vm1, %v5011_v33  ;;  %v450_v33 = vld [vmem:[%s4904_s23 + $0x178] sm:$0xff] }
  0x6c   : > { %4223 = vmatpush1.bf16.msra.mxu0 %v4222_v34  ;;  %3958 = vmatprep.mubr.msk.f32.mxu1 %vm726_vm1, %v5017_v35  ;;  %v449_v34 = vld [vmem:[%s4904_s23 + $0x170] sm:$0xff]  ;;  %v452_v35 = vld [vmem:[%s4904_s23 + $0x188] sm:$0xff] }
  0x6d   : > { %4224 = vmatprep.subr.bf16.mxu0 %v4736_v0 }
  0x6f   : > { %3959 = vmatmul.mubr.msk.f32.gmra.mrb[22].mxu1 %vm726_vm1, %v5020_v36  ;;  %v451_v36 = vld [vmem:[%s4904_s23 + $0x180] sm:$0xff] }
  0x70   : > { %4226 = vmatpush1.bf16.msra.mxu0 %v4225_v37  ;;  %3961 = vmatprep.mubr.msk.f32.mxu1 %vm726_vm1, %v5026_v38  ;;  %v454_v37 = vld [vmem:[%s4904_s23 + $0x198] sm:$0xff]  ;;  %v453_v38 = vld [vmem:[%s4904_s23 + $0x190] sm:$0xff] }
  0x71   : > { %4227 = vmatprep.subr.bf16.mxu0 %v4736_v0 }
  0x73   : > { %3962 = vmatmul.mubr.msk.f32.gmra.mrb[24].mxu1 %vm726_vm1, %v5029_v39  ;;  %v456_v39 = vld [vmem:[%s4904_s23 + $0x1a8] sm:$0xff] }
  0x74   : > { %4229 = vmatpush1.bf16.msra.mxu0 %v4228_v40  ;;  %3964 = vmatprep.mubr.msk.f32.mxu1 %vm726_vm1, %v5035_v41  ;;  %v455_v40 = vld [vmem:[%s4904_s23 + $0x1a0] sm:$0xff]  ;;  %v458_v41 = vld [vmem:[%s4904_s23 + $0x1b8] sm:$0xff] }
  0x75   : > { %4230 = vmatprep.subr.bf16.mxu0 %v4736_v0 }
  0x77   : > { %3965 = vmatmul.mubr.msk.f32.gmra.mrb[26].mxu1 %vm726_vm1, %v5038_v42  ;;  %v457_v42 = vld [vmem:[%s4904_s23 + $0x1b0] sm:$0xff] }
  0x78   : > { %4232 = vmatpush1.bf16.msra.mxu0 %v4231_v43  ;;  %3967 = vmatprep.mubr.msk.f32.mxu1 %vm726_vm1, %v5044_v44  ;;  %v460_v43 = vld [vmem:[%s4904_s23 + $0x1c8] sm:$0xff]  ;;  %v459_v44 = vld [vmem:[%s4904_s23 + $0x1c0] sm:$0xff] }
  0x79   : > { %4233 = vmatprep.subr.bf16.mxu0 %v4736_v0 }
  0x7b   : > { %3968 = vmatmul.mubr.msk.f32.gmra.mrb[28].mxu1 %vm726_vm1, %v5047_v45  ;;  %v462_v45 = vld [vmem:[%s4904_s23 + $0x1d8] sm:$0xff] }
  0x7c   : > { %4235 = vmatpush1.bf16.msra.mxu0 %v4234_v46  ;;  %3970 = vmatprep.mubr.msk.f32.mxu1 %vm726_vm1, %v5053_v47  ;;  %v461_v46 = vld [vmem:[%s4904_s23 + $0x1d0] sm:$0xff]  ;;  %v464_v47 = vld [vmem:[%s4904_s23 + $0x1e8] sm:$0xff] }
  0x7d   : > { %4236 = vmatprep.subr.bf16.mxu0 %v4736_v0  ;;  %v415_v0 = vld [vmem:[%s4904_s23 + $0x60] sm:$0xff] }
  0x7f   : > { %3971 = vmatmul.mubr.msk.f32.gmra.mrb[30].mxu1 %vm726_vm1, %v5056_v48  ;;  %v463_v48 = vld [vmem:[%s4904_s23 + $0x1e0] sm:$0xff] }
  0x80   : > { %4238 = vmatpush1.bf16.msra.mxu0 %v4237_v49  ;;  %v466_v49 = vld [vmem:[%s4904_s23 + $0x1f8] sm:$0xff]  ;;  %s6384_s23 = scalar_lea.hbm %s6446_s10, %s3748_s28 }
  0x83   : > { %564 = vmatmul.mubr.f32.vlgmr.msra.gmra.mrb[0].mxu0 %v403_v52  ;;  %v1448_v52 = vld [vmem:[%s6441_s5 + $0x8] sm:$0xff] }
  0x84   : > { %568 = vmatprep.mubr.f32.mxu0 %v406_v53  ;;  %v4239_v53 = vpack.c.bf16 %v1448_v52, %v1447_v51 }
  0x86   : > { %4240 = vmatprep.subr.bf16.mxu1 %v4239_v53 }
  0x87   : > { %569 = vmatmul.mubr.f32.gmra.mrb[2].mxu0 %v405_v54 }
  0x88   : > { %573 = vmatprep.mubr.f32.mxu0 %v408_v55 }
  0x8b   : > { %574 = vmatmul.mubr.f32.gmra.mrb[4].mxu0 %v407_v56 }
  0x8c   : > { %578 = vmatprep.mubr.f32.mxu0 %v410_v57 }
  0x8f   : > { %579 = vmatmul.mubr.f32.gmra.mrb[6].mxu0 %v409_v58 }
  0x90   : > { %583 = vmatprep.mubr.f32.mxu0 %v412_v59 }
  0x93   : > { %584 = vmatmul.mubr.f32.gmra.mrb[8].mxu0 %v411_v60 }
  0x94   : > { %588 = vmatprep.mubr.f32.mxu0 %v414_v61 }
  0x97   : > { %589 = vmatmul.mubr.f32.gmra.mrb[10].mxu0 %v413_v62 }
  0x98   : > { %593 = vmatprep.mubr.f32.mxu0 %v416_v63 }
  0x9b   : > { %594 = vmatmul.mubr.f32.gmra.mrb[12].mxu0 %v415_v0 }
  0x9c   : > { %598 = vmatprep.mubr.f32.mxu0 %v418_v1 }
  0x9f   : > { %599 = vmatmul.mubr.f32.gmra.mrb[14].mxu0 %v417_v2 }
  0xa0   : > { %603 = vmatprep.mubr.f32.mxu0 %v420_v3 }
  0xa3   : > { %604 = vmatmul.mubr.f32.gmra.mrb[16].mxu0 %v419_v4 }
  0xa4   : > { %608 = vmatprep.mubr.f32.mxu0 %v422_v5 }
  0xa7   : > { %609 = vmatmul.mubr.f32.gmra.mrb[18].mxu0 %v421_v6 }
  0xa8   : > { %613 = vmatprep.mubr.f32.mxu0 %v424_v7 }
  0xab   : > { %614 = vmatmul.mubr.f32.gmra.mrb[20].mxu0 %v423_v8 }
  0xac   : > { %618 = vmatprep.mubr.f32.mxu0 %v426_v9 }
  0xaf   : > { %619 = vmatmul.mubr.f32.gmra.mrb[22].mxu0 %v425_v10 }
  0xb0   : > { %623 = vmatprep.mubr.f32.mxu0 %v428_v11 }
  0xb3   : > { %624 = vmatmul.mubr.f32.gmra.mrb[24].mxu0 %v427_v12 }
  0xb4   : > { %628 = vmatprep.mubr.f32.mxu0 %v430_v13 }
  0xb7   : > { %629 = vmatmul.mubr.f32.gmra.mrb[26].mxu0 %v429_v14 }
  0xb8   : > { %633 = vmatprep.mubr.f32.mxu0 %v432_v15 }
  0xbb   : > { %634 = vmatmul.mubr.f32.gmra.mrb[28].mxu0 %v431_v16 }
  0xbc   : > { %638 = vmatprep.mubr.f32.mxu0 %v434_v17 }
  0xbf   : > { %639 = vmatmul.mubr.f32.gmra.mrb[30].mxu0 %v433_v18 }
  0xc0   : > { %643 = vmatprep.mubr.f32.mxu0 %v436_v19 }
  0xc3   : > { %644 = vmatmul.mubr.f32.gmra.mrb[32].mxu0 %v435_v20 }
  0xc4   : > { %648 = vmatprep.mubr.f32.mxu0 %v438_v21 }
  0xc7   : > { %649 = vmatmul.mubr.f32.gmra.mrb[34].mxu0 %v437_v22 }
  0xc8   : > { %653 = vmatprep.mubr.f32.mxu0 %v440_v23 }
  0xcb   : > { %654 = vmatmul.mubr.f32.gmra.mrb[36].mxu0 %v439_v24 }
  0xcc   : > { %658 = vmatprep.mubr.f32.mxu0 %v442_v25 }
  0xcf   : > { %659 = vmatmul.mubr.f32.gmra.mrb[38].mxu0 %v441_v26 }
  0xd0   : > { %663 = vmatprep.mubr.f32.mxu0 %v444_v27 }
  0xd3   : > { %664 = vmatmul.mubr.f32.gmra.mrb[40].mxu0 %v443_v28 }
  0xd4   : > { %668 = vmatprep.mubr.f32.mxu0 %v446_v29 }
  0xd7   : > { %669 = vmatmul.mubr.f32.gmra.mrb[42].mxu0 %v445_v30 }
  0xd8   : > { %673 = vmatprep.mubr.f32.mxu0 %v448_v31 }
  0xdb   : > { %674 = vmatmul.mubr.f32.gmra.mrb[44].mxu0 %v447_v32 }
  0xdc   : > { %678 = vmatprep.mubr.f32.mxu0 %v450_v33 }
  0xdf   : > { %679 = vmatmul.mubr.f32.gmra.mrb[46].mxu0 %v449_v34 }
  0xe0   : > { %683 = vmatprep.mubr.f32.mxu0 %v452_v35  ;;  %v1449_v35 = vld [vmem:[%s6441_s5 + $0x10] sm:$0xff] }
  0xe3   : > { %684 = vmatmul.mubr.f32.gmra.mrb[48].mxu0 %v451_v36  ;;  %v1450_v36 = vld [vmem:[%s6441_s5 + $0x18] sm:$0xff] }
  0xe4   : > { %688 = vmatprep.mubr.f32.mxu0 %v454_v37 }
  0xe7   : > { %689 = vmatmul.mubr.f32.gmra.mrb[50].mxu0 %v453_v38  ;;  %v4243_v38 = vpack.c.bf16 %v1450_v36, %v1449_v35 }
  0xe8   : > { %693 = vmatprep.mubr.f32.mxu0 %v456_v39 }
  0xeb   : > { %694 = vmatmul.mubr.f32.gmra.mrb[52].mxu0 %v455_v40 }
  0xec   : > { %698 = vmatprep.mubr.f32.mxu0 %v458_v41 }
  0xef   : > { %699 = vmatmul.mubr.f32.gmra.mrb[54].mxu0 %v457_v42 }
  0xf0   : > { %703 = vmatprep.mubr.f32.mxu0 %v460_v43 }
  0xf3   : > { %704 = vmatmul.mubr.f32.gmra.mrb[56].mxu0 %v459_v44 }
  0xf4   : > { %708 = vmatprep.mubr.f32.mxu0 %v462_v45 }
  0xf7   : > { %709 = vmatmul.mubr.f32.gmra.mrb[58].mxu0 %v461_v46 }
  0xf8   : > { %713 = vmatprep.mubr.f32.mxu0 %v464_v47 }
  0xfb   : > { %714 = vmatmul.mubr.f32.gmra.mrb[60].mxu0 %v463_v48 }
  0xfc   : > { %718 = vmatprep.mubr.f32.mxu0 %v466_v49 }
  0xff   : > { %719 = vmatmul.mubr.f32.gmra.mrb[62].mxu0 %v465_v50 }
 0x156   : > { %v565_v54 = vpop.f32.mrb[0].mxu0 }
 0x157   : > { %v567_v55 = vpop.f32.mrb[1].mxu0  ;;  %3975 = vmatprep.mubr.msk.f32.mxu1 %vm726_vm1, %v565_v54 }
 0x15a   : > { %v570_v56 = vpop.f32.mrb[2].mxu0 }
 0x15b   : > { %v572_v57 = vpop.f32.mrb[3].mxu0  ;;  %3976 = vmatmul.mubr.msk.f32.vlgmr.msra.gmra.mrb[0].mxu1 %vm726_vm1, %v570_v56 }
 0x15c   : > { %4242 = vmatpush3.bf16.msra.mxu1 %v4239_v53  ;;  %v1816_v57 = vld [vmem:[%s6444_s8] sm:$0xff] }
 0x15d   : > { %4244 = vmatprep.subr.bf16.mxu1 %v4243_v38 }
 0x15e   : > { %v575_v58 = vpop.f32.mrb[4].mxu0 }
 0x15f   : > { %v577_v59 = vpop.f32.mrb[5].mxu0  ;;  %3978 = vmatprep.mubr.msk.f32.mxu1 %vm726_vm1, %v575_v58  ;;  %v1817_v58 = vld [vmem:[%s6444_s8 + $0x8] sm:$0xff] }
 0x160   : > { %4246 = vmatpush3.bf16.msra.mxu1 %v4243_v38  ;;  %v4247_v59 = vpack.c.bf16 %v1817_v58, %v1816_v57 }
 0x162   : > { %v580_v60 = vpop.f32.mrb[6].mxu0  ;;  %4248 = vmatprep.subr.bf16.mxu1 %v4247_v59 }
 0x163   : > { %v582_v61 = vpop.f32.mrb[7].mxu0  ;;  %3979 = vmatmul.mubr.msk.f32.gmra.mrb[2].mxu1 %vm726_vm1, %v580_v60  ;;  %v5247_v60 = vld [vmem:[%s6440_s4] ss:$0 sm:$0xff] }
 0x166   : > { %v585_v62 = vpop.f32.mrb[8].mxu0 }
 0x167   : > { %v587_v63 = vpop.f32.mrb[9].mxu0  ;;  %3981 = vmatprep.mubr.msk.f32.mxu1 %vm726_vm1, %v585_v62 }
 0x16a   : > { %v590_v0 = vpop.f32.mrb[10].mxu0 }
 0x16b   : > { %v592_v1 = vpop.f32.mrb[11].mxu0  ;;  %3982 = vmatmul.mubr.msk.f32.gmra.mrb[4].mxu1 %vm726_vm1, %v590_v0 }
 0x16c   : > { %v1818_v1 = vld [vmem:[%s6444_s8 + $0x10] sm:$0xff] }
 0x16e   : > { %v595_v2 = vpop.f32.mrb[12].mxu0 }
 0x16f   : > { %v597_v3 = vpop.f32.mrb[13].mxu0  ;;  %3984 = vmatprep.mubr.msk.f32.mxu1 %vm726_vm1, %v595_v2  ;;  %v1819_v2 = vld [vmem:[%s6444_s8 + $0x18] sm:$0xff] }
 0x172   : > { %v600_v4 = vpop.f32.mrb[14].mxu0 }
 0x173   : > { %v602_v5 = vpop.f32.mrb[15].mxu0  ;;  %3985 = vmatmul.mubr.msk.f32.gmra.mrb[6].mxu1 %vm726_vm1, %v600_v4 }
 0x174   : > { %v4251_v5 = vpack.c.bf16 %v1819_v2, %v1818_v1 }
 0x176   : > { %v605_v6 = vpop.f32.mrb[16].mxu0 }
 0x177   : > { %v607_v7 = vpop.f32.mrb[17].mxu0  ;;  %3987 = vmatprep.mubr.msk.f32.mxu1 %vm726_vm1, %v605_v6 }
 0x17a   : > { %v610_v8 = vpop.f32.mrb[18].mxu0 }
 0x17b   : > { %v612_v9 = vpop.f32.mrb[19].mxu0  ;;  %3988 = vmatmul.mubr.msk.f32.gmra.mrb[8].mxu1 %vm726_vm1, %v610_v8 }
 0x17e   : > { %v615_v10 = vpop.f32.mrb[20].mxu0 }
 0x17f   : > { %v617_v11 = vpop.f32.mrb[21].mxu0  ;;  %3990 = vmatprep.mubr.msk.f32.mxu1 %vm726_vm1, %v615_v10 }
 0x182   : > { %v620_v12 = vpop.f32.mrb[22].mxu0 }
 0x183   : > { %v622_v13 = vpop.f32.mrb[23].mxu0  ;;  %3991 = vmatmul.mubr.msk.f32.gmra.mrb[10].mxu1 %vm726_vm1, %v620_v12 }
 0x186   : > { %v625_v14 = vpop.f32.mrb[24].mxu0 }
 0x187   : > { %v627_v15 = vpop.f32.mrb[25].mxu0  ;;  %3993 = vmatprep.mubr.msk.f32.mxu1 %vm726_vm1, %v625_v14 }
 0x18a   : > { %v630_v16 = vpop.f32.mrb[26].mxu0 }
 0x18b   : > { %v632_v17 = vpop.f32.mrb[27].mxu0  ;;  %3994 = vmatmul.mubr.msk.f32.gmra.mrb[12].mxu1 %vm726_vm1, %v630_v16 }
 0x18e   : > { %v635_v18 = vpop.f32.mrb[28].mxu0 }
 0x18f   : > { %v637_v19 = vpop.f32.mrb[29].mxu0  ;;  %3996 = vmatprep.mubr.msk.f32.mxu1 %vm726_vm1, %v635_v18  ;;  %v1812_v18 = vld [vmem:[%s6443_s7] sm:$0xff] }
 0x190   : > { %v1813_v19 = vld [vmem:[%s6443_s7 + $0x8] sm:$0xff] }
 0x192   : > { %v640_v20 = vpop.f32.mrb[30].mxu0 }
 0x193   : > { %v642_v21 = vpop.f32.mrb[31].mxu0  ;;  %3997 = vmatmul.mubr.msk.f32.gmra.mrb[14].mxu1 %vm726_vm1, %v640_v20 }
 0x194   : > { %v4255_v21 = vpack.c.bf16 %v1813_v19, %v1812_v18 }
 0x196   : > { %v645_v22 = vpop.f32.mrb[32].mxu0  ;;  %4256 = vmatprep.subr.bf16.mxu0 %v4255_v21 }
 0x197   : > { %v647_v23 = vpop.f32.mrb[33].mxu0  ;;  %3999 = vmatprep.mubr.msk.f32.mxu1 %vm726_vm1, %v645_v22  ;;  %4258 = vmatpush3.bf16.msra.mxu0 %v4255_v21 }
 0x19a   : > { %v650_v24 = vpop.f32.mrb[34].mxu0 }
 0x19b   : > { %v652_v25 = vpop.f32.mrb[35].mxu0  ;;  %4000 = vmatmul.mubr.msk.f32.gmra.mrb[16].mxu1 %vm726_vm1, %v650_v24 }
 0x19e   : > { %v655_v26 = vpop.f32.mrb[36].mxu0 }
 0x19f   : > { %v657_v27 = vpop.f32.mrb[37].mxu0  ;;  %4002 = vmatprep.mubr.msk.f32.mxu1 %vm726_vm1, %v655_v26 }
 0x1a2   : > { %v660_v28 = vpop.f32.mrb[38].mxu0 }
 0x1a3   : > { %v662_v29 = vpop.f32.mrb[39].mxu0  ;;  %4003 = vmatmul.mubr.msk.f32.gmra.mrb[18].mxu1 %vm726_vm1, %v660_v28 }
 0x1a6   : > { %v665_v30 = vpop.f32.mrb[40].mxu0 }
 0x1a7   : > { %v667_v31 = vpop.f32.mrb[41].mxu0  ;;  %4005 = vmatprep.mubr.msk.f32.mxu1 %vm726_vm1, %v665_v30 }
 0x1aa   : > { %v670_v32 = vpop.f32.mrb[42].mxu0 }
 0x1ab   : > { %v672_v33 = vpop.f32.mrb[43].mxu0  ;;  %4006 = vmatmul.mubr.msk.f32.gmra.mrb[20].mxu1 %vm726_vm1, %v670_v32 }
 0x1ae   : > { %v675_v34 = vpop.f32.mrb[44].mxu0 }
 0x1af   : > { %v677_v37 = vpop.f32.mrb[45].mxu0  ;;  %4008 = vmatprep.mubr.msk.f32.mxu1 %vm726_vm1, %v675_v34 }
 0x1b2   : > { %v680_v39 = vpop.f32.mrb[46].mxu0 }
 0x1b3   : > { %v682_v40 = vpop.f32.mrb[47].mxu0  ;;  %4009 = vmatmul.mubr.msk.f32.gmra.mrb[22].mxu1 %vm726_vm1, %v680_v39 }
 0x1b6   : > { %v685_v41 = vpop.f32.mrb[48].mxu0 }
 0x1b7   : > { %v687_v42 = vpop.f32.mrb[49].mxu0  ;;  %4011 = vmatprep.mubr.msk.f32.mxu1 %vm726_vm1, %v685_v41 }
 0x1ba   : > { %v690_v43 = vpop.f32.mrb[50].mxu0 }
 0x1bb   : > { %v692_v44 = vpop.f32.mrb[51].mxu0  ;;  %4012 = vmatmul.mubr.msk.f32.gmra.mrb[24].mxu1 %vm726_vm1, %v690_v43 }
 0x1be   : > { %v695_v45 = vpop.f32.mrb[52].mxu0 }
 0x1bf   : > { %v697_v46 = vpop.f32.mrb[53].mxu0  ;;  %4014 = vmatprep.mubr.msk.f32.mxu1 %vm726_vm1, %v695_v45 }
 0x1c2   : > { %v700_v47 = vpop.f32.mrb[54].mxu0 }
 0x1c3   : > { %v702_v48 = vpop.f32.mrb[55].mxu0  ;;  %4015 = vmatmul.mubr.msk.f32.gmra.mrb[26].mxu1 %vm726_vm1, %v700_v47 }
 0x1c6   : > { %v705_v49 = vpop.f32.mrb[56].mxu0 }
 0x1c7   : > { %v707_v50 = vpop.f32.mrb[57].mxu0  ;;  %4017 = vmatprep.mubr.msk.f32.mxu1 %vm726_vm1, %v705_v49 }
 0x1ca   : > { %v710_v51 = vpop.f32.mrb[58].mxu0 }
 0x1cb   : > { %v712_v52 = vpop.f32.mrb[59].mxu0  ;;  %4018 = vmatmul.mubr.msk.f32.gmra.mrb[28].mxu1 %vm726_vm1, %v710_v51 }
 0x1ce   : > { %v715_v53 = vpop.f32.mrb[60].mxu0 }
 0x1cf   : > { %v717_v54 = vpop.f32.mrb[61].mxu0  ;;  %4020 = vmatprep.mubr.msk.f32.mxu1 %vm726_vm1, %v715_v53 }
 0x1d2   : > { %v720_v55 = vpop.f32.mrb[62].mxu0 }
 0x1d3   : > { %v722_v56 = vpop.f32.mrb[63].mxu0  ;;  %4021 = vmatmul.mubr.msk.f32.gmra.mrb[30].mxu1 %vm726_vm1, %v720_v55 }
 0x22e   : > { %v3977_v61 = vpop.f32.mrb[0].mxu1 }
 0x22f   : > { %v1384_v62 = vadd.f32 %v3977_v61, %v5247_v60  ;;  %v1217_v63 = vpop.f32.mrb[1].mxu1 }
 0x230   : > { %v1383_v0 = vadd.f32 %v5247_v60, %v1217_v63 }
 0x231   : > { %v1416_v4 = vmax.f32 %v1384_v62, 0.0 }
 0x232   : > { %v1415_v3 = vmax.f32 %v1383_v0, 0.0 }
 0x234   : > { %1820 = vrot.lane.b32.xlu0 %v1415_v3, %s4737_s24  ;;  %4031 = vmatprep.mubr.msk.f32.mxu1 %vm1458_vm2, %v1415_v3 }
 0x235   : > { %4032 = vmatmul.mubr.msk.f32.vlgmr.msra.gmra.mrb[32].mxu1 %vm1458_vm2, %v1416_v4 }
 0x236   : > { %v3980_v6 = vpop.f32.mrb[2].mxu1  ;;  %4250 = vmatpush3.bf16.msra.mxu1 %v4247_v59 }
 0x237   : > { %v1386_v7 = vadd.f32 %v3980_v6, %v5247_v60  ;;  %v1227_v8 = vpop.f32.mrb[3].mxu1  ;;  %4252 = vmatprep.subr.bf16.mxu1 %v4251_v5  ;;  %v1814_v6 = vld [vmem:[%s6443_s7 + $0x10] sm:$0xff] }
 0x238   : > { %v1385_v9 = vadd.f32 %v5247_v60, %v1227_v8  ;;  %1822 = vrot.lane.b32.xlu0 %v1416_v4, %s4737_s24 }
 0x239   : > { %v1418_v11 = vmax.f32 %v1386_v7, 0.0  ;;  %v1815_v7 = vld [vmem:[%s6443_s7 + $0x18] sm:$0xff] }
 0x23a   : > { %v1417_v10 = vmax.f32 %v1385_v9, 0.0  ;;  %4254 = vmatpush3.bf16.msra.mxu1 %v4251_v5  ;;  %v4259_v9 = vpack.c.bf16 %v1815_v7, %v1814_v6 }
 0x23c   : > { %1824 = vrot.lane.b32.xlu1 %v1417_v10, %s4737_s24  ;;  %4034 = vmatprep.mubr.msk.f32.mxu1 %vm1458_vm2, %v1417_v10 }
 0x23d   : > { %4035 = vmatmul.mubr.msk.f32.gmra.mrb[34].mxu1 %vm1458_vm2, %v1418_v11  ;;  %4260 = vmatprep.subr.bf16.mxu0 %v4259_v9 }
 0x23e   : > { %v3983_v12 = vpop.f32.mrb[4].mxu1  ;;  %4262 = vmatpush3.bf16.msra.mxu0 %v4259_v9 }
 0x23f   : > { %v1388_v13 = vadd.f32 %v3983_v12, %v5247_v60  ;;  %v1237_v14 = vpop.f32.mrb[5].mxu1 }
 0x240   : > { %v1387_v15 = vadd.f32 %v5247_v60, %v1237_v14  ;;  %1826 = vrot.lane.b32.xlu1 %v1418_v11, %s4737_s24 }
 0x241   : > { %v1420_v16 = vmax.f32 %v1388_v13, 0.0 }
 0x242   : > { %v1419_v17 = vmax.f32 %v1387_v15, 0.0 }
 0x244   : > { %1830 = vrot.lane.b32.xlu1 %v1420_v16, %s4737_s24  ;;  %1828 = vrot.lane.b32.xlu0 %v1419_v17, %s4737_s24 }
 0x245   : > { %4037 = vmatprep.mubr.msk.f32.mxu1 %vm1458_vm2, %v1419_v17 }
 0x246   : > { %4038 = vmatmul.mubr.msk.f32.gmra.mrb[36].mxu1 %vm1458_vm2, %v1420_v16  ;;  %v3986_v20 = vpop.f32.mrb[6].mxu1 }
 0x247   : > { %v1390_v22 = vadd.f32 %v3986_v20, %v5247_v60  ;;  %v1247_v23 = vpop.f32.mrb[7].mxu1 }
 0x248   : > { %v1389_v24 = vadd.f32 %v5247_v60, %v1247_v23 }
 0x249   : > { %v1422_v25 = vmax.f32 %v1390_v22, 0.0 }
 0x24a   : > { %v1421_v26 = vmax.f32 %v1389_v24, 0.0 }
 0x24b   : > { %1834 = vrot.lane.b32.xlu1 %v1422_v25, %s4737_s24 }
 0x24c   : > { %1832 = vrot.lane.b32.xlu0 %v1421_v26, %s4737_s24  ;;  %4040 = vmatprep.mubr.msk.f32.mxu1 %vm1458_vm2, %v1421_v26 }
 0x24d   : > { %4041 = vmatmul.mubr.msk.f32.gmra.mrb[38].mxu1 %vm1458_vm2, %v1422_v25 }
 0x24e   : > { %v3989_v27 = vpop.f32.mrb[8].mxu1 }
 0x24f   : > { %v1392_v28 = vadd.f32 %v3989_v27, %v5247_v60  ;;  %v1257_v29 = vpop.f32.mrb[9].mxu1 }
 0x250   : > { %v1391_v30 = vadd.f32 %v5247_v60, %v1257_v29 }
 0x251   : > { %v1424_v31 = vmax.f32 %v1392_v28, 0.0 }
 0x252   : > { %v1423_v32 = vmax.f32 %v1391_v30, 0.0 }
 0x253   : > { %1838 = vrot.lane.b32.xlu1 %v1424_v31, %s4737_s24 }
 0x254   : > { %1836 = vrot.lane.b32.xlu0 %v1423_v32, %s4737_s24  ;;  %4043 = vmatprep.mubr.msk.f32.mxu1 %vm1458_vm2, %v1423_v32 }
 0x255   : > { %4044 = vmatmul.mubr.msk.f32.gmra.mrb[40].mxu1 %vm1458_vm2, %v1424_v31 }
 0x256   : > { %v3992_v33 = vpop.f32.mrb[10].mxu1 }
 0x257   : > { %v1394_v34 = vadd.f32 %v3992_v33, %v5247_v60  ;;  %v1267_v35 = vpop.f32.mrb[11].mxu1 }
 0x258   : > { %v1393_v36 = vadd.f32 %v5247_v60, %v1267_v35 }
 0x259   : > { %v1426_v37 = vmax.f32 %v1394_v34, 0.0 }
 0x25a   : > { %v1425_v38 = vmax.f32 %v1393_v36, 0.0 }
 0x25b   : > { %1842 = vrot.lane.b32.xlu1 %v1426_v37, %s4737_s24 }
 0x25c   : > { %1840 = vrot.lane.b32.xlu0 %v1425_v38, %s4737_s24  ;;  %4046 = vmatprep.mubr.msk.f32.mxu1 %vm1458_vm2, %v1425_v38 }
 0x25d   : > { %4047 = vmatmul.mubr.msk.f32.gmra.mrb[42].mxu1 %vm1458_vm2, %v1426_v37 }
 0x25e   : > { %v3995_v39 = vpop.f32.mrb[12].mxu1 }
 0x25f   : > { %v1396_v40 = vadd.f32 %v3995_v39, %v5247_v60  ;;  %v1277_v41 = vpop.f32.mrb[13].mxu1 }
 0x260   : > { %v1395_v42 = vadd.f32 %v5247_v60, %v1277_v41 }
 0x261   : > { %v1428_v43 = vmax.f32 %v1396_v40, 0.0 }
 0x262   : > { %v1427_v44 = vmax.f32 %v1395_v42, 0.0 }
 0x263   : > { %1846 = vrot.lane.b32.xlu1 %v1428_v43, %s4737_s24 }
 0x264   : > { %1844 = vrot.lane.b32.xlu0 %v1427_v44, %s4737_s24  ;;  %4049 = vmatprep.mubr.msk.f32.mxu1 %vm1458_vm2, %v1427_v44 }
 0x265   : > { %4050 = vmatmul.mubr.msk.f32.gmra.mrb[44].mxu1 %vm1458_vm2, %v1428_v43 }
 0x266   : > { %v3998_v45 = vpop.f32.mrb[14].mxu1 }
 0x267   : > { %v1398_v46 = vadd.f32 %v3998_v45, %v5247_v60  ;;  %v1287_v47 = vpop.f32.mrb[15].mxu1 }
 0x268   : > { %v1397_v48 = vadd.f32 %v5247_v60, %v1287_v47 }
 0x269   : > { %v1430_v49 = vmax.f32 %v1398_v46, 0.0 }
 0x26a   : > { %v1429_v50 = vmax.f32 %v1397_v48, 0.0 }
 0x26b   : > { %1850 = vrot.lane.b32.xlu1 %v1430_v49, %s4737_s24 }
 0x26c   : > { %1848 = vrot.lane.b32.xlu0 %v1429_v50, %s4737_s24  ;;  %4052 = vmatprep.mubr.msk.f32.mxu1 %vm1458_vm2, %v1429_v50 }
 0x26d   : > { %4053 = vmatmul.mubr.msk.f32.gmra.mrb[46].mxu1 %vm1458_vm2, %v1430_v49 }
 0x26e   : > { %v4001_v51 = vpop.f32.mrb[16].mxu1 }
 0x26f   : > { %v1400_v52 = vadd.f32 %v4001_v51, %v5247_v60  ;;  %v1297_v53 = vpop.f32.mrb[17].mxu1 }
 0x270   : > { %v1399_v54 = vadd.f32 %v5247_v60, %v1297_v53 }
 0x271   : > { %v1432_v55 = vmax.f32 %v1400_v52, 0.0 }
 0x272   : > { %v1431_v56 = vmax.f32 %v1399_v54, 0.0 }
 0x273   : > { %1854 = vrot.lane.b32.xlu1 %v1432_v55, %s4737_s24 }
 0x274   : > { %1852 = vrot.lane.b32.xlu0 %v1431_v56, %s4737_s24  ;;  %4055 = vmatprep.mubr.msk.f32.mxu1 %vm1458_vm2, %v1431_v56 }
 0x275   : > { %4056 = vmatmul.mubr.msk.f32.gmra.mrb[48].mxu1 %vm1458_vm2, %v1432_v55 }
 0x276   : > { %v4004_v57 = vpop.f32.mrb[18].mxu1 }
 0x277   : > { %v1402_v58 = vadd.f32 %v4004_v57, %v5247_v60  ;;  %v1307_v59 = vpop.f32.mrb[19].mxu1 }
 0x278   : > { %v1401_v61 = vadd.f32 %v5247_v60, %v1307_v59 }
 0x279   : > { %v1434_v62 = vmax.f32 %v1402_v58, 0.0 }
 0x27a   : > { %v1433_v63 = vmax.f32 %v1401_v61, 0.0 }
 0x27b   : > { %1858 = vrot.lane.b32.xlu1 %v1434_v62, %s4737_s24 }
 0x27c   : > { %1856 = vrot.lane.b32.xlu0 %v1433_v63, %s4737_s24  ;;  %4058 = vmatprep.mubr.msk.f32.mxu1 %vm1458_vm2, %v1433_v63 }
 0x27d   : > { %4059 = vmatmul.mubr.msk.f32.gmra.mrb[50].mxu1 %vm1458_vm2, %v1434_v62 }
 0x27e   : > { %v4007_v0 = vpop.f32.mrb[20].mxu1 }
 0x27f   : > { %v1404_v1 = vadd.f32 %v4007_v0, %v5247_v60  ;;  %v1317_v2 = vpop.f32.mrb[21].mxu1  ;;  %v5390_v0 = vld [vmem:[%s6442_s6] ss:$0 sm:$0xff] }
 0x280   : > { %v1403_v3 = vadd.f32 %v5247_v60, %v1317_v2 }
 0x281   : > { %v1436_v4 = vmax.f32 %v1404_v1, 0.0 }
 0x282   : > { %v1435_v5 = vmax.f32 %v1403_v3, 0.0 }
 0x283   : > { %1862 = vrot.lane.b32.xlu1 %v1436_v4, %s4737_s24 }
 0x284   : > { %1860 = vrot.lane.b32.xlu0 %v1435_v5, %s4737_s24  ;;  %4061 = vmatprep.mubr.msk.f32.mxu1 %vm1458_vm2, %v1435_v5 }
 0x285   : > { %4062 = vmatmul.mubr.msk.f32.gmra.mrb[52].mxu1 %vm1458_vm2, %v1436_v4 }
 0x286   : > { %v4010_v8 = vpop.f32.mrb[22].mxu1 }
 0x287   : > { %v1406_v10 = vadd.f32 %v4010_v8, %v5247_v60  ;;  %v1327_v11 = vpop.f32.mrb[23].mxu1 }
 0x288   : > { %v1405_v12 = vadd.f32 %v5247_v60, %v1327_v11 }
 0x289   : > { %v1438_v13 = vmax.f32 %v1406_v10, 0.0 }
 0x28a   : > { %v1437_v14 = vmax.f32 %v1405_v12, 0.0 }
 0x28b   : > { %1866 = vrot.lane.b32.xlu1 %v1438_v13, %s4737_s24 }
 0x28c   : > { %1864 = vrot.lane.b32.xlu0 %v1437_v14, %s4737_s24  ;;  %4064 = vmatprep.mubr.msk.f32.mxu1 %vm1458_vm2, %v1437_v14 }
 0x28d   : > { %4065 = vmatmul.mubr.msk.f32.gmra.mrb[54].mxu1 %vm1458_vm2, %v1438_v13 }
 0x28e   : > { %v4013_v15 = vpop.f32.mrb[24].mxu1 }
 0x28f   : > { %v1408_v16 = vadd.f32 %v4013_v15, %v5247_v60  ;;  %v1337_v17 = vpop.f32.mrb[25].mxu1 }
 0x290   : > { %v1407_v18 = vadd.f32 %v5247_v60, %v1337_v17 }
 0x291   : > { %v1440_v19 = vmax.f32 %v1408_v16, 0.0 }
 0x292   : > { %v1439_v20 = vmax.f32 %v1407_v18, 0.0 }
 0x293   : > { %1870 = vrot.lane.b32.xlu1 %v1440_v19, %s4737_s24 }
 0x294   : > { %1868 = vrot.lane.b32.xlu0 %v1439_v20, %s4737_s24  ;;  %4067 = vmatprep.mubr.msk.f32.mxu1 %vm1458_vm2, %v1439_v20 }
 0x295   : > { %4068 = vmatmul.mubr.msk.f32.gmra.mrb[56].mxu1 %vm1458_vm2, %v1440_v19 }
 0x296   : > { %v4016_v21 = vpop.f32.mrb[26].mxu1 }
 0x297   : > { %v1410_v22 = vadd.f32 %v4016_v21, %v5247_v60  ;;  %v1347_v23 = vpop.f32.mrb[27].mxu1 }
 0x298   : > { %v1409_v24 = vadd.f32 %v5247_v60, %v1347_v23 }
 0x299   : > { %v1442_v25 = vmax.f32 %v1410_v22, 0.0 }
 0x29a   : > { %v1441_v26 = vmax.f32 %v1409_v24, 0.0 }
 0x29b   : > { %1874 = vrot.lane.b32.xlu1 %v1442_v25, %s4737_s24 }
 0x29c   : > { %1872 = vrot.lane.b32.xlu0 %v1441_v26, %s4737_s24  ;;  %4070 = vmatprep.mubr.msk.f32.mxu1 %vm1458_vm2, %v1441_v26 }
 0x29d   : > { %4071 = vmatmul.mubr.msk.f32.gmra.mrb[58].mxu1 %vm1458_vm2, %v1442_v25 }
 0x29e   : > { %v4019_v27 = vpop.f32.mrb[28].mxu1 }
 0x29f   : > { %v1412_v28 = vadd.f32 %v4019_v27, %v5247_v60  ;;  %v1357_v29 = vpop.f32.mrb[29].mxu1 }
 0x2a0   : > { %v1411_v30 = vadd.f32 %v5247_v60, %v1357_v29 }
 0x2a1   : > { %v1444_v31 = vmax.f32 %v1412_v28, 0.0 }
 0x2a2   : > { %v1443_v32 = vmax.f32 %v1411_v30, 0.0 }
 0x2a3   : > { %1878 = vrot.lane.b32.xlu1 %v1444_v31, %s4737_s24 }
 0x2a4   : > { %1876 = vrot.lane.b32.xlu0 %v1443_v32, %s4737_s24  ;;  %4073 = vmatprep.mubr.msk.f32.mxu1 %vm1458_vm2, %v1443_v32 }
 0x2a5   : > { %4074 = vmatmul.mubr.msk.f32.gmra.mrb[60].mxu1 %vm1458_vm2, %v1444_v31 }
 0x2a6   : > { %v4022_v33 = vpop.f32.mrb[30].mxu1  ;;  %v1821_v38 = vpop.permute.xlu0 %1820 }
 0x2a7   : > { %v1414_v34 = vadd.f32 %v4022_v33, %v5247_v60  ;;  %v1367_v35 = vpop.f32.mrb[31].mxu1 }
 0x2a8   : > { %v1413_v36 = vadd.f32 %v5247_v60, %v1367_v35 }
 0x2a9   : > { %v1446_v37 = vmax.f32 %v1414_v34, 0.0 }
 0x2aa   : > { %v1445_v39 = vmax.f32 %v1413_v36, 0.0  ;;  %v1823_v41 = vpop.permute.xlu0 %1822 }
 0x2ab   : > { %1882 = vrot.lane.b32.xlu1 %v1446_v37, %s4737_s24 }
 0x2ac   : > { %1880 = vrot.lane.b32.xlu0 %v1445_v39, %s4737_s24  ;;  %4076 = vmatprep.mubr.msk.f32.mxu1 %vm1458_vm2, %v1445_v39  ;;  %s4669_s24 = sshll.u32 %s4738_s11, 4  ;;  %s4670_s24 = int_to_ptr.vmem [resolvable:$false] %s4669_s24 }
 0x2ad   : > { %4077 = vmatmul.mubr.msk.f32.gmra.mrb[62].mxu1 %vm1458_vm2, %v1446_v37  ;;  %s4671_s30 = scalar_lea.vmem %s4670_s24, 8192  ;;  %p4672_p10 = scmp.lt.s32.totalorder %s6386_s22, %s4670_s24 }
 0x2ae   : > { %v1825_v40 = vpop.permute.xlu1 %1824  ;;  %4087 = vmatprep.mubr.msk.f32.mxu1 %vm1458_vm2, %v1821_v38  ;;  %p4673_p0 = scmp.lt.s32.totalorder %s4671_s30, %s4665_s21 }
 0x2b0   : > { %p4674_p2 = por %p4673_p0, %p4672_p10 }
 0x2b1   : > { %4088 = vmatmul.mubr.msk.f32.vlgmr.msra.gmra.mrb[64].mxu1 %vm1458_vm2, %v1823_v41 }
 0x2b2   : > { %v1827_v42 = vpop.permute.xlu1 %1826  ;;  %4090 = vmatprep.mubr.msk.f32.mxu1 %vm1458_vm2, %v1825_v40  ;;  %p4675_p4 = pnand %p4674_p2, %p4668_p8 }
 0x2b5   : > { %4091 = vmatmul.mubr.msk.f32.gmra.mrb[66].mxu1 %vm1458_vm2, %v1827_v42 }
 0x2b6   : > { %v1829_v60 = vpop.permute.xlu0 %1828  ;;  %v1831_v43 = vpop.permute.xlu1 %1830 }
 0x2b7   : > { %4093 = vmatprep.mubr.msk.f32.mxu1 %vm1458_vm2, %v1829_v60 }
 0x2b9   : > { %4094 = vmatmul.mubr.msk.f32.gmra.mrb[68].mxu1 %vm1458_vm2, %v1831_v43 }
 0x2bd   : > { %v1835_v45 = vpop.permute.xlu1 %1834 }
 0x2be   : > { %v1833_v44 = vpop.permute.xlu0 %1832 }
 0x2bf   : > { %4096 = vmatprep.mubr.msk.f32.mxu1 %vm1458_vm2, %v1833_v44 }
 0x2c0   : > { %4097 = vmatmul.mubr.msk.f32.gmra.mrb[70].mxu1 %vm1458_vm2, %v1835_v45 }
 0x2c5   : > { %v1839_v47 = vpop.permute.xlu1 %1838 }
 0x2c6   : > { %v1837_v46 = vpop.permute.xlu0 %1836 }
 0x2c7   : > { %4099 = vmatprep.mubr.msk.f32.mxu1 %vm1458_vm2, %v1837_v46 }
 0x2c8   : > { %4100 = vmatmul.mubr.msk.f32.gmra.mrb[72].mxu1 %vm1458_vm2, %v1839_v47 }
 0x2cd   : > { %v1843_v49 = vpop.permute.xlu1 %1842 }
 0x2ce   : > { %v1841_v48 = vpop.permute.xlu0 %1840 }
 0x2cf   : > { %4102 = vmatprep.mubr.msk.f32.mxu1 %vm1458_vm2, %v1841_v48 }
 0x2d0   : > { %4103 = vmatmul.mubr.msk.f32.gmra.mrb[74].mxu1 %vm1458_vm2, %v1843_v49 }
 0x2d5   : > { %v1847_v51 = vpop.permute.xlu1 %1846 }
 0x2d6   : > { %v1845_v50 = vpop.permute.xlu0 %1844 }
 0x2d7   : > { %4105 = vmatprep.mubr.msk.f32.mxu1 %vm1458_vm2, %v1845_v50 }
 0x2d8   : > { %4106 = vmatmul.mubr.msk.f32.gmra.mrb[76].mxu1 %vm1458_vm2, %v1847_v51 }
 0x2dd   : > { %v1851_v53 = vpop.permute.xlu1 %1850 }
 0x2de   : > { %v1849_v52 = vpop.permute.xlu0 %1848 }
 0x2df   : > { %4108 = vmatprep.mubr.msk.f32.mxu1 %vm1458_vm2, %v1849_v52 }
 0x2e0   : > { %4109 = vmatmul.mubr.msk.f32.gmra.mrb[78].mxu1 %vm1458_vm2, %v1851_v53 }
 0x2e5   : > { %v1855_v55 = vpop.permute.xlu1 %1854 }
 0x2e6   : > { %v1853_v54 = vpop.permute.xlu0 %1852 }
 0x2e7   : > { %4111 = vmatprep.mubr.msk.f32.mxu1 %vm1458_vm2, %v1853_v54 }
 0x2e8   : > { %4112 = vmatmul.mubr.msk.f32.gmra.mrb[80].mxu1 %vm1458_vm2, %v1855_v55 }
 0x2ed   : > { %v1859_v57 = vpop.permute.xlu1 %1858 }
 0x2ee   : > { %v1857_v56 = vpop.permute.xlu0 %1856 }
 0x2ef   : > { %4114 = vmatprep.mubr.msk.f32.mxu1 %vm1458_vm2, %v1857_v56 }
 0x2f0   : > { %4115 = vmatmul.mubr.msk.f32.gmra.mrb[82].mxu1 %vm1458_vm2, %v1859_v57 }
 0x2f5   : > { %v1863_v59 = vpop.permute.xlu1 %1862 }
 0x2f6   : > { %v1861_v58 = vpop.permute.xlu0 %1860 }
 0x2f7   : > { %4117 = vmatprep.mubr.msk.f32.mxu1 %vm1458_vm2, %v1861_v58 }
 0x2f8   : > { %4118 = vmatmul.mubr.msk.f32.gmra.mrb[84].mxu1 %vm1458_vm2, %v1863_v59 }
 0x2fd   : > { %v1867_v62 = vpop.permute.xlu1 %1866 }
 0x2fe   : > { %v1865_v61 = vpop.permute.xlu0 %1864 }
 0x2ff   : > { %4120 = vmatprep.mubr.msk.f32.mxu1 %vm1458_vm2, %v1865_v61 }
 0x300   : > { %4121 = vmatmul.mubr.msk.f32.gmra.mrb[86].mxu1 %vm1458_vm2, %v1867_v62 }
 0x305   : > { %v1871_v1 = vpop.permute.xlu1 %1870 }
 0x306   : > { %v1869_v63 = vpop.permute.xlu0 %1868 }
 0x307   : > { %4123 = vmatprep.mubr.msk.f32.mxu1 %vm1458_vm2, %v1869_v63 }
 0x308   : > { %v4033_v2 = vpop.f32.mrb[32].mxu1  ;;  %4124 = vmatmul.mubr.msk.f32.gmra.mrb[88].mxu1 %vm1458_vm2, %v1871_v1 }
 0x309   : > { %v1627_v3 = vadd.f32 %v4033_v2, %v5390_v0  ;;  %v1621_v4 = vpop.f32.mrb[33].mxu1 }
 0x30a   : > { %v1622_v5 = vadd.f32 %v5390_v0, %v1621_v4 }
 0x30b   : > { %v1781_v7 = vmax.f32 %v1627_v3, 0.0 }
 0x30c   : > { %v1780_v6 = vmax.f32 %v1622_v5, 0.0 }
 0x30d   : > { %v1875_v9 = vpop.permute.xlu1 %1874 }
 0x30e   : > { %v1873_v8 = vpop.permute.xlu0 %1872  ;;  %4143 = vmatprep.mubr.msk.f32.mxu0 %vm1458_vm2, %v1780_v6 }
 0x30f   : > { %4126 = vmatprep.mubr.msk.f32.mxu1 %vm1458_vm2, %v1873_v8  ;;  %4144 = vmatmul.mubr.msk.f32.vlgmr.msra.gmra.mrb[64].mxu0 %vm1458_vm2, %v1781_v7 }
 0x310   : > { %v4036_v10 = vpop.f32.mrb[34].mxu1  ;;  %4127 = vmatmul.mubr.msk.f32.gmra.mrb[90].mxu1 %vm1458_vm2, %v1875_v9 }
 0x311   : > { %v1637_v11 = vadd.f32 %v4036_v10, %v5390_v0  ;;  %v1631_v12 = vpop.f32.mrb[35].mxu1 }
 0x312   : > { %v1632_v13 = vadd.f32 %v5390_v0, %v1631_v12 }
 0x313   : > { %v1783_v15 = vmax.f32 %v1637_v11, 0.0 }
 0x314   : > { %v1782_v14 = vmax.f32 %v1632_v13, 0.0 }
 0x315   : > { %v1879_v17 = vpop.permute.xlu1 %1878 }
 0x316   : > { %v1877_v16 = vpop.permute.xlu0 %1876  ;;  %4146 = vmatprep.mubr.msk.f32.mxu0 %vm1458_vm2, %v1782_v14 }
 0x317   : > { %4129 = vmatprep.mubr.msk.f32.mxu1 %vm1458_vm2, %v1877_v16  ;;  %4147 = vmatmul.mubr.msk.f32.gmra.mrb[66].mxu0 %vm1458_vm2, %v1783_v15 }
 0x318   : > { %4130 = vmatmul.mubr.msk.f32.gmra.mrb[92].mxu1 %vm1458_vm2, %v1879_v17 }
 0x319   : > { %v4039_v18 = vpop.f32.mrb[36].mxu1 }
 0x31a   : > { %v1647_v19 = vadd.f32 %v4039_v18, %v5390_v0  ;;  %v1641_v20 = vpop.f32.mrb[37].mxu1 }
 0x31b   : > { %v1642_v21 = vadd.f32 %v5390_v0, %v1641_v20 }
 0x31c   : > { %v1785_v23 = vmax.f32 %v1647_v19, 0.0 }
 0x31d   : > { %v1784_v22 = vmax.f32 %v1642_v21, 0.0  ;;  %v1883_v25 = vpop.permute.xlu1 %1882 }
 0x31e   : > { %v1881_v24 = vpop.permute.xlu0 %1880 }
 0x31f   : > { %4149 = vmatprep.mubr.msk.f32.mxu0 %vm1458_vm2, %v1784_v22  ;;  %4132 = vmatprep.mubr.msk.f32.mxu1 %vm1458_vm2, %v1881_v24 }
 0x320   : > { %4150 = vmatmul.mubr.msk.f32.gmra.mrb[68].mxu0 %vm1458_vm2, %v1785_v23  ;;  %v4042_v26 = vpop.f32.mrb[38].mxu1  ;;  %4133 = vmatmul.mubr.msk.f32.gmra.mrb[94].mxu1 %vm1458_vm2, %v1883_v25 }
 0x321   : > { %v1657_v27 = vadd.f32 %v4042_v26, %v5390_v0  ;;  %v1651_v28 = vpop.f32.mrb[39].mxu1 }
 0x322   : > { %v1652_v29 = vadd.f32 %v5390_v0, %v1651_v28 }
 0x323   : > { %v1787_v31 = vmax.f32 %v1657_v27, 0.0 }
 0x324   : > { %v1786_v30 = vmax.f32 %v1652_v29, 0.0 }
 0x326   : > { %4152 = vmatprep.mubr.msk.f32.mxu0 %vm1458_vm2, %v1786_v30 }
 0x327   : > { %4153 = vmatmul.mubr.msk.f32.gmra.mrb[70].mxu0 %vm1458_vm2, %v1787_v31 }
 0x328   : > { %v4045_v32 = vpop.f32.mrb[40].mxu1 }
 0x329   : > { %v1667_v33 = vadd.f32 %v4045_v32, %v5390_v0  ;;  %v1661_v34 = vpop.f32.mrb[41].mxu1 }
 0x32a   : > { %v1662_v35 = vadd.f32 %v5390_v0, %v1661_v34 }
 0x32b   : > { %v1789_v37 = vmax.f32 %v1667_v33, 0.0 }
 0x32c   : > { %v1788_v36 = vmax.f32 %v1662_v35, 0.0 }
 0x32e   : > { %4155 = vmatprep.mubr.msk.f32.mxu0 %vm1458_vm2, %v1788_v36 }
 0x32f   : > { %4156 = vmatmul.mubr.msk.f32.gmra.mrb[72].mxu0 %vm1458_vm2, %v1789_v37 }
 0x330   : > { %v4048_v38 = vpop.f32.mrb[42].mxu1 }
 0x331   : > { %v1677_v39 = vadd.f32 %v4048_v38, %v5390_v0  ;;  %v1671_v40 = vpop.f32.mrb[43].mxu1 }
 0x332   : > { %v1672_v41 = vadd.f32 %v5390_v0, %v1671_v40 }
 0x333   : > { %v1791_v60 = vmax.f32 %v1677_v39, 0.0 }
 0x334   : > { %v1790_v42 = vmax.f32 %v1672_v41, 0.0 }
 0x336   : > { %4158 = vmatprep.mubr.msk.f32.mxu0 %vm1458_vm2, %v1790_v42 }
 0x337   : > { %4159 = vmatmul.mubr.msk.f32.gmra.mrb[74].mxu0 %vm1458_vm2, %v1791_v60 }
 0x338   : > { %v4051_v43 = vpop.f32.mrb[44].mxu1 }
 0x339   : > { %v1687_v44 = vadd.f32 %v4051_v43, %v5390_v0  ;;  %v1681_v45 = vpop.f32.mrb[45].mxu1 }
 0x33a   : > { %v1682_v46 = vadd.f32 %v5390_v0, %v1681_v45 }
 0x33b   : > { %v1793_v48 = vmax.f32 %v1687_v44, 0.0 }
 0x33c   : > { %v1792_v47 = vmax.f32 %v1682_v46, 0.0 }
 0x33e   : > { %4161 = vmatprep.mubr.msk.f32.mxu0 %vm1458_vm2, %v1792_v47 }
 0x33f   : > { %4162 = vmatmul.mubr.msk.f32.gmra.mrb[76].mxu0 %vm1458_vm2, %v1793_v48 }
 0x340   : > { %v4054_v49 = vpop.f32.mrb[46].mxu1 }
 0x341   : > { %v1697_v50 = vadd.f32 %v4054_v49, %v5390_v0  ;;  %v1691_v51 = vpop.f32.mrb[47].mxu1 }
 0x342   : > { %v1692_v52 = vadd.f32 %v5390_v0, %v1691_v51 }
 0x343   : > { %v1795_v54 = vmax.f32 %v1697_v50, 0.0 }
 0x344   : > { %v1794_v53 = vmax.f32 %v1692_v52, 0.0 }
 0x346   : > { %4164 = vmatprep.mubr.msk.f32.mxu0 %vm1458_vm2, %v1794_v53 }
 0x347   : > { %4165 = vmatmul.mubr.msk.f32.gmra.mrb[78].mxu0 %vm1458_vm2, %v1795_v54 }
 0x348   : > { %v4057_v55 = vpop.f32.mrb[48].mxu1 }
 0x349   : > { %v1707_v56 = vadd.f32 %v4057_v55, %v5390_v0  ;;  %v1701_v57 = vpop.f32.mrb[49].mxu1 }
 0x34a   : > { %v1702_v58 = vadd.f32 %v5390_v0, %v1701_v57 }
 0x34b   : > { %v1797_v61 = vmax.f32 %v1707_v56, 0.0 }
 0x34c   : > { %v1796_v59 = vmax.f32 %v1702_v58, 0.0 }
 0x34e   : > { %4167 = vmatprep.mubr.msk.f32.mxu0 %vm1458_vm2, %v1796_v59 }
 0x34f   : > { %4168 = vmatmul.mubr.msk.f32.gmra.mrb[80].mxu0 %vm1458_vm2, %v1797_v61 }
 0x350   : > { %v4060_v62 = vpop.f32.mrb[50].mxu1 }
 0x351   : > { %v1717_v63 = vadd.f32 %v4060_v62, %v5390_v0  ;;  %v1711_v1 = vpop.f32.mrb[51].mxu1 }
 0x352   : > { %v1712_v2 = vadd.f32 %v5390_v0, %v1711_v1 }
 0x353   : > { %v1799_v4 = vmax.f32 %v1717_v63, 0.0 }
 0x354   : > { %v1798_v3 = vmax.f32 %v1712_v2, 0.0 }
 0x356   : > { %4170 = vmatprep.mubr.msk.f32.mxu0 %vm1458_vm2, %v1798_v3  ;;  %v2533_v3 = vlaneseq }
 0x357   : > { %4171 = vmatmul.mubr.msk.f32.gmra.mrb[82].mxu0 %vm1458_vm2, %v1799_v4 }
 0x358   : > { %v4063_v5 = vpop.f32.mrb[52].mxu1  ;;  %v5500_v4 = vand.u32 127, %v2533_v3 }
 0x359   : > { %v1727_v6 = vadd.f32 %v4063_v5, %v5390_v0  ;;  %v1721_v7 = vpop.f32.mrb[53].mxu1 }
 0x35a   : > { %v1722_v8 = vadd.f32 %v5390_v0, %v1721_v7  ;;  %6507 = vst [vmem:[#allocation9_spill] sm:$0xff] %v5500_v4  ;;  %vm2535_vm3 = vcmp.lt.s32.totalorder %v5500_v4, 16 }
 0x35b   : > { %v1801_v10 = vmax.f32 %v1727_v6, 0.0  ;;  %v5505_v6 = vld [vmem:[%s6445_s9] ss:$0 sm:$0xff] }
 0x35c   : > { %v1800_v9 = vmax.f32 %v1722_v8, 0.0 }
 0x35e   : > { %4173 = vmatprep.mubr.msk.f32.mxu0 %vm1458_vm2, %v1800_v9 }
 0x35f   : > { %4174 = vmatmul.mubr.msk.f32.gmra.mrb[84].mxu0 %vm1458_vm2, %v1801_v10 }
 0x360   : > { %v4066_v11 = vpop.f32.mrb[54].mxu1 }
 0x361   : > { %v1737_v12 = vadd.f32 %v4066_v11, %v5390_v0  ;;  %v1731_v13 = vpop.f32.mrb[55].mxu1 }
 0x362   : > { %v1732_v14 = vadd.f32 %v5390_v0, %v1731_v13 }
 0x363   : > { %v1803_v16 = vmax.f32 %v1737_v12, 0.0 }
 0x364   : > { %v1802_v15 = vmax.f32 %v1732_v14, 0.0 }
 0x366   : > { %4176 = vmatprep.mubr.msk.f32.mxu0 %vm1458_vm2, %v1802_v15 }
 0x367   : > { %4177 = vmatmul.mubr.msk.f32.gmra.mrb[86].mxu0 %vm1458_vm2, %v1803_v16 }
 0x368   : > { %v4069_v17 = vpop.f32.mrb[56].mxu1 }
 0x369   : > { %v1747_v18 = vadd.f32 %v4069_v17, %v5390_v0  ;;  %v1741_v19 = vpop.f32.mrb[57].mxu1 }
 0x36a   : > { %v1742_v20 = vadd.f32 %v5390_v0, %v1741_v19 }
 0x36b   : > { %v1805_v22 = vmax.f32 %v1747_v18, 0.0 }
 0x36c   : > { %v1804_v21 = vmax.f32 %v1742_v20, 0.0 }
 0x36e   : > { %4179 = vmatprep.mubr.msk.f32.mxu0 %vm1458_vm2, %v1804_v21 }
 0x36f   : > { %4180 = vmatmul.mubr.msk.f32.gmra.mrb[88].mxu0 %vm1458_vm2, %v1805_v22 }
 0x370   : > { %v4072_v23 = vpop.f32.mrb[58].mxu1 }
 0x371   : > { %v1757_v24 = vadd.f32 %v4072_v23, %v5390_v0  ;;  %v1751_v25 = vpop.f32.mrb[59].mxu1 }
 0x372   : > { %v1752_v26 = vadd.f32 %v5390_v0, %v1751_v25 }
 0x373   : > { %v1807_v28 = vmax.f32 %v1757_v24, 0.0 }
 0x374   : > { %v1806_v27 = vmax.f32 %v1752_v26, 0.0 }
 0x376   : > { %4182 = vmatprep.mubr.msk.f32.mxu0 %vm1458_vm2, %v1806_v27 }
 0x377   : > { %4183 = vmatmul.mubr.msk.f32.gmra.mrb[90].mxu0 %vm1458_vm2, %v1807_v28 }
 0x378   : > { %v4075_v29 = vpop.f32.mrb[60].mxu1 }
 0x379   : > { %v1767_v30 = vadd.f32 %v4075_v29, %v5390_v0  ;;  %v1761_v31 = vpop.f32.mrb[61].mxu1 }
 0x37a   : > { %v1762_v32 = vadd.f32 %v5390_v0, %v1761_v31 }
 0x37b   : > { %v1809_v34 = vmax.f32 %v1767_v30, 0.0 }
 0x37c   : > { %v1808_v33 = vmax.f32 %v1762_v32, 0.0 }
 0x37e   : > { %4185 = vmatprep.mubr.msk.f32.mxu0 %vm1458_vm2, %v1808_v33 }
 0x37f   : > { %4186 = vmatmul.mubr.msk.f32.gmra.mrb[92].mxu0 %vm1458_vm2, %v1809_v34 }
 0x380   : > { %v4078_v35 = vpop.f32.mrb[62].mxu1 }
 0x381   : > { %v1777_v36 = vadd.f32 %v4078_v35, %v5390_v0  ;;  %v1771_v37 = vpop.f32.mrb[63].mxu1 }
 0x382   : > { %v1772_v38 = vadd.f32 %v5390_v0, %v1771_v37 }
 0x383   : > { %v1811_v41 = vmax.f32 %v1777_v36, 0.0 }
 0x384   : > { %v1810_v39 = vmax.f32 %v1772_v38, 0.0  ;;  %v4089_v40 = vpop.f32.mrb[64].mxu1 }
 0x385   : > { %v2014_v42 = vpop.f32.mrb[65].mxu1 }
 0x386   : > { %4188 = vmatprep.mubr.msk.f32.mxu0 %vm1458_vm2, %v1810_v39 }
 0x387   : > { %4189 = vmatmul.mubr.msk.f32.gmra.mrb[94].mxu0 %vm1458_vm2, %v1811_v41 }
 0x388   : > { %v4092_v60 = vpop.f32.mrb[66].mxu1 }
 0x389   : > { %v2024_v43 = vpop.f32.mrb[67].mxu1 }
 0x38c   : > { %v4095_v44 = vpop.f32.mrb[68].mxu1 }
 0x38d   : > { %v2034_v45 = vpop.f32.mrb[69].mxu1 }
 0x393   : > { %v4098_v46 = vpop.f32.mrb[70].mxu1 }
 0x394   : > { %v2044_v47 = vpop.f32.mrb[71].mxu1 }
 0x39b   : > { %v5464_v48 = vpop.f32.mrb[72].mxu1 }
 0x39c   : > { %v5466_v49 = vpop.f32.mrb[73].mxu1 }
 0x3a3   : > { %v5468_v50 = vpop.f32.mrb[74].mxu1 }
 0x3a4   : > { %v5470_v0 = vpop.f32.mrb[75].mxu1 }
 0x3ab   : > { %v5472_v51 = vpop.f32.mrb[76].mxu1 }
 0x3ac   : > { %v5474_v52 = vpop.f32.mrb[77].mxu1 }
 0x3b3   : > { %v5476_v53 = vpop.f32.mrb[78].mxu1 }
 0x3b4   : > { %v5478_v54 = vpop.f32.mrb[79].mxu1 }
 0x3bb   : > { %v5480_v55 = vpop.f32.mrb[80].mxu1 }
 0x3bc   : > { %v5482_v56 = vpop.f32.mrb[81].mxu1 }
 0x3c3   : > { %v5484_v57 = vpop.f32.mrb[82].mxu1 }
 0x3c4   : > { %v5486_v58 = vpop.f32.mrb[83].mxu1 }
 0x3cb   : > { %v5488_v59 = vpop.f32.mrb[84].mxu1 }
 0x3cc   : > { %v5490_v61 = vpop.f32.mrb[85].mxu1 }
 0x3d3   : > { %v5492_v62 = vpop.f32.mrb[86].mxu1 }
 0x3d4   : > { %v5494_v63 = vpop.f32.mrb[87].mxu1 }
 0x3db   : > { %v5496_v1 = vpop.f32.mrb[88].mxu1 }
 0x3dc   : > { %v5498_v2 = vpop.f32.mrb[89].mxu1 }
 0x3e2   : > { %v4145_v5 = vpop.f32.mrb[64].mxu0 }
 0x3e3   : > { %v2341_v7 = vadd.f32 %v4145_v5, %v4089_v40  ;;  %v5507_v8 = vpop.f32.mrb[90].mxu1  ;;  %v2335_v9 = vpop.f32.mrb[65].mxu0 }
 0x3e4   : > { %v2336_v10 = vadd.f32 %v2335_v9, %v2014_v42  ;;  %v5509_v11 = vpop.f32.mrb[91].mxu1 }
 0x3e5   : > { %v5513_v12 = vadd.f32 %v5505_v6, %v2341_v7 }
 0x3e6   : > { %v5516_v13 = vadd.f32 %v5505_v6, %v2336_v10 }
 0x3e7   : > { %v5521_v14 = vsel %vm2535_vm3, %v5513_v12, -1e+30 }
 0x3e8   : > { %2570 = vmax.xlane.f32.xlu1 %v5521_v14  ;;  %v5527_v15 = vsel %vm2535_vm3, %v5516_v13, -1e+30 }
 0x3e9   : > { %2568 = vmax.xlane.f32.xlu0 %v5527_v15 }
 0x3ea   : > { %v4148_v16 = vpop.f32.mrb[66].mxu0 }
 0x3eb   : > { %v2351_v17 = vadd.f32 %v4148_v16, %v4092_v60  ;;  %v5530_v18 = vpop.f32.mrb[92].mxu1  ;;  %v2345_v19 = vpop.f32.mrb[67].mxu0 }
 0x3ec   : > { %v2346_v20 = vadd.f32 %v2345_v19, %v2024_v43  ;;  %v5532_v21 = vpop.f32.mrb[93].mxu1 }
 0x3ed   : > { %v5535_v22 = vadd.f32 %v5505_v6, %v2351_v17 }
 0x3ee   : > { %v5538_v23 = vadd.f32 %v5505_v6, %v2346_v20 }
 0x3ef   : > { %v5543_v24 = vsel %vm2535_vm3, %v5535_v22, -1e+30 }
 0x3f0   : > { %2574 = vmax.xlane.f32.xlu0 %v5543_v24  ;;  %v5551_v27 = vsel %vm2535_vm3, %v5538_v23, -1e+30 }
 0x3f3   : > { %v4151_v25 = vpop.f32.mrb[68].mxu0  ;;  %v5546_v26 = vpop.f32.mrb[94].mxu1 }
 0x3f4   : > { %v2361_v28 = vadd.f32 %v4151_v25, %v4095_v44  ;;  %v2355_v29 = vpop.f32.mrb[69].mxu0  ;;  %v5553_v30 = vpop.f32.mrb[95].mxu1  ;;  %2572 = vmax.xlane.f32.xlu0 %v5551_v27 }
 0x3f5   : > { %v2356_v31 = vadd.f32 %v2355_v29, %v2034_v45 }
 0x3f6   : > { %v5557_v32 = vadd.f32 %v5505_v6, %v2361_v28 }
 0x3f7   : > { %v5560_v33 = vadd.f32 %v5505_v6, %v2356_v31 }
 0x3f8   : > { %v5565_v34 = vsel %vm2535_vm3, %v5557_v32, -1e+30 }
 0x3f9   : > { %2578 = vmax.xlane.f32.xlu0 %v5565_v34  ;;  %v5571_v35 = vsel %vm2535_vm3, %v5560_v33, -1e+30 }
 0x3fa   : > { %2576 = vmax.xlane.f32.xlu1 %v5571_v35  ;;  %v4154_v36 = vpop.f32.mrb[70].mxu0 }
 0x3fb   : > { %v2371_v37 = vadd.f32 %v4154_v36, %v4098_v46  ;;  %v2365_v38 = vpop.f32.mrb[71].mxu0 }
 0x3fc   : > { %v2366_v39 = vadd.f32 %v2365_v38, %v2044_v47 }
 0x3fd   : > { %v5575_v40 = vadd.f32 %v5505_v6, %v2371_v37 }
 0x3fe   : > { %v5578_v41 = vadd.f32 %v5505_v6, %v2366_v39 }
 0x3ff   : > { %v5583_v42 = vsel %vm2535_vm3, %v5575_v40, -1e+30 }
 0x400   : > { %2582 = vmax.xlane.f32.xlu0 %v5583_v42  ;;  %v5589_v60 = vsel %vm2535_vm3, %v5578_v41, -1e+30 }
 0x401   : > { %2580 = vmax.xlane.f32.xlu1 %v5589_v60 }
 0x402   : > { %v4157_v43 = vpop.f32.mrb[72].mxu0 }
 0x403   : > { %v2381_v44 = vadd.f32 %v4157_v43, %v5464_v48  ;;  %v2375_v45 = vpop.f32.mrb[73].mxu0 }
 0x404   : > { %v2376_v46 = vadd.f32 %v2375_v45, %v5466_v49 }
 0x405   : > { %v5595_v47 = vadd.f32 %v5505_v6, %v2381_v44 }
 0x406   : > { %v5598_v3 = vadd.f32 %v5505_v6, %v2376_v46 }
 0x407   : > { %v5603_v5 = vsel %vm2535_vm3, %v5595_v47, -1e+30 }
 0x408   : > { %2586 = vmax.xlane.f32.xlu0 %v5603_v5  ;;  %v5609_v48 = vsel %vm2535_vm3, %v5598_v3, -1e+30 }
 0x409   : > { %2584 = vmax.xlane.f32.xlu1 %v5609_v48 }
 0x40a   : > { %v4160_v49 = vpop.f32.mrb[74].mxu0 }
 0x40b   : > { %v2391_v7 = vadd.f32 %v4160_v49, %v5468_v50  ;;  %v2385_v9 = vpop.f32.mrb[75].mxu0 }
 0x40c   : > { %v2386_v10 = vadd.f32 %v2385_v9, %v5470_v0 }
 0x40d   : > { %v5615_v16 = vadd.f32 %v5505_v6, %v2391_v7 }
 0x40e   : > { %v5618_v17 = vadd.f32 %v5505_v6, %v2386_v10 }
 0x40f   : > { %v5623_v19 = vsel %vm2535_vm3, %v5615_v16, -1e+30 }
 0x410   : > { %2590 = vmax.xlane.f32.xlu0 %v5623_v19  ;;  %v5629_v50 = vsel %vm2535_vm3, %v5618_v17, -1e+30 }
 0x411   : > { %2588 = vmax.xlane.f32.xlu1 %v5629_v50 }
 0x412   : > { %v4163_v0 = vpop.f32.mrb[76].mxu0 }
 0x413   : > { %v2401_v20 = vadd.f32 %v4163_v0, %v5472_v51  ;;  %v2395_v25 = vpop.f32.mrb[77].mxu0 }
 0x414   : > { %v2396_v28 = vadd.f32 %v2395_v25, %v5474_v52 }
 0x415   : > { %v5635_v29 = vadd.f32 %v5505_v6, %v2401_v20 }
 0x416   : > { %v5638_v31 = vadd.f32 %v5505_v6, %v2396_v28 }
 0x417   : > { %v5643_v36 = vsel %vm2535_vm3, %v5635_v29, -1e+30 }
 0x418   : > { %2594 = vmax.xlane.f32.xlu0 %v5643_v36  ;;  %v5649_v51 = vsel %vm2535_vm3, %v5638_v31, -1e+30 }
 0x419   : > { %2592 = vmax.xlane.f32.xlu1 %v5649_v51 }
 0x41a   : > { %v4166_v52 = vpop.f32.mrb[78].mxu0 }
 0x41b   : > { %v2411_v37 = vadd.f32 %v4166_v52, %v5476_v53  ;;  %v2405_v38 = vpop.f32.mrb[79].mxu0 }
 0x41c   : > { %v2406_v39 = vadd.f32 %v2405_v38, %v5478_v54 }
 0x41d   : > { %v5655_v43 = vadd.f32 %v5505_v6, %v2411_v37 }
 0x41e   : > { %v5658_v44 = vadd.f32 %v5505_v6, %v2406_v39 }
 0x41f   : > { %v5663_v45 = vsel %vm2535_vm3, %v5655_v43, -1e+30 }
 0x420   : > { %2598 = vmax.xlane.f32.xlu0 %v5663_v45  ;;  %v5669_v53 = vsel %vm2535_vm3, %v5658_v44, -1e+30 }
 0x421   : > { %2596 = vmax.xlane.f32.xlu1 %v5669_v53 }
 0x422   : > { %v4169_v54 = vpop.f32.mrb[80].mxu0 }
 0x423   : > { %v2421_v46 = vadd.f32 %v4169_v54, %v5480_v55  ;;  %v2415_v49 = vpop.f32.mrb[81].mxu0 }
 0x424   : > { %v2416_v7 = vadd.f32 %v2415_v49, %v5482_v56 }
 0x425   : > { %v5675_v9 = vadd.f32 %v5505_v6, %v2421_v46 }
 0x426   : > { %v5678_v10 = vadd.f32 %v5505_v6, %v2416_v7 }
 0x427   : > { %v5683_v0 = vsel %vm2535_vm3, %v5675_v9, -1e+30 }
 0x428   : > { %2602 = vmax.xlane.f32.xlu0 %v5683_v0  ;;  %v5689_v55 = vsel %vm2535_vm3, %v5678_v10, -1e+30 }
 0x429   : > { %2600 = vmax.xlane.f32.xlu1 %v5689_v55 }
 0x42a   : > { %v4172_v56 = vpop.f32.mrb[82].mxu0 }
 0x42b   : > { %v2431_v20 = vadd.f32 %v4172_v56, %v5484_v57  ;;  %v2425_v25 = vpop.f32.mrb[83].mxu0 }
 0x42c   : > { %v2426_v28 = vadd.f32 %v2425_v25, %v5486_v58 }
 0x42d   : > { %v5695_v52 = vadd.f32 %v5505_v6, %v2431_v20 }
 0x42e   : > { %v5698_v37 = vadd.f32 %v5505_v6, %v2426_v28 }
 0x42f   : > { %6508 = vst [vmem:[#allocation10_spill] sm:$0xff] %v5695_v52  ;;  %v5703_v38 = vsel %vm2535_vm3, %v5695_v52, -1e+30 }
 0x430   : > { %6509 = vst [vmem:[#allocation11_spill] sm:$0xff] %v5698_v37  ;;  %2606 = vmax.xlane.f32.xlu0 %v5703_v38  ;;  %v5709_v57 = vsel %vm2535_vm3, %v5698_v37, -1e+30 }
 0x431   : > { %2604 = vmax.xlane.f32.xlu1 %v5709_v57 }
 0x432   : > { %v4175_v58 = vpop.f32.mrb[84].mxu0 }
 0x433   : > { %v2441_v39 = vadd.f32 %v4175_v58, %v5488_v59  ;;  %v2435_v54 = vpop.f32.mrb[85].mxu0 }
 0x434   : > { %v2436_v46 = vadd.f32 %v2435_v54, %v5490_v61 }
 0x435   : > { %v5715_v49 = vadd.f32 %v5505_v6, %v2441_v39 }
 0x436   : > { %v5718_v7 = vadd.f32 %v5505_v6, %v2436_v46 }
 0x437   : > { %6510 = vst [vmem:[#allocation12_spill] sm:$0xff] %v5715_v49  ;;  %v5723_v56 = vsel %vm2535_vm3, %v5715_v49, -1e+30 }
 0x438   : > { %6511 = vst [vmem:[#allocation13_spill] sm:$0xff] %v5718_v7  ;;  %2610 = vmax.xlane.f32.xlu0 %v5723_v56  ;;  %v5729_v59 = vsel %vm2535_vm3, %v5718_v7, -1e+30 }
 0x439   : > { %2608 = vmax.xlane.f32.xlu1 %v5729_v59 }
 0x43a   : > { %v4178_v61 = vpop.f32.mrb[86].mxu0 }
 0x43b   : > { %v2451_v20 = vadd.f32 %v4178_v61, %v5492_v62  ;;  %v2445_v25 = vpop.f32.mrb[87].mxu0 }
 0x43c   : > { %v2446_v28 = vadd.f32 %v2445_v25, %v5494_v63 }
 0x43d   : > { %v5735_v58 = vadd.f32 %v5505_v6, %v2451_v20 }
 0x43e   : > { %v5738_v39 = vadd.f32 %v5505_v6, %v2446_v28 }
 0x43f   : > { %6512 = vst [vmem:[#allocation14_spill] sm:$0xff] %v5735_v58  ;;  %v5743_v54 = vsel %vm2535_vm3, %v5735_v58, -1e+30 }
 0x440   : > { %6513 = vst [vmem:[#allocation15_spill] sm:$0xff] %v5738_v39  ;;  %2614 = vmax.xlane.f32.xlu0 %v5743_v54  ;;  %v5749_v62 = vsel %vm2535_vm3, %v5738_v39, -1e+30 }
 0x441   : > { %2612 = vmax.xlane.f32.xlu1 %v5749_v62 }
 0x442   : > { %v4181_v63 = vpop.f32.mrb[88].mxu0 }
 0x443   : > { %v2461_v46 = vadd.f32 %v4181_v63, %v5496_v1  ;;  %v2455_v61 = vpop.f32.mrb[89].mxu0 }
 0x444   : > { %v2456_v20 = vadd.f32 %v2455_v61, %v5498_v2 }
 0x445   : > { %v5755_v25 = vadd.f32 %v5505_v6, %v2461_v46 }
 0x446   : > { %v5758_v28 = vadd.f32 %v5505_v6, %v2456_v20 }
 0x447   : > { %6514 = vst [vmem:[#allocation16_spill] sm:$0xff] %v5755_v25  ;;  %v5763_v58 = vsel %vm2535_vm3, %v5755_v25, -1e+30 }
 0x448   : > { %6515 = vst [vmem:[#allocation17_spill] sm:$0xff] %v5758_v28  ;;  %2618 = vmax.xlane.f32.xlu0 %v5763_v58  ;;  %v5769_v1 = vsel %vm2535_vm3, %v5758_v28, -1e+30 }
 0x449   : > { %2616 = vmax.xlane.f32.xlu1 %v5769_v1 }
 0x44a   : > { %v4184_v2 = vpop.f32.mrb[90].mxu0 }
 0x44b   : > { %v2471_v63 = vadd.f32 %v4184_v2, %v5507_v8  ;;  %v2465_v46 = vpop.f32.mrb[91].mxu0 }
 0x44c   : > { %v2466_v61 = vadd.f32 %v2465_v46, %v5509_v11 }
 0x44d   : > { %v5775_v20 = vadd.f32 %v5505_v6, %v2471_v63 }
 0x44e   : > { %v5778_v25 = vadd.f32 %v5505_v6, %v2466_v61 }
 0x44f   : > { %6516 = vst [vmem:[#allocation18_spill] sm:$0xff] %v5775_v20  ;;  %v5783_v39 = vsel %vm2535_vm3, %v5775_v20, -1e+30 }
 0x450   : > { %6517 = vst [vmem:[#allocation19_spill] sm:$0xff] %v5778_v25  ;;  %2622 = vmax.xlane.f32.xlu0 %v5783_v39  ;;  %v5789_v8 = vsel %vm2535_vm3, %v5778_v25, -1e+30 }
 0x451   : > { %2620 = vmax.xlane.f32.xlu1 %v5789_v8 }
 0x452   : > { %v4187_v11 = vpop.f32.mrb[92].mxu0 }
 0x453   : > { %v2481_v2 = vadd.f32 %v4187_v11, %v5530_v18  ;;  %v2475_v63 = vpop.f32.mrb[93].mxu0 }
 0x454   : > { %v2476_v46 = vadd.f32 %v2475_v63, %v5532_v21 }
 0x455   : > { %v5795_v61 = vadd.f32 %v5505_v6, %v2481_v2 }
 0x456   : > { %v5798_v20 = vadd.f32 %v5505_v6, %v2476_v46 }
 0x457   : > { %6518 = vst [vmem:[#allocation20_spill] sm:$0xff] %v5795_v61  ;;  %v5803_v28 = vsel %vm2535_vm3, %v5795_v61, -1e+30 }
 0x458   : > { %6519 = vst [vmem:[#allocation21_spill] sm:$0xff] %v5798_v20  ;;  %2626 = vmax.xlane.f32.xlu0 %v5803_v28  ;;  %v5809_v18 = vsel %vm2535_vm3, %v5798_v20, -1e+30 }
 0x459   : > { %2624 = vmax.xlane.f32.xlu1 %v5809_v18 }
 0x45a   : > { %v4190_v21 = vpop.f32.mrb[94].mxu0 }
 0x45b   : > { %v2491_v11 = vadd.f32 %v4190_v21, %v5546_v26  ;;  %v2485_v2 = vpop.f32.mrb[95].mxu0 }
 0x45c   : > { %v2486_v63 = vadd.f32 %v2485_v2, %v5553_v30 }
 0x45d   : > { %v5815_v46 = vadd.f32 %v5505_v6, %v2491_v11 }
 0x45e   : > { %v5818_v61 = vadd.f32 %v5505_v6, %v2486_v63 }
 0x45f   : > { %6520 = vst [vmem:[#allocation22_spill] sm:$0xff] %v5815_v46  ;;  %v5823_v25 = vsel %vm2535_vm3, %v5815_v46, -1e+30 }
 0x460   : > { %6521 = vst [vmem:[#allocation23_spill] sm:$0xff] %v5818_v61  ;;  %2630 = vmax.xlane.f32.xlu0 %v5823_v25  ;;  %v5829_v26 = vsel %vm2535_vm3, %v5818_v61, -1e+30 }
 0x461   : > { %2628 = vmax.xlane.f32.xlu1 %v5829_v26 }
 0x475   : > { %v2571_v30 = vpop.xlane.xlu1 %2570 }
 0x476   : > { %v2633_v21 = vsub.f32 %v5521_v14, %v2571_v30  ;;  %v2569_v11 = vpop.xlane.xlu0 %2568 }
 0x477   : > { %v2632_v6 = vsub.f32 %v5527_v15, %v2569_v11 }
 0x478   : > { %v2666_v2 = vmul.f32 1.442695, %v2633_v21 }
 0x479   : > { %v2664_v63 = vmul.f32 1.442695, %v2632_v6 }
 0x47a   : > { %4379 = vpow2.f32 %v2666_v2 }
 0x47b   : > { %4381 = vpow2.f32 %v2664_v63 }
 0x47d   : > { %v2575_v46 = vpop.xlane.xlu0 %2574 }
 0x47e   : > { %v2635_v20 = vsub.f32 %v5543_v24, %v2575_v46 }
 0x480   : > { %v2670_v7 = vmul.f32 1.442695, %v2635_v20 }
 0x481   : > { %v2573_v49 = vpop.xlane.xlu0 %2572 }
 0x482   : > { %4383 = vpow2.f32 %v2670_v7  ;;  %v2634_v61 = vsub.f32 %v5551_v27, %v2573_v49 }
 0x484   : > { %v5836_v4 = vpop.eup %4379  ;;  %v2668_v37 = vmul.f32 1.442695, %v2634_v61 }
 0x485   : > { %v5838_v52 = vpop.eup %4381  ;;  %2730 = vadd.xlane.f32.xlu0 %v5836_v4 }
 0x486   : > { %4385 = vpow2.f32 %v2668_v37  ;;  %v2579_v14 = vpop.xlane.xlu0 %2578  ;;  %2728 = vadd.xlane.f32.xlu1 %v5838_v52 }
 0x487   : > { %v2637_v15 = vsub.f32 %v5565_v34, %v2579_v14  ;;  %v2577_v30 = vpop.xlane.xlu1 %2576 }
 0x488   : > { %v2636_v24 = vsub.f32 %v5571_v35, %v2577_v30 }
 0x489   : > { %v2674_v20 = vmul.f32 1.442695, %v2637_v15 }
 0x48a   : > { %v2672_v7 = vmul.f32 1.442695, %v2636_v24 }
 0x48b   : > { %4387 = vpow2.f32 %v2674_v20 }
 0x48c   : > { %v5844_v27 = vpop.eup %4383  ;;  %4389 = vpow2.f32 %v2672_v7 }
 0x48d   : > { %2734 = vadd.xlane.f32.xlu0 %v5844_v27  ;;  %v2583_v49 = vpop.xlane.xlu0 %2582 }
 0x48e   : > { %v2639_v61 = vsub.f32 %v5583_v42, %v2583_v49  ;;  %v2581_v37 = vpop.xlane.xlu1 %2580 }
 0x48f   : > { %v2638_v46 = vsub.f32 %v5589_v60, %v2581_v37 }
 0x490   : > { %v5849_v21 = vpop.eup %4385  ;;  %v2678_v34 = vmul.f32 1.442695, %v2639_v61 }
 0x491   : > { %v2676_v11 = vmul.f32 1.442695, %v2638_v46  ;;  %2732 = vadd.xlane.f32.xlu1 %v5849_v21 }
 0x492   : > { %4391 = vpow2.f32 %v2678_v34 }
 0x493   : > { %4393 = vpow2.f32 %v2676_v11 }
 0x495   : > { %v5852_v35 = vpop.eup %4387  ;;  %v2587_v6 = vpop.xlane.xlu0 %2586 }
 0x496   : > { %v5854_v2 = vpop.eup %4389  ;;  %2738 = vadd.xlane.f32.xlu0 %v5852_v35  ;;  %v2641_v42 = vsub.f32 %v5603_v5, %v2587_v6  ;;  %v2585_v63 = vpop.xlane.xlu1 %2584 }
 0x497   : > { %v2640_v60 = vsub.f32 %v5609_v48, %v2585_v63  ;;  %2736 = vadd.xlane.f32.xlu1 %v5854_v2 }
 0x498   : > { %v2682_v14 = vmul.f32 1.442695, %v2641_v42 }
 0x499   : > { %v2680_v15 = vmul.f32 1.442695, %v2640_v60 }
 0x49a   : > { %4395 = vpow2.f32 %v2682_v14 }
 0x49b   : > { %4397 = vpow2.f32 %v2680_v15 }
 0x49c   : > { %v5860_v30 = vpop.eup %4391 }
 0x49d   : > { %v5862_v24 = vpop.eup %4393  ;;  %2742 = vadd.xlane.f32.xlu0 %v5860_v30  ;;  %v2591_v20 = vpop.xlane.xlu0 %2590 }
 0x49e   : > { %v2643_v7 = vsub.f32 %v5623_v19, %v2591_v20  ;;  %v2589_v49 = vpop.xlane.xlu1 %2588  ;;  %2740 = vadd.xlane.f32.xlu1 %v5862_v24 }
 0x49f   : > { %v2642_v5 = vsub.f32 %v5629_v50, %v2589_v49 }
 0x4a0   : > { %v2686_v48 = vmul.f32 1.442695, %v2643_v7 }
 0x4a1   : > { %v2684_v61 = vmul.f32 1.442695, %v2642_v5  ;;  %v2862_v5 = vrot.slane %v5513_v12, 4 }
 0x4a2   : > { %4399 = vpow2.f32 %v2686_v48 }
 0x4a3   : > { %4401 = vpow2.f32 %v2684_v61 }
 0x4a4   : > { %v5868_v37 = vpop.eup %4395 }
 0x4a5   : > { %v5870_v46 = vpop.eup %4397  ;;  %2746 = vadd.xlane.f32.xlu0 %v5868_v37  ;;  %v2595_v34 = vpop.xlane.xlu0 %2594 }
 0x4a6   : > { %6522 = vst [vmem:[#allocation24_spill] sm:$0xff] %v5870_v46  ;;  %v2645_v11 = vsub.f32 %v5643_v36, %v2595_v34  ;;  %v2593_v6 = vpop.xlane.xlu1 %2592  ;;  %2744 = vadd.xlane.f32.xlu1 %v5870_v46 }
 0x4a7   : > { %v2644_v19 = vsub.f32 %v5649_v51, %v2593_v6 }
 0x4a8   : > { %v2690_v42 = vmul.f32 1.442695, %v2645_v11  ;;  %v2863_v11 = vmax.f32 %v5513_v12, %v2862_v5  ;;  %v2874_v5 = vrot.slane %v5535_v22, 4 }
 0x4a9   : > { %v2688_v50 = vmul.f32 1.442695, %v2644_v19  ;;  %v2856_v19 = vrot.slane %v5516_v13, 4 }
 0x4aa   : > { %4403 = vpow2.f32 %v2690_v42 }
 0x4ab   : > { %4405 = vpow2.f32 %v2688_v50 }
 0x4ac   : > { %v5876_v63 = vpop.eup %4399 }
 0x4ad   : > { %6523 = vst [vmem:[#allocation25_spill] sm:$0xff] %v5876_v63  ;;  %v5878_v60 = vpop.eup %4401  ;;  %2750 = vadd.xlane.f32.xlu0 %v5876_v63  ;;  %v2599_v14 = vpop.xlane.xlu0 %2598 }
 0x4ae   : > { %6524 = vst [vmem:[#allocation26_spill] sm:$0xff] %v5878_v60  ;;  %v2647_v15 = vsub.f32 %v5663_v45, %v2599_v14  ;;  %v2597_v20 = vpop.xlane.xlu1 %2596  ;;  %2748 = vadd.xlane.f32.xlu1 %v5878_v60  ;;  %v2864_v14 = vrot.slane %v2863_v11, 2 }
 0x4af   : > { %v2646_v36 = vsub.f32 %v5669_v53, %v2597_v20 }
 0x4b0   : > { %v2694_v7 = vmul.f32 1.442695, %v2647_v15 }
 0x4b1   : > { %v2692_v51 = vmul.f32 1.442695, %v2646_v36 }
 0x4b2   : > { %4407 = vpow2.f32 %v2694_v7 }
 0x4b3   : > { %4409 = vpow2.f32 %v2692_v51  ;;  %v2865_v51 = vmax.f32 %v2863_v11, %v2864_v14 }
 0x4b4   : > { %v5884_v49 = vpop.eup %4403 }
 0x4b5   : > { %6525 = vst [vmem:[#allocation27_spill] sm:$0xff] %v5884_v49  ;;  %v5887_v48 = vpop.eup %4405  ;;  %2754 = vadd.xlane.f32.xlu0 %v5884_v49  ;;  %v2603_v61 = vpop.xlane.xlu0 %2602 }
 0x4b6   : > { %6526 = vst [vmem:[#allocation28_spill] sm:$0xff] %v5887_v48  ;;  %v2649_v45 = vsub.f32 %v5683_v0, %v2603_v61  ;;  %v2601_v34 = vpop.xlane.xlu1 %2600  ;;  %2752 = vadd.xlane.f32.xlu1 %v5887_v48  ;;  %v2857_v0 = vmax.f32 %v5516_v13, %v2856_v19  ;;  %v2866_v19 = vrot.slane %v2865_v51, 1 }
 0x4b7   : > { %v2648_v53 = vsub.f32 %v5689_v55, %v2601_v34  ;;  %v2868_v34 = vrot.slane %v5538_v23, 4 }
 0x4b8   : > { %v2698_v6 = vmul.f32 1.442695, %v2649_v45  ;;  %v2858_v45 = vrot.slane %v2857_v0, 2 }
 0x4b9   : > { %v2696_v42 = vmul.f32 1.442695, %v2648_v53 }
 0x4ba   : > { %4411 = vpow2.f32 %v2698_v6 }
 0x4bb   : > { %4413 = vpow2.f32 %v2696_v42 }
 0x4bc   : > { %v5895_v50 = vpop.eup %4407 }
 0x4bd   : > { %6527 = vst [vmem:[#allocation29_spill] sm:$0xff] %v5895_v50  ;;  %v5897_v15 = vpop.eup %4409  ;;  %2758 = vadd.xlane.f32.xlu0 %v5895_v50  ;;  %v2607_v20 = vpop.xlane.xlu0 %2606  ;;  %v2886_v50 = vrot.slane %v5557_v32, 4 }
 0x4be   : > { %6528 = vst [vmem:[#allocation30_spill] sm:$0xff] %v5897_v15  ;;  %v2651_v55 = vsub.f32 %v5703_v38, %v2607_v20  ;;  %v2605_v36 = vpop.xlane.xlu1 %2604  ;;  %2756 = vadd.xlane.f32.xlu1 %v5897_v15  ;;  %v2875_v38 = vmax.f32 %v5535_v22, %v2874_v5  ;;  %v2859_v20 = vmax.f32 %v2857_v0, %v2858_v45 }
 0x4bf   : > { %v2650_v7 = vsub.f32 %v5709_v57, %v2605_v36  ;;  %v2869_v57 = vmax.f32 %v5538_v23, %v2868_v34 }
 0x4c0   : > { %v2702_v61 = vmul.f32 1.442695, %v2651_v55  ;;  %v2860_v15 = vrot.slane %v2859_v20, 1 }
 0x4c1   : > { %v2700_v53 = vmul.f32 1.442695, %v2650_v7  ;;  %v2867_v7 = vmax.f32 %v2865_v51, %v2866_v19  ;;  %v2870_v5 = vrot.slane %v2869_v57, 2 }
 0x4c2   : > { %4415 = vpow2.f32 %v2702_v61  ;;  %v2876_v61 = vrot.slane %v2875_v38, 2 }
 0x4c3   : > { %4417 = vpow2.f32 %v2700_v53  ;;  %v3049_v34 = vsub.f32 %v5513_v12, %v2867_v7 }
 0x4c4   : > { %v5906_v6 = vpop.eup %4411 }
 0x4c5   : > { %6529 = vst [vmem:[#allocation31_spill] sm:$0xff] %v5906_v6  ;;  %v5909_v42 = vpop.eup %4413  ;;  %2762 = vadd.xlane.f32.xlu0 %v5906_v6  ;;  %v2611_v11 = vpop.xlane.xlu0 %2610  ;;  %v2871_v6 = vmax.f32 %v2869_v57, %v2870_v5  ;;  %v3082_v12 = vmul.f32 1.442695, %v3049_v34 }
 0x4c6   : > { %6530 = vst [vmem:[#allocation32_spill] sm:$0xff] %v5909_v42  ;;  %v2653_v14 = vsub.f32 %v5723_v56, %v2611_v11  ;;  %v2609_v55 = vpop.xlane.xlu1 %2608  ;;  %2760 = vadd.xlane.f32.xlu1 %v5909_v42  ;;  %v2877_v56 = vmax.f32 %v2875_v38, %v2876_v61  ;;  %v2861_v42 = vmax.f32 %v2859_v20, %v2860_v15 }
 0x4c7   : > { %v2652_v36 = vsub.f32 %v5729_v59, %v2609_v55  ;;  %v2887_v59 = vmax.f32 %v5557_v32, %v2886_v50  ;;  %v2880_v55 = vrot.slane %v5560_v33, 4  ;;  %v2872_v20 = vrot.slane %v2871_v6, 1 }
 0x4c8   : > { %v2706_v53 = vmul.f32 1.442695, %v2653_v14  ;;  %v2878_v38 = vrot.slane %v2877_v56, 1  ;;  %v3048_v15 = vsub.f32 %v5516_v13, %v2861_v42 }
 0x4c9   : > { %v2704_v0 = vmul.f32 1.442695, %v2652_v36  ;;  %v2888_v57 = vrot.slane %v2887_v59, 2  ;;  %v2881_v61 = vmax.f32 %v5560_v33, %v2880_v55 }
 0x4ca   : > { %4419 = vpow2.f32 %v2706_v53  ;;  %v2879_v53 = vmax.f32 %v2877_v56, %v2878_v38  ;;  %v2898_v56 = vrot.slane %v5575_v40, 4  ;;  %v2892_v38 = vrot.slane %v5578_v41, 4 }
 0x4cb   : > { %4421 = vpow2.f32 %v2704_v0  ;;  %v3080_v0 = vmul.f32 1.442695, %v3048_v15  ;;  %v2889_v34 = vmax.f32 %v2887_v59, %v2888_v57 }
 0x4cc   : > { %v5917_v45 = vpop.eup %4415  ;;  %v3051_v55 = vsub.f32 %v5535_v22, %v2879_v53  ;;  %v2893_v53 = vmax.f32 %v5578_v41, %v2892_v38  ;;  %v2922_v38 = vrot.slane %v5615_v16, 4 }
 0x4cd   : > { %6531 = vst [vmem:[#allocation33_spill] sm:$0xff] %v5917_v45  ;;  %v5920_v11 = vpop.eup %4417  ;;  %2766 = vadd.xlane.f32.xlu0 %v5917_v45  ;;  %v2615_v51 = vpop.xlane.xlu0 %2614  ;;  %v2890_v59 = vrot.slane %v2889_v34, 1 }
 0x4ce   : > { %6532 = vst [vmem:[#allocation34_spill] sm:$0xff] %v5920_v11  ;;  %v2655_v19 = vsub.f32 %v5743_v54, %v2615_v51  ;;  %v2613_v14 = vpop.xlane.xlu1 %2612  ;;  %2764 = vadd.xlane.f32.xlu1 %v5920_v11  ;;  %v3086_v15 = vmul.f32 1.442695, %v3051_v55 }
 0x4cf   : > { %v2654_v36 = vsub.f32 %v5749_v62, %v2613_v14  ;;  %v2873_v62 = vmax.f32 %v2871_v6, %v2872_v20  ;;  %v2891_v57 = vmax.f32 %v2889_v34, %v2890_v59 }
 0x4d0   : > { %v2710_v7 = vmul.f32 1.442695, %v2655_v19  ;;  %v2882_v19 = vrot.slane %v2881_v61, 2 }
 0x4d1   : > { %v2708_v50 = vmul.f32 1.442695, %v2654_v36  ;;  %v3050_v6 = vsub.f32 %v5538_v23, %v2873_v62 }
 0x4d2   : > { %4423 = vpow2.f32 %v2710_v7 }
 0x4d3   : > { %4425 = vpow2.f32 %v2708_v50  ;;  %v3084_v22 = vmul.f32 1.442695, %v3050_v6 }
 0x4d4   : > { %v5930_v54 = vpop.eup %4419  ;;  %4427 = vpow2.f32 %v3082_v12 }
 0x4d5   : > { %6533 = vst [vmem:[#allocation35_spill] sm:$0xff] %v5930_v54  ;;  %v5932_v5 = vpop.eup %4421  ;;  %2770 = vadd.xlane.f32.xlu0 %v5930_v54  ;;  %v2619_v51 = vpop.xlane.xlu0 %2618  ;;  %4429 = vpow2.f32 %v3080_v0 }
 0x4d6   : > { %6534 = vst [vmem:[#allocation36_spill] sm:$0xff] %v5932_v5  ;;  %v2657_v13 = vsub.f32 %v5763_v58, %v2619_v51  ;;  %v2617_v42 = vpop.xlane.xlu1 %2616  ;;  %2768 = vadd.xlane.f32.xlu1 %v5932_v5  ;;  %v2883_v58 = vmax.f32 %v2881_v61, %v2882_v19  ;;  %v2910_v51 = vrot.slane %v5595_v47, 4  ;;  %v2940_v5 = vrot.slane %v5658_v44, 4 }
 0x4d7   : > { %v2656_v14 = vsub.f32 %v5769_v1, %v2617_v42  ;;  %v2899_v1 = vmax.f32 %v5575_v40, %v2898_v56  ;;  %v2894_v56 = vrot.slane %v2893_v53, 2 }
 0x4d8   : > { %v2714_v36 = vmul.f32 1.442695, %v2657_v13  ;;  %v2884_v62 = vrot.slane %v2883_v58, 1  ;;  %v2911_v59 = vmax.f32 %v5595_v47, %v2910_v51 }
 0x4d9   : > { %v2712_v12 = vmul.f32 1.442695, %v2656_v14  ;;  %v2900_v42 = vrot.slane %v2899_v1, 2  ;;  %v3053_v14 = vsub.f32 %v5557_v32, %v2891_v57  ;;  %v2916_v32 = vrot.slane %v5618_v17, 4 }
 0x4da   : > { %4431 = vpow2.f32 %v2714_v36  ;;  %v2885_v6 = vmax.f32 %v2883_v58, %v2884_v62 }
 0x4db   : > { %4433 = vpow2.f32 %v2712_v12  ;;  %v2901_v12 = vmax.f32 %v2899_v1, %v2900_v42 }
 0x4dc   : > { %v5942_v7 = vpop.eup %4423  ;;  %4435 = vpow2.f32 %v3086_v15  ;;  %v3052_v51 = vsub.f32 %v5560_v33, %v2885_v6  ;;  %v2928_v33 = vrot.slane %v5638_v31, 4 }
 0x4dd   : > { %6535 = vst [vmem:[#allocation37_spill] sm:$0xff] %v5942_v7  ;;  %v5945_v20 = vpop.eup %4425  ;;  %2774 = vadd.xlane.f32.xlu0 %v5942_v7  ;;  %v2623_v50 = vpop.xlane.xlu0 %2622  ;;  %4437 = vpow2.f32 %v3084_v22  ;;  %v3090_v22 = vmul.f32 1.442695, %v3053_v14  ;;  %v2923_v14 = vmax.f32 %v5615_v16, %v2922_v38 }
 0x4de   : > { %6536 = vst [vmem:[#allocation38_spill] sm:$0xff] %v5945_v20  ;;  %v5948_v23 = vpop.eup %4427  ;;  %v2659_v0 = vsub.f32 %v5783_v39, %v2623_v50  ;;  %v2621_v61 = vpop.xlane.xlu1 %2620  ;;  %2772 = vadd.xlane.f32.xlu1 %v5945_v20  ;;  %v2904_v39 = vrot.slane %v5598_v3, 4 }
 0x4df   : > { %v2658_v13 = vsub.f32 %v5789_v8, %v2621_v61  ;;  %v3150_v19 = vrot.slane %v5948_v23, 4  ;;  %v5958_v36 = vpop.eup %4429 }
 0x4e0   : > { %v2718_v34 = vmul.f32 1.442695, %v2659_v0  ;;  %v2895_v0 = vmax.f32 %v2893_v53, %v2894_v56  ;;  %v2905_v58 = vmax.f32 %v5598_v3, %v2904_v39  ;;  %v3144_v1 = vrot.slane %v5958_v36, 4 }
 0x4e1   : > { %v2716_v55 = vmul.f32 1.442695, %v2658_v13  ;;  %v3151_v50 = vadd.f32 %v5948_v23, %v3150_v19  ;;  %v2912_v13 = vrot.slane %v2911_v59, 2  ;;  %v2934_v19 = vrot.slane %v5635_v29, 4 }
 0x4e2   : > { %4439 = vpow2.f32 %v2718_v34  ;;  %v2902_v34 = vrot.slane %v2901_v12, 1  ;;  %v3145_v38 = vadd.f32 %v5958_v36, %v3144_v1 }
 0x4e3   : > { %4441 = vpow2.f32 %v2716_v55  ;;  %v2917_v55 = vmax.f32 %v5618_v17, %v2916_v32  ;;  %v3152_v56 = vrot.slane %v3151_v50, 2  ;;  %v2924_v32 = vrot.slane %v2923_v14, 2 }
 0x4e4   : > { %v5961_v8 = vpop.eup %4431  ;;  %4443 = vpow2.f32 %v3090_v22  ;;  %v2903_v22 = vmax.f32 %v2901_v12, %v2902_v34  ;;  %v2929_v12 = vmax.f32 %v5638_v31, %v2928_v33  ;;  %v3146_v45 = vrot.slane %v3145_v38, 2 }
 0x4e5   : > { %6537 = vst [vmem:[#allocation39_spill] sm:$0xff] %v5961_v8  ;;  %v5964_v15 = vpop.eup %4433  ;;  %2778 = vadd.xlane.f32.xlu0 %v5961_v8  ;;  %v2627_v57 = vpop.xlane.xlu0 %2626  ;;  %v2946_v8 = vrot.slane %v5655_v43, 4  ;;  %v2925_v48 = vmax.f32 %v2923_v14, %v2924_v32  ;;  %v2958_v33 = vrot.slane %v5675_v9, 4 }
 0x4e6   : > { %6538 = vst [vmem:[#allocation40_spill] sm:$0xff] %v5964_v15  ;;  %v2661_v61 = vsub.f32 %v5803_v28, %v2627_v57  ;;  %v2625_v62 = vpop.xlane.xlu1 %2624  ;;  %2776 = vadd.xlane.f32.xlu1 %v5964_v15  ;;  %v5978_v39 = vpop.eup %4435  ;;  %v2896_v57 = vrot.slane %v2895_v0, 1  ;;  %v2906_v15 = vrot.slane %v2905_v58, 2 }
 0x4e7   : > { %v2660_v42 = vsub.f32 %v5809_v18, %v2625_v62  ;;  %v5981_v6 = vpop.eup %4437  ;;  %v3088_v18 = vmul.f32 1.442695, %v3052_v51  ;;  %v2913_v62 = vmax.f32 %v2911_v59, %v2912_v13  ;;  %v3162_v7 = vrot.slane %v5978_v39, 4 }
 0x4e8   : > { %v2722_v53 = vmul.f32 1.442695, %v2661_v61  ;;  %v3153_v51 = vadd.f32 %v3152_v56, %v3151_v50  ;;  %v2897_v1 = vmax.f32 %v2895_v0, %v2896_v57  ;;  %v2907_v13 = vmax.f32 %v2905_v58, %v2906_v15 }
 0x4e9   : > { %v2720_v28 = vmul.f32 1.442695, %v2660_v42  ;;  %v2935_v42 = vmax.f32 %v5635_v29, %v2934_v19  ;;  %v2914_v54 = vrot.slane %v2913_v62, 1  ;;  %v3055_v15 = vsub.f32 %v5575_v40, %v2903_v22 }
 0x4ea   : > { %4445 = vpow2.f32 %v2722_v53  ;;  %v2918_v53 = vrot.slane %v2917_v55, 2  ;;  %v2941_v58 = vmax.f32 %v5658_v44, %v2940_v5  ;;  %v2908_v56 = vrot.slane %v2907_v13, 1 }
 0x4eb   : > { %4447 = vpow2.f32 %v2720_v28  ;;  %v3156_v28 = vrot.slane %v5981_v6, 4  ;;  %v2936_v49 = vrot.slane %v2935_v42, 2  ;;  %v2930_v57 = vrot.slane %v2929_v12, 2 }
 0x4ec   : > { %v5984_v61 = vpop.eup %4439  ;;  %v2919_v0 = vmax.f32 %v2917_v55, %v2918_v53  ;;  %v2915_v14 = vmax.f32 %v2913_v62, %v2914_v54  ;;  %v2926_v40 = vrot.slane %v2925_v48, 1  ;;  %v3154_v5 = vrot.slane %v3153_v51, 1 }
 0x4ed   : > { %6539 = vst [vmem:[#allocation41_spill] sm:$0xff] %v5984_v61  ;;  %v5988_v20 = vpop.eup %4441  ;;  %2782 = vadd.xlane.f32.xlu0 %v5984_v61  ;;  %v2631_v59 = vpop.xlane.xlu0 %2630  ;;  %v2947_v61 = vmax.f32 %v5655_v43, %v2946_v8  ;;  %v3163_v8 = vadd.f32 %v5978_v39, %v3162_v7  ;;  %v2937_v55 = vmax.f32 %v2935_v42, %v2936_v49  ;;  %v3094_v53 = vmul.f32 1.442695, %v3055_v15 }
 0x4ee   : > { %6540 = vst [vmem:[#allocation42_spill] sm:$0xff] %v5988_v20  ;;  %v2663_v34 = vsub.f32 %v5823_v25, %v2631_v59  ;;  %v2629_v19 = vpop.xlane.xlu1 %2628  ;;  %2780 = vadd.xlane.f32.xlu1 %v5988_v20  ;;  %v6002_v59 = vpop.eup %4443  ;;  %v2959_v54 = vmax.f32 %v5675_v9, %v2958_v33  ;;  %v3147_v7 = vadd.f32 %v3146_v45, %v3145_v38  ;;  %v2952_v45 = vrot.slane %v5678_v10, 4 }
 0x4ef   : > { %v2662_v11 = vsub.f32 %v5829_v26, %v2629_v19  ;;  %v3054_v26 = vsub.f32 %v5578_v41, %v2897_v1  ;;  %v2948_v22 = vrot.slane %v2947_v61, 2  ;;  %v2942_v19 = vrot.slane %v2941_v58, 2 }
 0x4f0   : > { %v2726_v50 = vmul.f32 1.442695, %v2663_v34  ;;  %v2920_v34 = vrot.slane %v2919_v0, 1  ;;  %v2931_v41 = vmax.f32 %v2929_v12, %v2930_v57  ;;  %v3057_v49 = vsub.f32 %v5595_v47, %v2915_v14 }
 0x4f1   : > { %v2724_v25 = vmul.f32 1.442695, %v2662_v11  ;;  %v3092_v62 = vmul.f32 1.442695, %v3054_v26  ;;  %v3164_v42 = vrot.slane %v3163_v8, 2  ;;  %v3157_v1 = vadd.f32 %v5981_v6, %v3156_v28 }
 0x4f2   : > { %4449 = vpow2.f32 %v2726_v50  ;;  %v2909_v50 = vmax.f32 %v2907_v13, %v2908_v56  ;;  %v2949_v15 = vmax.f32 %v2947_v61, %v2948_v22  ;;  %v3155_v20 = vadd.f32 %v3154_v5, %v3153_v51 }
 0x4f3   : > { %4451 = vpow2.f32 %v2724_v25  ;;  %v2927_v25 = vmax.f32 %v2925_v48, %v2926_v40  ;;  %v3174_v60 = vrot.slane %v6002_v59, 4  ;;  %v2921_v13 = vmax.f32 %v2919_v0, %v2920_v34 }
 0x4f4   : > { %v6006_v32 = vpop.eup %4445  ;;  %4453 = vpow2.f32 %v3088_v18  ;;  %v2938_v18 = vrot.slane %v2937_v55, 1  ;;  %v2943_v12 = vmax.f32 %v2941_v58, %v2942_v19  ;;  %v3056_v56 = vsub.f32 %v5598_v3, %v2909_v50 }
 0x4f5   : > { %6541 = vst [vmem:[#allocation43_spill] sm:$0xff] %v6006_v32  ;;  %v6008_v11 = vpop.eup %4447  ;;  %2786 = vadd.xlane.f32.xlu0 %v6006_v32  ;;  %4455 = vpow2.f32 %v3094_v53  ;;  %v2932_v57 = vrot.slane %v2931_v41, 1  ;;  %v2960_v33 = vrot.slane %v2959_v54, 2  ;;  %v3098_v38 = vmul.f32 1.442695, %v3057_v49 }
 0x4f6   : > { %6542 = vst [vmem:[#allocation44_spill] sm:$0xff] %v6008_v11  ;;  %2784 = vadd.xlane.f32.xlu1 %v6008_v11  ;;  %v3148_v47 = vrot.slane %v3147_v7, 1  ;;  %v3165_v26 = vadd.f32 %v3164_v42, %v3163_v8  ;;  %v3158_v14 = vrot.slane %v3157_v1, 2  ;;  %4457 = vpow2.f32 %v3092_v62 }
 0x4f7   : > { %v3059_v48 = vsub.f32 %v5615_v16, %v2927_v25  ;;  %v2939_v61 = vmax.f32 %v2937_v55, %v2938_v18  ;;  %v2950_v51 = vrot.slane %v2949_v15, 1  ;;  %v3058_v0 = vsub.f32 %v5618_v17, %v2921_v13 }
 0x4f8   : > { %v2944_v3 = vrot.slane %v2943_v12, 1  ;;  %4459 = vrcp.f32 %v3155_v20  ;;  %v3175_v58 = vadd.f32 %v6002_v59, %v3174_v60  ;;  %v3096_v22 = vmul.f32 1.442695, %v3056_v56  ;;  %v6545_v20 = vld [vmem:[#allocation10_spill] sm:$0xff] }
 0x4f9   : > { %v2933_v8 = vmax.f32 %v2931_v41, %v2932_v57  ;;  %v2961_v5 = vmax.f32 %v2959_v54, %v2960_v33  ;;  %v2953_v53 = vmax.f32 %v5678_v10, %v2952_v45  ;;  %4461 = vpow2.f32 %v3098_v38  ;;  %v6546_v41 = vld [vmem:[#allocation11_spill] sm:$0xff] }
 0x4fa   : > { %v3149_v55 = vadd.f32 %v3148_v47, %v3147_v7  ;;  %v3166_v34 = vrot.slane %v3165_v26, 1  ;;  %v3159_v19 = vadd.f32 %v3158_v14, %v3157_v1  ;;  %v3102_v17 = vmul.f32 1.442695, %v3059_v48 }
 0x4fb   : > { %v3061_v50 = vsub.f32 %v5635_v29, %v2939_v61  ;;  %v2951_v62 = vmax.f32 %v2949_v15, %v2950_v51  ;;  %v2970_v49 = vrot.slane %v6545_v20, 4  ;;  %v3100_v60 = vmul.f32 1.442695, %v3058_v0  ;;  %v6547_v51 = vld [vmem:[#allocation12_spill] sm:$0xff] }
 0x4fc   : > { %v6018_v28 = vpop.eup %4449  ;;  %v2945_v42 = vmax.f32 %v2943_v12, %v2944_v3  ;;  %v2964_v54 = vrot.slane %v6546_v41, 4  ;;  %v3176_v25 = vrot.slane %v3175_v58, 2  ;;  %4463 = vpow2.f32 %v3096_v22 }
 0x4fd   : > { %6543 = vst [vmem:[#allocation45_spill] sm:$0xff] %v6018_v28  ;;  %v6021_v40 = vpop.eup %4451  ;;  %2790 = vadd.xlane.f32.xlu0 %v6018_v28  ;;  %v3060_v18 = vsub.f32 %v5638_v31, %v2933_v8  ;;  %v2962_v13 = vrot.slane %v2961_v5, 1  ;;  %v2954_v56 = vrot.slane %v2953_v53, 2  ;;  %4465 = vrcp.f32 %v3149_v55 }
 0x4fe   : > { %6544 = vst [vmem:[#allocation46_spill] sm:$0xff] %v6021_v40  ;;  %2788 = vadd.xlane.f32.xlu1 %v6021_v40  ;;  %v6028_v16 = vpop.eup %4453  ;;  %v3167_v1 = vadd.f32 %v3166_v34, %v3165_v26  ;;  %v3160_v29 = vrot.slane %v3159_v19, 1  ;;  %4467 = vpow2.f32 %v3102_v17  ;;  %v3106_v15 = vmul.f32 1.442695, %v3061_v50  ;;  %v6552_v40 = vld [vmem:[#allocation16_spill] sm:$0xff] }
 0x4ff   : > { %v6034_v57 = vpop.eup %4455  ;;  %v3168_v7 = vrot.slane %v6028_v16, 4  ;;  %v3063_v33 = vsub.f32 %v5655_v43, %v2951_v62  ;;  %v2971_v12 = vmax.f32 %v6545_v20, %v2970_v49  ;;  %4469 = vpow2.f32 %v3100_v60 }
 0x500   : > { %v3062_v45 = vsub.f32 %v5658_v44, %v2945_v42  ;;  %v2965_v31 = vmax.f32 %v6546_v41, %v2964_v54  ;;  %v3177_v38 = vadd.f32 %v3176_v25, %v3175_v58  ;;  %v6041_v47 = vpop.eup %4457  ;;  %v3104_v14 = vmul.f32 1.442695, %v3060_v18  ;;  %v6548_v58 = vld [vmem:[#allocation13_spill] sm:$0xff] }
 0x501   : > { %v2963_v48 = vmax.f32 %v2961_v5, %v2962_v13  ;;  %v2955_v61 = vmax.f32 %v2953_v53, %v2954_v56  ;;  %v2982_v26 = vrot.slane %v6547_v51, 4  ;;  %4471 = vrcp.f32 %v3167_v1  ;;  %v6549_v1 = vld [vmem:[#allocation14_spill] sm:$0xff] }
 0x502   : > { %v4460_v0 = vpop.eup %4459  ;;  %v3161_v3 = vadd.f32 %v3160_v29, %v3159_v19  ;;  %4473 = vpow2.f32 %v3106_v15  ;;  %v3110_v43 = vmul.f32 1.442695, %v3063_v33  ;;  %v2972_v22 = vrot.slane %v2971_v12, 2 }
 0x503   : > { %v3169_v8 = vadd.f32 %v6028_v16, %v3168_v7  ;;  %v6045_v55 = vpop.eup %4461  ;;  %v3108_v44 = vmul.f32 1.442695, %v3062_v45  ;;  %v2966_v34 = vrot.slane %v2965_v31, 2  ;;  %v2976_v17 = vrot.slane %v6548_v58, 4 }
 0x504   : > { %v3178_v50 = vrot.slane %v3177_v38, 1  ;;  %4475 = vpow2.f32 %v3104_v14  ;;  %v3065_v5 = vsub.f32 %v5675_v9, %v2963_v48  ;;  %v2956_v53 = vrot.slane %v2955_v61, 1 }
 0x505   : > { %v2983_v62 = vmax.f32 %v6547_v51, %v2982_v26  ;;  %4477 = vrcp.f32 %v3161_v3  ;;  %v2973_v49 = vmax.f32 %v2971_v12, %v2972_v22  ;;  %v3170_v60 = vrot.slane %v3169_v8, 2 }
 0x506   : > { %v6050_v19 = vpop.eup %4463  ;;  %4479 = vpow2.f32 %v3110_v43  ;;  %v2967_v54 = vmax.f32 %v2965_v31, %v2966_v34  ;;  %v2977_v25 = vmax.f32 %v6548_v58, %v2976_v17  ;;  %v3179_v18 = vadd.f32 %v3178_v50, %v3177_v38 }
 0x507   : > { %v4466_v42 = vpop.eup %4465  ;;  %4481 = vpow2.f32 %v3108_v44  ;;  %v3114_v56 = vmul.f32 1.442695, %v3065_v5  ;;  %v2957_v7 = vmax.f32 %v2955_v61, %v2956_v53  ;;  %v2984_v9 = vrot.slane %v2983_v62, 2  ;;  %v6550_v61 = vld [vmem:[#allocation15_spill] sm:$0xff] }
 0x508   : > { %v6053_v13 = vpop.eup %4467  ;;  %v2994_v29 = vrot.slane %v6549_v1, 4  ;;  %v3186_v33 = vrot.slane %v6034_v57, 4  ;;  %v3180_v12 = vrot.slane %v6041_v47, 4  ;;  %v2974_v14 = vrot.slane %v2973_v49, 1 }
 0x509   : > { %v6056_v15 = vpop.eup %4469  ;;  %v6062_v31 = vmul.f32 %v4460_v0, %v5948_v23  ;;  %v3171_v38 = vadd.f32 %v3170_v60, %v3169_v8  ;;  %v2968_v26 = vrot.slane %v2967_v54, 1  ;;  %v2978_v3 = vrot.slane %v2977_v25, 2 }
 0x50a   : > { %v2988_v43 = vrot.slane %v6550_v61, 4  ;;  %4483 = vrcp.f32 %v3179_v18  ;;  %v3064_v44 = vsub.f32 %v5678_v10, %v2957_v7  ;;  %v2985_v34 = vmax.f32 %v2983_v62, %v2984_v9 }
 0x50b   : > { %v4472_v48 = vpop.eup %4471  ;;  %4485 = vpow2.f32 %v3114_v56  ;;  %v2995_v17 = vmax.f32 %v6549_v1, %v2994_v29  ;;  %v3192_v5 = vrot.slane %v6050_v19, 4  ;;  %v6072_v0 = vmul.f32 %v4466_v42, %v5958_v36  ;;  %v6551_v56 = vld [vmem:[#allocation9_spill] sm:$0xff] }
 0x50c   : > { %v6065_v22 = vpop.eup %4473  ;;  %v2975_v60 = vmax.f32 %v2973_v49, %v2974_v14  ;;  %v3172_v18 = vrot.slane %v3171_v38, 1  ;;  %v3187_v10 = vadd.f32 %v6034_v57, %v3186_v33  ;;  %vm3400_vm4 = vcmp.eq.s32.totalorder %v6551_v56, 16 }
 0x50d   : > { %v2969_v7 = vmax.f32 %v2967_v54, %v2968_v26  ;;  %v2979_v9 = vmax.f32 %v2977_v25, %v2978_v3  ;;  %v2989_v29 = vmax.f32 %v6550_v61, %v2988_v43  ;;  %v3112_v42 = vmul.f32 1.442695, %v3064_v44 }
 0x50e   : > { %v6074_v53 = vpop.eup %4475  ;;  %v2986_v45 = vrot.slane %v2985_v34, 1  ;;  %v2996_v49 = vrot.slane %v2995_v17, 2  ;;  %v3006_v54 = vrot.slane %v6552_v40, 4  ;;  %v6089_v25 = vmul.f32 %v4472_v48, %v5978_v39 }
 0x50f   : > { %v4478_v62 = vpop.eup %4477  ;;  %v3173_v3 = vadd.f32 %v3172_v18, %v3171_v38  ;;  %v3188_v43 = vrot.slane %v3187_v10, 2  ;;  %v3066_v44 = vsub.f32 %v6546_v41, %v2969_v7  ;;  %v2980_v36 = vrot.slane %v2979_v9, 1 }
 0x510   : > { %v6080_v23 = vpop.eup %4479  ;;  %v6093_v26 = vmul.f32 %v4478_v62, %v5981_v6  ;;  %v2990_v28 = vrot.slane %v2989_v29, 2  ;;  %v2987_v11 = vmax.f32 %v2985_v34, %v2986_v45  ;;  %v2997_v32 = vmax.f32 %v2995_v17, %v2996_v49 }
 0x511   : > { %v6083_v14 = vpop.eup %4481  ;;  %v3007_v6 = vmax.f32 %v6552_v40, %v3006_v54  ;;  %v3189_v18 = vadd.f32 %v3188_v43, %v3187_v10  ;;  %v6554_v7 = vrot.slane %v6045_v55, 4  ;;  %v3116_v17 = vmul.f32 1.442695, %v3066_v44 }
 0x512   : > { %v2731_v50 = vpop.xlane.xlu0 %2730  ;;  %v2991_v49 = vmax.f32 %v2989_v29, %v2990_v28  ;;  %v3069_v54 = vsub.f32 %v6547_v51, %v2987_v11  ;;  %v2998_v63 = vrot.slane %v2997_v32, 1 }
 0x513   : > { %4487 = vrcp.f32 %v2731_v50  ;;  %v2729_v8 = vpop.xlane.xlu1 %2728  ;;  %v3181_v50 = vadd.f32 %v6041_v47, %v3180_v12  ;;  %v3067_v12 = vsub.f32 %v6545_v20, %v2975_v60  ;;  %v6553_v60 = vld [vmem:[#allocation17_spill] sm:$0xff]  ;;  %v3199_v45 = vadd.f32 %v6045_v55, %v6554_v7 }
 0x514   : > { %4489 = vrcp.f32 %v2729_v8  ;;  %v4484_v48 = vpop.eup %4483  ;;  %v3000_v62 = vrot.slane %v6553_v60, 4  ;;  %v2992_v11 = vrot.slane %v2991_v49, 1  ;;  %v2999_v51 = vmax.f32 %v2997_v32, %v2998_v63 }
 0x515   : > { %v3182_v33 = vrot.slane %v3181_v50, 2  ;;  %4491 = vpow2.f32 %v3112_v42  ;;  %v6101_v38 = vpop.eup %4485  ;;  %v3118_v41 = vmul.f32 1.442695, %v3067_v12  ;;  %v2981_v42 = vmax.f32 %v2979_v9, %v2980_v36 }
 0x516   : > { %v3193_v12 = vadd.f32 %v6050_v19, %v3192_v5  ;;  %v3001_v10 = vmax.f32 %v6553_v60, %v3000_v62  ;;  %v3190_v9 = vrot.slane %v3189_v18, 1  ;;  %v3200_v29 = vrot.slane %v3199_v45, 2 }
 0x517   : > { %v3183_v20 = vadd.f32 %v3182_v33, %v3181_v50  ;;  %v3122_v50 = vmul.f32 1.442695, %v3069_v54  ;;  %v3068_v36 = vsub.f32 %v6548_v58, %v2981_v42  ;;  %v2993_v32 = vmax.f32 %v2991_v49, %v2992_v11 }
 0x518   : > { %v3194_v5 = vrot.slane %v3193_v12, 2 }
 0x51a   : > { %v2735_v39 = vpop.xlane.xlu0 %2734 }
 0x51b   : > { %4493 = vrcp.f32 %v2735_v39 }
 0x51c   : > { %4495 = vrcp.f32 %v3173_v3  ;;  %v3008_v3 = vrot.slane %v3007_v6, 2 }
 0x51d   : > { %v4488_v34 = vpop.eup %4487 }
 0x51e   : > { %v4490_v8 = vpop.eup %4489  ;;  %v2795_v39 = vmul.f32 %v4488_v34, %v5836_v4  ;;  %v2733_v46 = vpop.xlane.xlu1 %2732  ;;  %v3009_v33 = vmax.f32 %v3007_v6, %v3008_v3  ;;  %v3191_v34 = vadd.f32 %v3190_v9, %v3189_v18  ;;  %v3071_v6 = vsub.f32 %v6549_v1, %v2999_v51 }
 0x51f   : > { %v2793_v43 = vmul.f32 %v4490_v8, %v5838_v52  ;;  %4497 = vrcp.f32 %v2733_v46  ;;  %v3184_v52 = vrot.slane %v3183_v20, 1  ;;  %v3246_v46 = vrot.slane %v6101_v38, 4  ;;  %v6126_v62 = vpop.eup %4491 }
 0x520   : > { %4499 = vpow2.f32 %v3118_v41  ;;  %v3402_v28 = vsel %vm3400_vm4, %v6062_v31, %v2795_v39  ;;  %v6123_v31 = vmul.f32 %v4484_v48, %v6002_v59  ;;  %v3002_v8 = vrot.slane %v3001_v10, 2  ;;  %v6555_v41 = vld [vmem:[#allocation18_spill] sm:$0xff] }
 0x521   : > { %4501 = vpow2.f32 %v3116_v17  ;;  %3434 = vst [vmem:[%s6114_s27 + $0x8] sm:$0xff] %v3402_v28  ;;  %v3401_v4 = vsel %vm3400_vm4, %v6072_v0, %v2793_v43  ;;  %v3018_v7 = vrot.slane %v6555_v41, 4  ;;  %v3201_v17 = vadd.f32 %v3200_v29, %v3199_v45  ;;  %v6558_v43 = vld [vmem:[#allocation19_spill] sm:$0xff] }
 0x522   : > { %3433 = vst [vmem:[%s6114_s27] sm:$0xff] %v3401_v4  ;;  %v3185_v59 = vadd.f32 %v3184_v52, %v3183_v20  ;;  %v6556_v48 = vrot.slane %v6053_v13, 4  ;;  %v3195_v39 = vadd.f32 %v3194_v5, %v3193_v12  ;;  %v6557_v3 = vrot.slane %v6056_v15, 4 }
 0x523   : > { %v2739_v44 = vpop.xlane.xlu0 %2738  ;;  %v3010_v45 = vrot.slane %v3009_v33, 1  ;;  %v3003_v49 = vmax.f32 %v3001_v10, %v3002_v8  ;;  %v3012_v20 = vrot.slane %v6558_v43, 4  ;;  %v3019_v28 = vmax.f32 %v6555_v41, %v3018_v7 }
 0x524   : > { %4503 = vrcp.f32 %v2739_v44  ;;  %v2737_v0 = vpop.xlane.xlu1 %2736  ;;  %v3211_v54 = vadd.f32 %v6053_v13, %v6556_v48  ;;  %v3205_v18 = vadd.f32 %v6056_v15, %v6557_v3  ;;  %v3202_v1 = vrot.slane %v3201_v17, 1 }
 0x525   : > { %v4494_v63 = vpop.eup %4493  ;;  %4505 = vrcp.f32 %v2737_v0  ;;  %v3070_v12 = vsub.f32 %v6550_v61, %v2993_v32  ;;  %v3126_v10 = vmul.f32 1.442695, %v3071_v6  ;;  %v3196_v5 = vrot.slane %v3195_v39, 1 }
 0x526   : > { %v4496_v58 = vpop.eup %4495  ;;  %v2799_v42 = vmul.f32 %v4494_v63, %v5844_v27  ;;  %4507 = vpow2.f32 %v3122_v50  ;;  %v3120_v27 = vmul.f32 1.442695, %v3068_v36  ;;  %v3212_v11 = vrot.slane %v3211_v54, 2 }
 0x527   : > { %4509 = vrcp.f32 %v3191_v34  ;;  %v3206_v50 = vrot.slane %v3205_v18, 2  ;;  %v3004_v44 = vrot.slane %v3003_v49, 1  ;;  %v3013_v36 = vmax.f32 %v6558_v43, %v3012_v20 }
 0x528   : > { %v3404_v9 = vsel %vm3400_vm4, %v6089_v25, %v2799_v42  ;;  %4511 = vrcp.f32 %v3185_v59  ;;  %v3011_v25 = vmax.f32 %v3009_v33, %v3010_v45  ;;  %v3020_v7 = vrot.slane %v3019_v28, 2 }
 0x529   : > { %v4498_v29 = vpop.eup %4497  ;;  %3436 = vst [vmem:[%s6114_s27 + $0x18] sm:$0xff] %v3404_v9  ;;  %v3203_v34 = vadd.f32 %v3202_v1, %v3201_v17  ;;  %v3213_v63 = vadd.f32 %v3212_v11, %v3211_v54  ;;  %v6559_v32 = vrot.slane %v6065_v22, 4  ;;  %v3345_v48 = vmul.f32 %v4496_v58, %v6028_v16 }
 0x52a   : > { %v6144_v4 = vpop.eup %4499  ;;  %v2797_v52 = vmul.f32 %v4498_v29, %v5849_v21  ;;  %v2743_v51 = vpop.xlane.xlu0 %2742  ;;  %v3124_v21 = vmul.f32 1.442695, %v3070_v12  ;;  %v3197_v6 = vadd.f32 %v3196_v5, %v3195_v39  ;;  %v3207_v42 = vadd.f32 %v3206_v50, %v3205_v18 }
 0x52b   : > { %v6147_v8 = vpop.eup %4501  ;;  %4513 = vrcp.f32 %v2743_v51  ;;  %v2741_v61 = vpop.xlane.xlu1 %2740  ;;  %v3223_v33 = vadd.f32 %v6065_v22, %v6559_v32  ;;  %v6560_v3 = vrot.slane %v6074_v53, 4  ;;  %v3073_v17 = vsub.f32 %v6552_v40, %v3011_v25 }
 0x52c   : > { %v3403_v0 = vsel %vm3400_vm4, %v6093_v26, %v2797_v52  ;;  %4515 = vrcp.f32 %v2741_v61  ;;  %v6162_v20 = vmax.f32 %v3003_v49, %v3004_v44  ;;  %v3021_v9 = vmax.f32 %v3019_v28, %v3020_v7 }
 0x52d   : > { %4517 = vpow2.f32 %v3120_v27  ;;  %3435 = vst [vmem:[%s6114_s27 + $0x10] sm:$0xff] %v3403_v0  ;;  %v3217_v45 = vadd.f32 %v6074_v53, %v6560_v3  ;;  %v3014_v1 = vrot.slane %v3013_v36, 2  ;;  %v3214_v39 = vrot.slane %v3213_v63, 1 }
 0x52e   : > { %v4504_v59 = vpop.eup %4503  ;;  %4519 = vpow2.f32 %v3126_v10  ;;  %v3224_v18 = vrot.slane %v3223_v33, 2  ;;  %v3208_v28 = vrot.slane %v3207_v42, 1  ;;  %v3240_v12 = vrot.slane %v6126_v62, 4  ;;  %v6561_v10 = vld [vmem:[#allocation20_spill] sm:$0xff] }
 0x52f   : > { %v4506_v26 = vpop.eup %4505  ;;  %v2803_v54 = vmul.f32 %v4504_v59, %v5852_v35  ;;  %4521 = vrcp.f32 %v3203_v34  ;;  %v3072_v11 = vsub.f32 %v6553_v60, %v6162_v20  ;;  %v3030_v52 = vrot.slane %v6561_v10, 4 }
 0x530   : > { %v2801_v29 = vmul.f32 %v4506_v26, %v5854_v2  ;;  %v6166_v16 = vpop.eup %4507  ;;  %4523 = vpow2.f32 %v3124_v21  ;;  %v3218_v2 = vrot.slane %v3217_v45, 2  ;;  %v3130_v51 = vmul.f32 1.442695, %v3073_v17 }
 0x531   : > { %v3406_v58 = vsel %vm3400_vm4, %v6123_v31, %v2803_v54  ;;  %v4510_v40 = vpop.eup %4509  ;;  %4525 = vrcp.f32 %v3197_v6  ;;  %v3022_v5 = vrot.slane %v3021_v9, 1  ;;  %v3015_v50 = vmax.f32 %v3013_v36, %v3014_v1 }
 0x532   : > { %3438 = vst [vmem:[%s6114_s27 + $0x28] sm:$0xff] %v3406_v58  ;;  %v3405_v35 = vsel %vm3400_vm4, %v3345_v48, %v2801_v29  ;;  %v2747_v49 = vpop.xlane.xlu0 %2746  ;;  %v4512_v27 = vpop.eup %4511  ;;  %v3351_v44 = vmul.f32 %v4510_v40, %v6034_v57  ;;  %v3215_v61 = vadd.f32 %v3214_v39, %v3213_v63  ;;  %v3225_v7 = vadd.f32 %v3224_v18, %v3223_v33  ;;  %v6564_v63 = vld [vmem:[#allocation21_spill] sm:$0xff] }
 0x533   : > { %3437 = vst [vmem:[%s6114_s27 + $0x20] sm:$0xff] %v3405_v35  ;;  %4527 = vrcp.f32 %v2747_v49  ;;  %v2745_v31 = vpop.xlane.xlu1 %2744  ;;  %v6562_v0 = vrot.slane %v6080_v23, 4  ;;  %v3209_v32 = vadd.f32 %v3208_v28, %v3207_v42  ;;  %v3219_v59 = vadd.f32 %v3218_v2, %v3217_v45 }
 0x534   : > { %4529 = vrcp.f32 %v2745_v31  ;;  %v6563_v48 = vrot.slane %v6083_v14, 4  ;;  %v3031_v57 = vmax.f32 %v6561_v10, %v3030_v52  ;;  %v3024_v33 = vrot.slane %v6564_v63, 4 }
 0x535   : > { %v4514_v25 = vpop.eup %4513  ;;  %v3235_v34 = vadd.f32 %v6080_v23, %v6562_v0  ;;  %v3349_v3 = vmul.f32 %v4512_v27, %v6041_v47  ;;  %4531 = vpow2.f32 %v3130_v51  ;;  %v3023_v17 = vmax.f32 %v3021_v9, %v3022_v5 }
 0x536   : > { %v4516_v60 = vpop.eup %4515  ;;  %v2807_v21 = vmul.f32 %v4514_v25, %v5860_v30  ;;  %v3229_v36 = vadd.f32 %v6083_v14, %v6563_v48  ;;  %v3016_v30 = vrot.slane %v3015_v50, 1  ;;  %4533 = vrcp.f32 %v3215_v61  ;;  %v6566_v48 = vld [vmem:[#allocation22_spill] sm:$0xff] }
 0x537   : > { %v6187_v6 = vpop.eup %4517  ;;  %v2805_v26 = vmul.f32 %v4516_v60, %v5862_v24  ;;  %v3226_v54 = vrot.slane %v3225_v7, 1  ;;  %v3236_v1 = vrot.slane %v3235_v34, 2  ;;  %v3258_v47 = vrot.slane %v6144_v4, 4 }
 0x538   : > { %v3408_v42 = vsel %vm3400_vm4, %v3351_v44, %v2807_v21  ;;  %v6195_v45 = vpop.eup %4519  ;;  %4535 = vrcp.f32 %v3209_v32  ;;  %v3220_v9 = vrot.slane %v3219_v59, 1  ;;  %v3230_v58 = vrot.slane %v3229_v36, 2 }
 0x539   : > { %3440 = vst [vmem:[%s6114_s27 + $0x38] sm:$0xff] %v3408_v42  ;;  %v3407_v20 = vsel %vm3400_vm4, %v3349_v3, %v2805_v26  ;;  %v4522_v29 = vpop.eup %4521  ;;  %v3252_v18 = vrot.slane %v6147_v8, 4  ;;  %v3032_v40 = vrot.slane %v3031_v57, 2  ;;  %v3025_v35 = vmax.f32 %v6564_v63, %v3024_v33 }
 0x53a   : > { %3439 = vst [vmem:[%s6114_s27 + $0x30] sm:$0xff] %v3407_v20  ;;  %v2751_v24 = vpop.xlane.xlu0 %2750  ;;  %v6202_v39 = vpop.eup %4523  ;;  %v3128_v2 = vmul.f32 1.442695, %v3072_v11  ;;  %v3075_v27 = vsub.f32 %v6555_v41, %v3023_v17  ;;  %v6207_v52 = vmax.f32 %v3015_v50, %v3016_v30  ;;  %v3355_v51 = vmul.f32 %v4522_v29, %v6045_v55  ;;  %v6565_v55 = vld [vmem:[#allocation24_spill] sm:$0xff] }
 0x53b   : > { %4537 = vrcp.f32 %v2751_v24  ;;  %v2749_v49 = vpop.xlane.xlu1 %2748  ;;  %v4526_v28 = vpop.eup %4525  ;;  %v3227_v5 = vadd.f32 %v3226_v54, %v3225_v7  ;;  %v3237_v25 = vadd.f32 %v3236_v1, %v3235_v34  ;;  %v3247_v44 = vadd.f32 %v6101_v38, %v3246_v46  ;;  %v6567_v24 = vld [vmem:[#allocation23_spill] sm:$0xff] }
 0x53c   : > { %4539 = vrcp.f32 %v2749_v49  ;;  %v3221_v60 = vadd.f32 %v3220_v9, %v3219_v59  ;;  %v3231_v11 = vadd.f32 %v3230_v58, %v3229_v36  ;;  %v3241_v41 = vadd.f32 %v6126_v62, %v3240_v12 }
 0x53d   : > { %v4528_v31 = vpop.eup %4527  ;;  %v3033_v50 = vmax.f32 %v3031_v57, %v3032_v40  ;;  %v3026_v21 = vrot.slane %v3025_v35, 2  ;;  %v3353_v32 = vmul.f32 %v4526_v28, %v6050_v19  ;;  %4541 = vpow2.f32 %v3128_v2 }
 0x53e   : > { %v4530_v61 = vpop.eup %4529  ;;  %v2811_v0 = vmul.f32 %v4528_v31, %v5868_v37  ;;  %v3134_v34 = vmul.f32 1.442695, %v3075_v27  ;;  %v3042_v33 = vrot.slane %v6566_v48, 4  ;;  %4543 = vrcp.f32 %v3227_v5  ;;  %v6568_v27 = vld [vmem:[#allocation25_spill] sm:$0xff] }
 0x53f   : > { %v2809_v7 = vmul.f32 %v4530_v61, %v6565_v55  ;;  %v3238_v12 = vrot.slane %v3237_v25, 1  ;;  %v3248_v59 = vrot.slane %v3247_v44, 2  ;;  %v6223_v36 = vpop.eup %4531  ;;  %v3270_v19 = vrot.slane %v6166_v16, 4 }
 0x540   : > { %v3410_v46 = vsel %vm3400_vm4, %v3355_v51, %v2811_v0  ;;  %4545 = vrcp.f32 %v3221_v60  ;;  %v3232_v3 = vrot.slane %v3231_v11, 1  ;;  %v3242_v26 = vrot.slane %v3241_v41, 2  ;;  %v4534_v17 = vpop.eup %4533 }
 0x541   : > { %3442 = vst [vmem:[%s6114_s27 + $0x48] sm:$0xff] %v3410_v46  ;;  %v3409_v37 = vsel %vm3400_vm4, %v3353_v32, %v2809_v7  ;;  %v3074_v30 = vsub.f32 %v6558_v43, %v6207_v52  ;;  %v3034_v42 = vrot.slane %v3033_v50, 1  ;;  %v3027_v20 = vmax.f32 %v3025_v35, %v3026_v21 }
 0x542   : > { %3441 = vst [vmem:[%s6114_s27 + $0x40] sm:$0xff] %v3409_v37  ;;  %v2755_v57 = vpop.xlane.xlu0 %2754  ;;  %v4536_v1 = vpop.eup %4535  ;;  %v3043_v29 = vmax.f32 %v6566_v48, %v3042_v33  ;;  %v3036_v9 = vrot.slane %v6567_v24, 4  ;;  %v3259_v58 = vadd.f32 %v6144_v4, %v3258_v47  ;;  %v3239_v49 = vadd.f32 %v3238_v12, %v3237_v25  ;;  %v6569_v47 = vld [vmem:[#allocation26_spill] sm:$0xff] }
 0x543   : > { %4547 = vrcp.f32 %v2755_v57  ;;  %v2753_v54 = vpop.xlane.xlu1 %2752  ;;  %v3249_v28 = vadd.f32 %v3248_v59, %v3247_v44  ;;  %v3253_v2 = vadd.f32 %v6147_v8, %v3252_v18  ;;  %v3359_v35 = vmul.f32 %v4534_v17, %v6053_v13 }
 0x544   : > { %4549 = vrcp.f32 %v2753_v54  ;;  %v3233_v31 = vadd.f32 %v3232_v3, %v3231_v11  ;;  %v3243_v51 = vadd.f32 %v3242_v26, %v3241_v41  ;;  %v3035_v5 = vmax.f32 %v3033_v50, %v3034_v42 }
 0x545   : > { %v4538_v40 = vpop.eup %4537  ;;  %4551 = vpow2.f32 %v3134_v34  ;;  %v3028_v61 = vrot.slane %v3027_v20, 1  ;;  %v3357_v0 = vmul.f32 %v4536_v1, %v6056_v15  ;;  %v3044_v21 = vrot.slane %v3043_v29, 2 }
 0x546   : > { %v4540_v43 = vpop.eup %4539  ;;  %v2815_v52 = vmul.f32 %v4538_v40, %v6568_v27  ;;  %v3037_v25 = vmax.f32 %v6567_v24, %v3036_v9  ;;  %v3260_v44 = vrot.slane %v3259_v58, 2  ;;  %4553 = vrcp.f32 %v3239_v49 }
 0x547   : > { %v2813_v60 = vmul.f32 %v4540_v43, %v6569_v47  ;;  %v3250_v11 = vrot.slane %v3249_v28, 1  ;;  %v3254_v41 = vrot.slane %v3253_v2, 2  ;;  %v6243_v50 = vpop.eup %4541  ;;  %v3264_v15 = vrot.slane %v6187_v6, 4 }
 0x548   : > { %v3412_v18 = vsel %vm3400_vm4, %v3359_v35, %v2815_v52  ;;  %v3282_v32 = vrot.slane %v6195_v45, 4  ;;  %4555 = vrcp.f32 %v3233_v31  ;;  %v3244_v7 = vrot.slane %v3243_v51, 1  ;;  %v4544_v34 = vpop.eup %4543 }
 0x549   : > { %3444 = vst [vmem:[%s6114_s27 + $0x58] sm:$0xff] %v3412_v18  ;;  %v3411_v13 = vsel %vm3400_vm4, %v3357_v0, %v2813_v60  ;;  %v3276_v33 = vrot.slane %v6202_v39, 4  ;;  %v3132_v46 = vmul.f32 1.442695, %v3074_v30  ;;  %v3029_v37 = vmax.f32 %v3027_v20, %v3028_v61  ;;  %v6570_v30 = vld [vmem:[#allocation27_spill] sm:$0xff] }
 0x54a   : > { %3443 = vst [vmem:[%s6114_s27 + $0x50] sm:$0xff] %v3411_v13  ;;  %v2759_v55 = vpop.xlane.xlu0 %2758  ;;  %v4546_v59 = vpop.eup %4545  ;;  %v3045_v57 = vmax.f32 %v3043_v29, %v3044_v21  ;;  %v3038_v3 = vrot.slane %v3037_v25, 2  ;;  %v3261_v26 = vadd.f32 %v3260_v44, %v3259_v58  ;;  %v3077_v42 = vsub.f32 %v6561_v10, %v3035_v5 }
 0x54b   : > { %4557 = vrcp.f32 %v2759_v55  ;;  %v2757_v12 = vpop.xlane.xlu1 %2756  ;;  %v3251_v54 = vadd.f32 %v3250_v11, %v3249_v28  ;;  %v3255_v1 = vadd.f32 %v3254_v41, %v3253_v2  ;;  %v3271_v9 = vadd.f32 %v6166_v16, %v3270_v19  ;;  %v6571_v28 = vld [vmem:[#allocation28_spill] sm:$0xff] }
 0x54c   : > { %4559 = vrcp.f32 %v2757_v12  ;;  %v3363_v49 = vmul.f32 %v4544_v34, %v6065_v22  ;;  %v3245_v43 = vadd.f32 %v3244_v7, %v3243_v51  ;;  %v3265_v29 = vadd.f32 %v6187_v6, %v3264_v15  ;;  %v6572_v34 = vld [vmem:[#allocation29_spill] sm:$0xff] }
 0x54d   : > { %v4548_v17 = vpop.eup %4547  ;;  %4561 = vpow2.f32 %v3132_v46  ;;  %v3076_v58 = vsub.f32 %v6564_v63, %v3029_v37  ;;  %v3361_v10 = vmul.f32 %v4546_v59, %v6074_v53  ;;  %v3046_v19 = vrot.slane %v3045_v57, 1 }
 0x54e   : > { %v4550_v40 = vpop.eup %4549  ;;  %v2819_v20 = vmul.f32 %v4548_v17, %v6570_v30  ;;  %v3039_v27 = vmax.f32 %v3037_v25, %v3038_v3  ;;  %v3262_v52 = vrot.slane %v3261_v26, 1  ;;  %v3138_v31 = vmul.f32 1.442695, %v3077_v42  ;;  %v6573_v3 = vld [vmem:[#allocation30_spill] sm:$0xff] }
 0x54f   : > { %v6254_v35 = vpop.eup %4551  ;;  %v2817_v2 = vmul.f32 %v4550_v40, %v6571_v28  ;;  %4563 = vrcp.f32 %v3251_v54  ;;  %v3272_v5 = vrot.slane %v3271_v9, 2  ;;  %v3256_v63 = vrot.slane %v3255_v1, 1 }
 0x550   : > { %v3414_v22 = vsel %vm3400_vm4, %v3363_v49, %v2819_v20  ;;  %4565 = vrcp.f32 %v3245_v43  ;;  %v3266_v53 = vrot.slane %v3265_v29, 2  ;;  %v4554_v0 = vpop.eup %4553  ;;  %v3136_v47 = vmul.f32 1.442695, %v3076_v58 }
 0x551   : > { %3446 = vst [vmem:[%s6114_s27 + $0x68] sm:$0xff] %v3414_v22  ;;  %v3413_v51 = vsel %vm3400_vm4, %v3361_v10, %v2817_v2  ;;  %v3047_v25 = vmax.f32 %v3045_v57, %v3046_v19  ;;  %v3040_v18 = vrot.slane %v3039_v27, 1  ;;  %v3263_v44 = vadd.f32 %v3262_v52, %v3261_v26  ;;  %v6574_v52 = vld [vmem:[#allocation31_spill] sm:$0xff] }
 0x552   : > { %3445 = vst [vmem:[%s6114_s27 + $0x60] sm:$0xff] %v3413_v51  ;;  %v2763_v61 = vpop.xlane.xlu0 %2762  ;;  %v4556_v21 = vpop.eup %4555  ;;  %v3273_v11 = vadd.f32 %v3272_v5, %v3271_v9  ;;  %v3283_v41 = vadd.f32 %v6195_v45, %v3282_v32  ;;  %v3277_v15 = vadd.f32 %v6202_v39, %v3276_v33  ;;  %v3367_v7 = vmul.f32 %v4554_v0, %v6080_v23 }
 0x553   : > { %4567 = vrcp.f32 %v2763_v61  ;;  %v2761_v60 = vpop.xlane.xlu1 %2760  ;;  %v3257_v37 = vadd.f32 %v3256_v63, %v3255_v1  ;;  %v3267_v12 = vadd.f32 %v3266_v53, %v3265_v29  ;;  %v3294_v59 = vrot.slane %v6223_v36, 4  ;;  %v6575_v53 = vld [vmem:[#allocation32_spill] sm:$0xff] }
 0x554   : > { %4569 = vrcp.f32 %v2761_v60  ;;  %v3365_v57 = vmul.f32 %v4556_v21, %v6083_v14  ;;  %v3079_v32 = vsub.f32 %v6566_v48, %v3047_v25  ;;  %v3041_v17 = vmax.f32 %v3039_v27, %v3040_v18 }
 0x555   : > { %v4558_v13 = vpop.eup %4557  ;;  %4571 = vpow2.f32 %v3138_v31  ;;  %v3274_v54 = vrot.slane %v3273_v11, 1  ;;  %v3284_v1 = vrot.slane %v3283_v41, 2  ;;  %v3278_v9 = vrot.slane %v3277_v15, 2 }
 0x556   : > { %v4560_v55 = vpop.eup %4559  ;;  %v2823_v46 = vmul.f32 %v4558_v13, %v6572_v34  ;;  %4573 = vpow2.f32 %v3136_v47  ;;  %v3288_v14 = vrot.slane %v6243_v50, 4  ;;  %v3268_v48 = vrot.slane %v3267_v12, 1 }
 0x557   : > { %v2821_v26 = vmul.f32 %v4560_v55, %v6573_v3  ;;  %4575 = vrcp.f32 %v3263_v44  ;;  %v6275_v23 = vpop.eup %4561  ;;  %v3142_v43 = vmul.f32 1.442695, %v3079_v32  ;;  %v3078_v29 = vsub.f32 %v6567_v24, %v3041_v17  ;;  %v6576_v3 = vld [vmem:[#allocation33_spill] sm:$0xff] }
 0x558   : > { %v3416_v33 = vsel %vm3400_vm4, %v3367_v7, %v2823_v46  ;;  %4577 = vrcp.f32 %v3257_v37  ;;  %v3295_v58 = vadd.f32 %v6223_v36, %v3294_v59  ;;  %v3275_v28 = vadd.f32 %v3274_v54, %v3273_v11 }
 0x559   : > { %3448 = vst [vmem:[%s6114_s27 + $0x78] sm:$0xff] %v3416_v33  ;;  %v3415_v42 = vsel %vm3400_vm4, %v3365_v57, %v2821_v26  ;;  %v4564_v49 = vpop.eup %4563  ;;  %v3285_v2 = vadd.f32 %v3284_v1, %v3283_v41  ;;  %v3279_v19 = vadd.f32 %v3278_v9, %v3277_v15  ;;  %v3269_v51 = vadd.f32 %v3268_v48, %v3267_v12 }
 0x55a   : > { %3447 = vst [vmem:[%s6114_s27 + $0x70] sm:$0xff] %v3415_v42  ;;  %v2767_v40 = vpop.xlane.xlu0 %2766  ;;  %v4566_v20 = vpop.eup %4565  ;;  %v3371_v22 = vmul.f32 %v4564_v49, %v6101_v38  ;;  %v3289_v5 = vadd.f32 %v6243_v50, %v3288_v14  ;;  %v3306_v24 = vrot.slane %v6254_v35, 4  ;;  %v3140_v47 = vmul.f32 1.442695, %v3078_v29  ;;  %v6577_v42 = vld [vmem:[#allocation34_spill] sm:$0xff] }
 0x55b   : > { %4579 = vrcp.f32 %v2767_v40  ;;  %v2765_v30 = vpop.xlane.xlu1 %2764  ;;  %v3369_v63 = vmul.f32 %v4566_v20, %v6126_v62  ;;  %v3296_v38 = vrot.slane %v3295_v58, 2  ;;  %v3286_v18 = vrot.slane %v3285_v2, 1 }
 0x55c   : > { %4581 = vrcp.f32 %v2765_v30  ;;  %v3280_v44 = vrot.slane %v3279_v19, 1  ;;  %v3300_v62 = vrot.slane %v6275_v23, 4  ;;  %v3290_v41 = vrot.slane %v3289_v5, 2 }
 0x55d   : > { %v4568_v10 = vpop.eup %4567  ;;  %4583 = vpow2.f32 %v3142_v43  ;;  %v3297_v7 = vadd.f32 %v3296_v38, %v3295_v58  ;;  %v3287_v46 = vadd.f32 %v3286_v18, %v3285_v2  ;;  %v3307_v12 = vadd.f32 %v6254_v35, %v3306_v24 }
 0x55e   : > { %v4570_v27 = vpop.eup %4569  ;;  %v2827_v31 = vmul.f32 %v4568_v10, %v6574_v52  ;;  %4585 = vrcp.f32 %v3275_v28  ;;  %v3281_v37 = vadd.f32 %v3280_v44, %v3279_v19  ;;  %v3291_v32 = vadd.f32 %v3290_v41, %v3289_v5 }
 0x55f   : > { %v6287_v61 = vpop.eup %4571  ;;  %v2825_v0 = vmul.f32 %v4570_v27, %v6575_v53  ;;  %4587 = vrcp.f32 %v3269_v51  ;;  %v3301_v17 = vadd.f32 %v6275_v23, %v3300_v62  ;;  %v3298_v14 = vrot.slane %v3297_v7, 1 }
 0x560   : > { %v3418_v60 = vsel %vm3400_vm4, %v3371_v22, %v2827_v31  ;;  %v6294_v21 = vpop.eup %4573  ;;  %v3318_v1 = vrot.slane %v6287_v61, 4  ;;  %v3308_v48 = vrot.slane %v3307_v12, 2  ;;  %v3292_v30 = vrot.slane %v3291_v32, 1  ;;  %v6578_v31 = vld [vmem:[#allocation35_spill] sm:$0xff] }
 0x561   : > { %3450 = vst [vmem:[%s6114_s27 + $0x88] sm:$0xff] %v3418_v60  ;;  %v3417_v25 = vsel %vm3400_vm4, %v3369_v63, %v2825_v0  ;;  %v4576_v13 = vpop.eup %4575  ;;  %v3312_v40 = vrot.slane %v6294_v21, 4  ;;  %v3302_v20 = vrot.slane %v3301_v17, 2  ;;  %v3299_v10 = vadd.f32 %v3298_v14, %v3297_v7  ;;  %v6579_v0 = vld [vmem:[#allocation36_spill] sm:$0xff] }
 0x562   : > { %3449 = vst [vmem:[%s6114_s27 + $0x80] sm:$0xff] %v3417_v25  ;;  %v2771_v11 = vpop.xlane.xlu0 %2770  ;;  %v4578_v55 = vpop.eup %4577  ;;  %v3375_v57 = vmul.f32 %v4576_v13, %v6144_v4  ;;  %v3309_v2 = vadd.f32 %v3308_v48, %v3307_v12  ;;  %v3319_v19 = vadd.f32 %v6287_v61, %v3318_v1  ;;  %v3293_v5 = vadd.f32 %v3292_v30, %v3291_v32 }
 0x563   : > { %4589 = vrcp.f32 %v2771_v11  ;;  %v2769_v15 = vpop.xlane.xlu1 %2768  ;;  %v3373_v33 = vmul.f32 %v4578_v55, %v6147_v8  ;;  %v3313_v27 = vadd.f32 %v6294_v21, %v3312_v40  ;;  %v3303_v24 = vadd.f32 %v3302_v20, %v3301_v17 }
 0x564   : > { %4591 = vrcp.f32 %v2769_v15  ;;  %v3310_v25 = vrot.slane %v3309_v2, 1  ;;  %v3320_v18 = vrot.slane %v3319_v19, 2 }
 0x565   : > { %v4580_v34 = vpop.eup %4579  ;;  %4593 = vpow2.f32 %v3140_v47  ;;  %v3314_v44 = vrot.slane %v3313_v27, 2 }
 0x566   : > { %v4582_v59 = vpop.eup %4581  ;;  %v2831_v26 = vmul.f32 %v4580_v34, %v6576_v3  ;;  %4595 = vrcp.f32 %v3287_v46  ;;  %v3311_v7 = vadd.f32 %v3310_v25, %v3309_v2  ;;  %v3321_v34 = vadd.f32 %v3320_v18, %v3319_v19  ;;  %v6584_v25 = vld [vmem:[#allocation41_spill] sm:$0xff] }
 0x567   : > { %v2829_v54 = vmul.f32 %v4582_v59, %v6577_v42  ;;  %v6314_v49 = vpop.eup %4583  ;;  %4597 = vrcp.f32 %v3281_v37  ;;  %v3315_v46 = vadd.f32 %v3314_v44, %v3313_v27 }
 0x568   : > { %v3420_v9 = vsel %vm3400_vm4, %v3375_v57, %v2831_v26  ;;  %v4586_v43 = vpop.eup %4585  ;;  %v3330_v60 = vrot.slane %v6314_v49, 4  ;;  %v6580_v57 = vld [vmem:[#allocation37_spill] sm:$0xff] }
 0x569   : > { %3452 = vst [vmem:[%s6114_s27 + $0x98] sm:$0xff] %v3420_v9  ;;  %v3419_v4 = vsel %vm3400_vm4, %v3373_v33, %v2829_v54  ;;  %v4588_v58 = vpop.eup %4587  ;;  %v3379_v52 = vmul.f32 %v4586_v43, %v6166_v16  ;;  %v6581_v33 = vld [vmem:[#allocation38_spill] sm:$0xff]  ;;  %v3322_v9 = vrot.slane %v3321_v34, 1 }
 0x56a   : > { %3451 = vst [vmem:[%s6114_s27 + $0x90] sm:$0xff] %v3419_v4  ;;  %v2775_v8 = vpop.xlane.xlu0 %2774  ;;  %v3377_v53 = vmul.f32 %v4588_v58, %v6187_v6  ;;  %v3304_v6 = vrot.slane %v3303_v24, 1  ;;  %v3331_v37 = vadd.f32 %v6314_v49, %v3330_v60  ;;  %v3316_v4 = vrot.slane %v3315_v46, 1 }
 0x56b   : > { %4599 = vrcp.f32 %v2775_v8  ;;  %v2773_v29 = vpop.xlane.xlu1 %2772  ;;  %v3323_v20 = vadd.f32 %v3322_v9, %v3321_v34 }
 0x56c   : > { %4601 = vrcp.f32 %v2773_v29  ;;  %v3305_v26 = vadd.f32 %v3304_v6, %v3303_v24  ;;  %v3332_v14 = vrot.slane %v3331_v37, 2  ;;  %v3317_v2 = vadd.f32 %v3316_v4, %v3315_v46 }
 0x56d   : > { %v4590_v28 = vpop.eup %4589  ;;  %4603 = vrcp.f32 %v3299_v10  ;;  %v6582_v10 = vld [vmem:[#allocation39_spill] sm:$0xff] }
 0x56e   : > { %v4592_v22 = vpop.eup %4591  ;;  %v2835_v51 = vmul.f32 %v4590_v28, %v6578_v31  ;;  %4605 = vrcp.f32 %v3293_v5  ;;  %v3333_v43 = vadd.f32 %v3332_v14, %v3331_v37  ;;  %v6586_v37 = vld [vmem:[#allocation43_spill] sm:$0xff]  ;;  %v6589_v14 = vld [vmem:[#allocation46_spill] sm:$0xff] }
 0x56f   : > { %v6321_v63 = vpop.eup %4593  ;;  %v2833_v47 = vmul.f32 %v4592_v22, %v6579_v0  ;;  %v6583_v22 = vld [vmem:[#allocation40_spill] sm:$0xff] }
 0x570   : > { %v3422_v38 = vsel %vm3400_vm4, %v3379_v52, %v2835_v51  ;;  %v3324_v13 = vrot.slane %v6321_v63, 4  ;;  %v4596_v11 = vpop.eup %4595  ;;  %v3334_v5 = vrot.slane %v3333_v43, 1 }
 0x571   : > { %3454 = vst [vmem:[%s6114_s27 + $0xa8] sm:$0xff] %v3422_v38  ;;  %v3421_v16 = vsel %vm3400_vm4, %v3377_v53, %v2833_v47  ;;  %v4598_v15 = vpop.eup %4597  ;;  %v3383_v59 = vmul.f32 %v4596_v11, %v6195_v45 }
 0x572   : > { %3453 = vst [vmem:[%s6114_s27 + $0xa0] sm:$0xff] %v3421_v16  ;;  %v2779_v62 = vpop.xlane.xlu0 %2778  ;;  %v3325_v32 = vadd.f32 %v6321_v63, %v3324_v13  ;;  %v3381_v17 = vmul.f32 %v4598_v15, %v6202_v39  ;;  %v3335_v60 = vadd.f32 %v3334_v5, %v3333_v43 }
 0x573   : > { %4607 = vrcp.f32 %v2779_v62  ;;  %v2777_v41 = vpop.xlane.xlu1 %2776  ;;  %v6585_v62 = vld [vmem:[#allocation42_spill] sm:$0xff] }
 0x574   : > { %4609 = vrcp.f32 %v2777_v41  ;;  %v3326_v48 = vrot.slane %v3325_v32, 2 }
 0x575   : > { %v4600_v55 = vpop.eup %4599  ;;  %4611 = vrcp.f32 %v3311_v7 }
 0x576   : > { %v4602_v12 = vpop.eup %4601  ;;  %v2839_v3 = vmul.f32 %v4600_v55, %v6580_v57  ;;  %4613 = vrcp.f32 %v3305_v26  ;;  %v3327_v19 = vadd.f32 %v3326_v48, %v3325_v32  ;;  %v6587_v57 = vld [vmem:[#allocation44_spill] sm:$0xff] }
 0x577   : > { %v2837_v42 = vmul.f32 %v4602_v12, %v6581_v33  ;;  %v4604_v45 = vpop.eup %4603 }
 0x578   : > { %v3424_v54 = vsel %vm3400_vm4, %v3383_v59, %v2839_v3  ;;  %v4606_v8 = vpop.eup %4605  ;;  %v3387_v58 = vmul.f32 %v4604_v45, %v6223_v36  ;;  %v3328_v36 = vrot.slane %v3327_v19, 1 }
 0x579   : > { %3456 = vst [vmem:[%s6114_s27 + $0xb8] sm:$0xff] %v3424_v54  ;;  %v3423_v1 = vsel %vm3400_vm4, %v3381_v17, %v2837_v42  ;;  %v3385_v27 = vmul.f32 %v4606_v8, %v6243_v50  ;;  %v6588_v54 = vld [vmem:[#allocation45_spill] sm:$0xff] }
 0x57a   : > { %3455 = vst [vmem:[%s6114_s27 + $0xb0] sm:$0xff] %v3423_v1  ;;  %v2783_v40 = vpop.xlane.xlu0 %2782  ;;  %v3329_v44 = vadd.f32 %v3328_v36, %v3327_v19 }
 0x57b   : > { %4615 = vrcp.f32 %v2783_v40  ;;  %v2781_v39 = vpop.xlane.xlu1 %2780 }
 0x57c   : > { %4617 = vrcp.f32 %v2781_v39 }
 0x57d   : > { %v4608_v30 = vpop.eup %4607  ;;  %4619 = vrcp.f32 %v3323_v20 }
 0x57e   : > { %v4610_v29 = vpop.eup %4609  ;;  %v2843_v28 = vmul.f32 %v4608_v30, %v6582_v10  ;;  %4621 = vrcp.f32 %v3317_v2 }
 0x57f   : > { %v2841_v52 = vmul.f32 %v4610_v29, %v6583_v22  ;;  %v4612_v53 = vpop.eup %4611 }
 0x580   : > { %v3426_v31 = vsel %vm3400_vm4, %v3387_v58, %v2843_v28  ;;  %v4614_v0 = vpop.eup %4613  ;;  %v3391_v16 = vmul.f32 %v4612_v53, %v6254_v35 }
 0x581   : > { %3458 = vst [vmem:[%s6114_s27 + $0xc8] sm:$0xff] %v3426_v31  ;;  %v3425_v51 = vsel %vm3400_vm4, %v3385_v27, %v2841_v52  ;;  %v3389_v13 = vmul.f32 %v4614_v0, %v6275_v23 }
 0x582   : > { %3457 = vst [vmem:[%s6114_s27 + $0xc0] sm:$0xff] %v3425_v51  ;;  %v2787_v24 = vpop.xlane.xlu0 %2786 }
 0x583   : > { %4623 = vrcp.f32 %v2787_v24  ;;  %v2785_v50 = vpop.xlane.xlu1 %2784 }
 0x584   : > { %4625 = vrcp.f32 %v2785_v50 }
 0x585   : > { %v4616_v47 = vpop.eup %4615  ;;  %4627 = vrcp.f32 %v3335_v60 }
 0x586   : > { %v4618_v38 = vpop.eup %4617  ;;  %v2847_v18 = vmul.f32 %v4616_v47, %v6584_v25  ;;  %4629 = vrcp.f32 %v3329_v44 }
 0x587   : > { %v2845_v6 = vmul.f32 %v4618_v38, %v6585_v62  ;;  %v4620_v35 = vpop.eup %4619 }
 0x588   : > { %v3428_v11 = vsel %vm3400_vm4, %v3391_v16, %v2847_v18  ;;  %v4622_v23 = vpop.eup %4621  ;;  %v3395_v46 = vmul.f32 %v4620_v35, %v6287_v61 }
 0x589   : > { %3460 = vst [vmem:[%s6114_s27 + $0xd8] sm:$0xff] %v3428_v11  ;;  %v3427_v41 = vsel %vm3400_vm4, %v3389_v13, %v2845_v6  ;;  %v3393_v59 = vmul.f32 %v4622_v23, %v6294_v21 }
 0x58a   : > { %3459 = vst [vmem:[%s6114_s27 + $0xd0] sm:$0xff] %v3427_v41  ;;  %v2791_v15 = vpop.xlane.xlu0 %2790 }
 0x58b   : > { %4631 = vrcp.f32 %v2791_v15  ;;  %v2789_v55 = vpop.xlane.xlu1 %2788 }
 0x58c   : > { %4633 = vrcp.f32 %v2789_v55 }
 0x58d   : > { %v4624_v7 = vpop.eup %4623 }
 0x58e   : > { %v4626_v34 = vpop.eup %4625  ;;  %v2851_v12 = vmul.f32 %v4624_v7, %v6586_v37 }
 0x58f   : > { %v2849_v3 = vmul.f32 %v4626_v34, %v6587_v57  ;;  %v4628_v17 = vpop.eup %4627 }
 0x590   : > { %v3430_v26 = vsel %vm3400_vm4, %v3395_v46, %v2851_v12  ;;  %v4630_v33 = vpop.eup %4629  ;;  %v3399_v42 = vmul.f32 %v4628_v17, %v6314_v49 }
 0x591   : > { %3462 = vst [vmem:[%s6114_s27 + $0xe8] sm:$0xff] %v3430_v26  ;;  %v3429_v32 = vsel %vm3400_vm4, %v3393_v59, %v2849_v3  ;;  %v3397_v9 = vmul.f32 %v4630_v33, %v6321_v63 }
 0x592   : > { %3461 = vst [vmem:[%s6114_s27 + $0xe0] sm:$0xff] %v3429_v32 }
 0x595   : > { %v4632_v61 = vpop.eup %4631 }
 0x596   : > { %v4634_v21 = vpop.eup %4633  ;;  %v2855_v1 = vmul.f32 %v4632_v61, %v6588_v54 }
 0x597   : > { %v2853_v45 = vmul.f32 %v4634_v21, %v6589_v14 }
 0x598   : > { %v3432_v40 = vsel %vm3400_vm4, %v3399_v42, %v2855_v1 }
 0x599   : > { %3464 = vst [vmem:[%s6114_s27 + $0xf8] sm:$0xff] %v3432_v40  ;;  %v3431_v49 = vsel %vm3400_vm4, %v3397_v9, %v2853_v45 }
 0x59a   : > { %3463 = vst [vmem:[%s6114_s27 + $0xf0] sm:$0xff] %v3431_v49 }
 0x59b   : > { %4678 = shalt.err (!%p4675_p4)
}
 0x59c   : > { %s4679_s29 = scalar_lea.hbm %s6384_s23, 4096  ;;  %s4683_s12 = scalar_lea.hbm %s6446_s10, 8192 }
 0x59d   : > { %p4680_p5 = scmp.ne.s32.totalorder %s6384_s23, %s4679_s29  ;;  %p4684_p1 = scmp.lt.u32.totalorder %s6384_s23, %s6446_s10 }
 0x59e   : > { %p4685_p3 = scmp.lt.u32.totalorder %s4683_s12, %s4679_s29  ;;  %p4687_p6 = scmp.lt.u32.totalorder %s4679_s29, %s6384_s23 }
 0x59f   : > { %p4681_p7 = pnand %p4680_p5, %p6590_p12 }
 0x5a0   : > { %p4686_p11 = por %p4685_p3, %p4684_p1 }
 0x5a1   : > { %p4682_p9 = pneg %p4681_p7 }
 0x5a2   : > { %p4688_p13 = por %p4687_p6, %p4686_p11 }
 0x5a4   : > { %p4689_p8 = pnand %p4688_p13, %p4682_p9 }
 0x5a6   : > { %4692 = shalt.err (!%p4689_p8)
}
 0x5a7   : > { %s4739_s21 = smov 128   ;;  %s4740_s24 = smov 8  }
 0x5a8   : > { %4329 = dma.vmem_to_hbm [thread:$0]  (%p6590_p12), %s6386_s22, 4096, %s6384_s23, %s3466_s17, %s4739_s21, %s4739_s21, %s4740_s24  }
 0x5a9 PF: > { %s3494_s30 = sand.u32 1, %s4719_s13   ;;  %p6591_p10 = scmp.ne.s32.totalorder %s6505_s26, 0 }
 0x5aa   : > { %p6592_p0 = scmp.ge.s32.totalorder %s4731_s16, 2  ;;  %s3495_s29 = scalar_lea.sflag [#allocation4], %s3494_s30 }
 0x5ac   : > { %p4336_p2 = pnand %p6592_p0, %p6591_p10 }
 0x5ae   : > { %4714 = dma.done.wait (!%p4336_p2), %s3495_s29, 4096  }
 0x5af   : > { %4716 = vsyncadd (!%p4336_p2), %s3495_s29, 4294963200  ;;  %s6593_s27 = sld [smem:[#allocation8_spill]]  ;;  %p23_p4 = scmp.ge.s32.totalorder %s4821_s19, 4  }
 0x5b0   : > { %s6594_s13 = smov %s4723_s14  ;;  %s6595_s14 = smov %s4727_s15 }
 0x5b1   : > { %s6597_s16 = smov %s4821_s19  ;;  %25 = sbr.rel (!%p23_p4) target bundleno = 5 (0x5), region = 108 }
 0x5b5   : > { %s6596_s15 = smov %s6593_s27 }
 0x5b8   :  { %3500 = vsyncpa [#allocation3], 1 }
 0x5b9   :  { %3502 = vsyncpa [#allocation3 + $0x1], 1 }
 0x5ba   :  { %3503 = vsyncpa [#allocation4], 1 }
 0x5bb   :  { %3505 = vsyncpa [#allocation4 + $0x1], 1 }

</bundles_post_ra>
